<compile_context>
chip_gen: v7x
topology: tpu7x:2x2x1
jax: 0.10.0
libtpu: 0.0.40
codegen_flags: <defaults>
</compile_context>

<pallas_src>
import jax
import jax.numpy as jnp
from jax.experimental import pallas as pl
from jax.experimental.pallas import tpu as pltpu

LANE = 128       # lane-dense padding for the head output / head widths
ROW_ALIGN = 16   # bf16 sublane tile height -> aligned static slices in the slab


# ------------------------------ fused kernel ---------------------------------
def make_fused_kernel(T, B, D, H, offs, out_rows):
    G = 4 * H

    def kernel(x_ref, w_ref, b_ref, out_ref, y_sc, hn_sc):
        # ---- hoisted constants (JAX does not CSE broadcasts) ----
        lane = jax.lax.broadcasted_iota(jnp.int32, (B, G), 1)
        g_mask = (lane >= 2 * H) & (lane < 3 * H)
        act_scale = jnp.where(g_mask, 2.0, 1.0)   # g lanes carry sigmoid(2x)
        act_shift = jnp.where(g_mask, -1.0, 0.0)  # 2*sigmoid(2x)-1 == tanh(x)

        x_bf = x_ref[...]                         # (T*B, D) bf16

        def w_at(name, rows, cols):
            r0 = offs[name]
            return w_ref[r0:r0 + rows, :cols]     # bf16, static aligned slice

        def b_at(row, cols):
            return b_ref[row:row + 1, :cols]      # f32 (1, cols)

        wih_s1l0 = w_at("s1l0_wih", D, G); whh_s1l0 = w_at("s1l0_whh", H, G)
        wih_s1l1 = w_at("s1l1_wih", H, G); whh_s1l1 = w_at("s1l1_whh", H, G)
        wih_s2l0 = w_at("s2l0_wih", D, G); whh_s2l0 = w_at("s2l0_whh", H, G)
        wih_s2l1 = w_at("s2l1_wih", H, G); whh_s2l1 = w_at("s2l1_whh", H, G)
        fc1_w = w_at("fc1_w", H, LANE);    fc_w = w_at("fc_w", LANE, LANE)

        b_s1l0 = b_at(0, G); b_s1l1 = b_at(1, G)
        b_s2l0 = b_at(2, G); b_s2l1 = b_at(3, G)
        fc1_b = b_at(4, LANE); fc_b = b_at(5, LANE)

        def cell(xg, h, c, whh):
            # xg: (B, 4H) f32 precomputed x@W_ih + b for this timestep.
            gates = xg + jnp.dot(h.astype(jnp.bfloat16), whh,
                                 preferred_element_type=jnp.float32)
            sig = jax.nn.sigmoid(gates)           # single full-width EUP pass
            act = sig * act_scale + act_shift     # i,f,o: sigmoid ; g: tanh
            i_g = act[:, 0:H]
            f_g = act[:, H:2 * H]
            g_g = act[:, 2 * H:3 * H]
            o_g = act[:, 3 * H:4 * H]
            c = f_g * c + i_g * g_g
            h = o_g * jnp.tanh(c)
            return h, c

        zero = jnp.zeros((B, H), jnp.float32)

        # Off-recurrence input projections for both layer-0 cells (independent
        # of any recurrent state; scheduler can overlap them with phase 1).
        xp_s1l0 = jnp.dot(x_bf, wih_s1l0,
                          preferred_element_type=jnp.float32) + b_s1l0
        xp_s2l0 = jnp.dot(x_bf, wih_s2l0,
                          preferred_element_type=jnp.float32) + b_s2l0

        # ---- phase 1: stack1 layer0 (T serial steps) ----
        h, c = zero, zero
        for t in range(T):                        # static unroll
            h, c = cell(xp_s1l0[t * B:(t + 1) * B, :], h, c, whh_s1l0)
            y_sc[t * B:(t + 1) * B, :] = h        # output seq stays in VMEM
        h10, c10 = h, c

        # stack1-layer1 input projection (consumes the full s1l0 sequence).
        xp_s1l1 = jnp.dot(y_sc[...].astype(jnp.bfloat16), wih_s1l1,
                          preferred_element_type=jnp.float32) + b_s1l1

        # ---- phase 2: stack1 layer1 || stack2 layer0, interleaved ----
        # Both become ready once s1l0 finishes; two independent dependence
        # chains per step fill the otherwise idle unit slots.
        h_a, c_a = zero, zero                     # stack1 layer1
        h_b, c_b = h10, c10                       # stack2 layer0 (init = s1l0 final)
        for t in range(T):
            h_a, c_a = cell(xp_s1l1[t * B:(t + 1) * B, :], h_a, c_a, whh_s1l1)
            h_b, c_b = cell(xp_s2l0[t * B:(t + 1) * B, :], h_b, c_b, whh_s2l0)
            y_sc[t * B:(t + 1) * B, :] = h_b      # s2l0 output seq (scratch reuse)
        h11, c11 = h_a, c_a
        h20 = h_b

        # stack2-layer1 input projection.
        xp_s2l1 = jnp.dot(y_sc[...].astype(jnp.bfloat16), wih_s2l1,
                          preferred_element_type=jnp.float32) + b_s2l1

        # ---- phase 3: stack2 layer1 (T serial steps) ----
        h, c = h11, c11                           # init = s1l1 final
        for t in range(T):
            h, c = cell(xp_s2l1[t * B:(t + 1) * B, :], h, c, whh_s2l1)
        h21 = h

        # ---- head: relu -> fc1 -> relu -> fc, batched over both layers ----
        hn_sc[...] = jnp.zeros((out_rows, H), jnp.float32)
        hn_sc[0:B, :] = h20                       # row order = l*B + b (as hn.view)
        hn_sc[B:2 * B, :] = h21
        hr = jnp.maximum(hn_sc[...], 0.0).astype(jnp.bfloat16)
        z = jnp.maximum(
            jnp.dot(hr, fc1_w, preferred_element_type=jnp.float32) + fc1_b, 0.0)
        out = jnp.dot(z.astype(jnp.bfloat16), fc_w,
                      preferred_element_type=jnp.float32) + fc_b
        out_ref[...] = out                        # single full-sublane store

    return kernel


# ------------------------------ params & forward ------------------------------
def init_params(key, num_classes, input_size, hidden_size, num_layers):
    params = {"lstm1": [], "lstm2": []}
    keys = jax.random.split(key, 8 * num_layers + 4)
    idx = 0
    k_lstm = 1.0 / float(hidden_size) ** 0.5

    def u(kk, shape, bound):
        return jax.random.uniform(kk, shape, jnp.float32, -bound, bound)

    for name in ("lstm1", "lstm2"):
        for l in range(num_layers):
            d_in = input_size if l == 0 else hidden_size
            wih = u(keys[idx], (d_in, 4 * hidden_size), k_lstm); idx += 1
            whh = u(keys[idx], (hidden_size, 4 * hidden_size), k_lstm); idx += 1
            bih = u(keys[idx], (4 * hidden_size,), k_lstm); idx += 1
            bhh = u(keys[idx], (4 * hidden_size,), k_lstm); idx += 1
            params[name].append((wih, whh, bih + bhh))

    k_fc1 = 1.0 / float(hidden_size) ** 0.5
    k_fc2 = 1.0 / float(128) ** 0.5
    params["fc1_w"] = u(keys[idx], (hidden_size, 128), k_fc1); idx += 1
    params["fc1_b"] = u(keys[idx], (128,), k_fc1); idx += 1
    params["fc_w"] = u(keys[idx], (128, num_classes), k_fc2); idx += 1
    params["fc_b"] = u(keys[idx], (num_classes,), k_fc2); idx += 1
    return params


def my_lstm_forward(x_btd, params, num_layers, hidden_size, num_classes):
    assert num_layers == 2, "fused kernel is specialized for num_layers == 2"
    B, T, D = x_btd.shape
    H = hidden_size
    G = 4 * H
    assert num_classes <= LANE
    width = max(G, LANE)

    def scale_g(w):
        # Pre-scale the tanh-gate (g) columns by 2 so the kernel only needs one
        # sigmoid pass: tanh(x) = 2*sigmoid(2x) - 1 (exact scaling, no rounding).
        return w.at[..., 2 * H:3 * H].multiply(2.0)

    # Time-major rows: row t*B + b == x[b, t, :]; bf16 operands for the MXU.
    x2d = jnp.transpose(x_btd, (1, 0, 2)).reshape(T * B, D).astype(jnp.bfloat16)

    # ---- pack all matmul weights into ONE bf16 slab (16-row aligned blocks)
    #      and all biases into ONE small f32 slab -> 3 prologue DMAs total ----
    entries = []
    for si, name in enumerate(("lstm1", "lstm2")):
        for l in range(num_layers):
            wih, whh, _ = params[name][l]
            entries.append((f"s{si + 1}l{l}_wih", scale_g(wih)))
            entries.append((f"s{si + 1}l{l}_whh", scale_g(whh)))
    entries.append(("fc1_w", params["fc1_w"]))
    entries.append(("fc_w", params["fc_w"]))

    offs, blocks, r = {}, [], 0
    for name, arr in entries:
        offs[name] = r
        rows = -(-arr.shape[0] // ROW_ALIGN) * ROW_ALIGN
        blk = jnp.zeros((rows, width), jnp.float32)
        blk = blk.at[:arr.shape[0], :arr.shape[1]].set(arr)
        blocks.append(blk)
        r += rows
    w_slab = jnp.concatenate(blocks, axis=0).astype(jnp.bfloat16)

    b_slab = jnp.zeros((8, width), jnp.float32)
    brow = 0
    for name in ("lstm1", "lstm2"):
        for l in range(num_layers):
            _, _, b = params[name][l]
            b_slab = b_slab.at[brow, :G].set(scale_g(b))
            brow += 1
    b_slab = b_slab.at[4, :LANE].set(params["fc1_b"])
    b_slab = b_slab.at[5, :num_classes].set(params["fc_b"])

    out_rows = max(8, -(-(num_layers * B) // 8) * 8)
    kernel = make_fused_kernel(T, B, D, H, offs, out_rows)
    out_pad = pl.pallas_call(
        kernel,
        out_shape=jax.ShapeDtypeStruct((out_rows, LANE), jnp.float32),
        scratch_shapes=[
            pltpu.VMEM((T * B, H), jnp.float32),    # inter-layer sequence
            pltpu.VMEM((out_rows, H), jnp.float32),  # stacked final hiddens
        ],
    )(x2d, w_slab, b_slab)
    return out_pad[:num_layers * B, :num_classes]


if __name__ == "__main__":
    num_classes, input_size, hidden_size, num_layers, seq_length = 4, 16, 32, 2, 8
    batch = 2

    key = jax.random.PRNGKey(0)
    k_x, k_p = jax.random.split(key)
    x = jax.random.normal(k_x, (batch, seq_length, input_size), jnp.float32)
    params = init_params(k_p, num_classes, input_size, hidden_size, num_layers)

    out = my_lstm_forward(x, params, num_layers, hidden_size, num_classes)
    out = jax.block_until_ready(out)
    assert out.shape == (num_layers * batch, num_classes)
    print("KERNEL_OK")
</pallas_src>

<mosaic_0001>
module attributes {stable_mosaic.version = 11 : i64} {
  func.func @kernel(%arg0: memref<16x16xbf16, #tpu.memory_space<vmem>>, %arg1: memref<384x128xbf16, #tpu.memory_space<vmem>>, %arg2: memref<8x128xf32, #tpu.memory_space<vmem>>, %arg3: memref<8x128xf32, #tpu.memory_space<vmem>>, %arg4: memref<16x32xf32, #tpu.memory_space<vmem>>, %arg5: memref<8x32xf32, #tpu.memory_space<vmem>>) attributes {dimension_semantics = [], scalar_prefetch = 0 : i64, scratch_operands = 2 : i64, tpu.core_type = #tpu.core_type<tc>} {
    %0 = tpu.iota {dimensions = array<i32: 1>} : vector<2x128xi32>
    %c64_i32 = arith.constant 64 : i32
    %1 = vector.broadcast %c64_i32 : i32 to vector<2x128xi32>
    %2 = arith.cmpi sge, %0, %1 : vector<2x128xi32>
    %c96_i32 = arith.constant 96 : i32
    %3 = vector.broadcast %c96_i32 : i32 to vector<2x128xi32>
    %4 = arith.cmpi slt, %0, %3 : vector<2x128xi32>
    %5 = arith.andi %2, %4 : vector<2x128xi1>
    %cst = arith.constant 2.000000e+00 : f32
    %cst_0 = arith.constant 1.000000e+00 : f32
    %6 = vector.broadcast %cst : f32 to vector<2x128xf32>
    %7 = vector.broadcast %cst_0 : f32 to vector<2x128xf32>
    %8 = arith.select %5, %6, %7 : vector<2x128xi1>, vector<2x128xf32>
    %cst_1 = arith.constant -1.000000e+00 : f32
    %cst_2 = arith.constant 0.000000e+00 : f32
    %9 = vector.broadcast %cst_1 : f32 to vector<2x128xf32>
    %10 = vector.broadcast %cst_2 : f32 to vector<2x128xf32>
    %11 = arith.select %5, %9, %10 : vector<2x128xi1>, vector<2x128xf32>
    %c0 = arith.constant 0 : index
    %c0_3 = arith.constant 0 : index
    %12 = vector.load %arg0[%c0, %c0_3] : memref<16x16xbf16, #tpu.memory_space<vmem>>, vector<16x16xbf16>
    %c0_4 = arith.constant 0 : index
    %c0_5 = arith.constant 0 : index
    %13 = vector.load %arg1[%c0_4, %c0_5] : memref<384x128xbf16, #tpu.memory_space<vmem>>, vector<16x128xbf16>
    %c16 = arith.constant 16 : index
    %c0_6 = arith.constant 0 : index
    %14 = vector.load %arg1[%c16, %c0_6] : memref<384x128xbf16, #tpu.memory_space<vmem>>, vector<32x128xbf16>
    %c48 = arith.constant 48 : index
    %c0_7 = arith.constant 0 : index
    %15 = vector.load %arg1[%c48, %c0_7] : memref<384x128xbf16, #tpu.memory_space<vmem>>, vector<32x128xbf16>
    %c80 = arith.constant 80 : index
    %c0_8 = arith.constant 0 : index
    %16 = vector.load %arg1[%c80, %c0_8] : memref<384x128xbf16, #tpu.memory_space<vmem>>, vector<32x128xbf16>
    %c112 = arith.constant 112 : index
    %c0_9 = arith.constant 0 : index
    %17 = vector.load %arg1[%c112, %c0_9] : memref<384x128xbf16, #tpu.memory_space<vmem>>, vector<16x128xbf16>
    %c128 = arith.constant 128 : index
    %c0_10 = arith.constant 0 : index
    %18 = vector.load %arg1[%c128, %c0_10] : memref<384x128xbf16, #tpu.memory_space<vmem>>, vector<32x128xbf16>
    %c160 = arith.constant 160 : index
    %c0_11 = arith.constant 0 : index
    %19 = vector.load %arg1[%c160, %c0_11] : memref<384x128xbf16, #tpu.memory_space<vmem>>, vector<32x128xbf16>
    %c192 = arith.constant 192 : index
    %c0_12 = arith.constant 0 : index
    %20 = vector.load %arg1[%c192, %c0_12] : memref<384x128xbf16, #tpu.memory_space<vmem>>, vector<32x128xbf16>
    %c224 = arith.constant 224 : index
    %c0_13 = arith.constant 0 : index
    %21 = vector.load %arg1[%c224, %c0_13] : memref<384x128xbf16, #tpu.memory_space<vmem>>, vector<32x128xbf16>
    %c256 = arith.constant 256 : index
    %c0_14 = arith.constant 0 : index
    %22 = vector.load %arg1[%c256, %c0_14] : memref<384x128xbf16, #tpu.memory_space<vmem>>, vector<128x128xbf16>
    %c0_15 = arith.constant 0 : index
    %c0_16 = arith.constant 0 : index
    %23 = vector.load %arg2[%c0_15, %c0_16] : memref<8x128xf32, #tpu.memory_space<vmem>>, vector<1x128xf32>
    %c1 = arith.constant 1 : index
    %c0_17 = arith.constant 0 : index
    %24 = vector.load %arg2[%c1, %c0_17] : memref<8x128xf32, #tpu.memory_space<vmem>>, vector<1x128xf32>
    %c2 = arith.constant 2 : index
    %c0_18 = arith.constant 0 : index
    %25 = vector.load %arg2[%c2, %c0_18] : memref<8x128xf32, #tpu.memory_space<vmem>>, vector<1x128xf32>
    %c3 = arith.constant 3 : index
    %c0_19 = arith.constant 0 : index
    %26 = vector.load %arg2[%c3, %c0_19] : memref<8x128xf32, #tpu.memory_space<vmem>>, vector<1x128xf32>
    %c4 = arith.constant 4 : index
    %c0_20 = arith.constant 0 : index
    %27 = vector.load %arg2[%c4, %c0_20] : memref<8x128xf32, #tpu.memory_space<vmem>>, vector<1x128xf32>
    %c5 = arith.constant 5 : index
    %c0_21 = arith.constant 0 : index
    %28 = vector.load %arg2[%c5, %c0_21] : memref<8x128xf32, #tpu.memory_space<vmem>>, vector<1x128xf32>
    %cst_22 = arith.constant 0.000000e+00 : f32
    %29 = vector.broadcast %cst_22 : f32 to vector<2x32xf32>
    %cst_23 = arith.constant dense<0.000000e+00> : vector<16x128xf32>
    %30 = tpu.matmul %12, %13, %cst_23 {dimension_numbers = #tpu.dot_dimension_numbers<[1], [0], [0], [1], [0, 0, 1, 1], [], []>} : vector<16x16xbf16>, vector<16x128xbf16>, vector<16x128xf32> -> vector<16x128xf32>
    %31 = vector.broadcast %23 : vector<1x128xf32> to vector<16x128xf32>
    %32 = arith.addf %30, %31 : vector<16x128xf32>
    %cst_24 = arith.constant dense<0.000000e+00> : vector<16x128xf32>
    %33 = tpu.matmul %12, %17, %cst_24 {dimension_numbers = #tpu.dot_dimension_numbers<[1], [0], [0], [1], [0, 0, 1, 1], [], []>} : vector<16x16xbf16>, vector<16x128xbf16>, vector<16x128xf32> -> vector<16x128xf32>
    %34 = vector.broadcast %25 : vector<1x128xf32> to vector<16x128xf32>
    %35 = arith.addf %33, %34 : vector<16x128xf32>
    %36 = vector.extract_strided_slice %32 {offsets = [0, 0], sizes = [2, 128], strides = [1, 1]} : vector<16x128xf32> to vector<2x128xf32>
    %37 = arith.truncf %29 : vector<2x32xf32> to vector<2x32xbf16>
    %cst_25 = arith.constant dense<0.000000e+00> : vector<2x128xf32>
    %38 = tpu.matmul %37, %14, %cst_25 {dimension_numbers = #tpu.dot_dimension_numbers<[1], [0], [0], [1], [0, 0, 1, 1], [], []>} : vector<2x32xbf16>, vector<32x128xbf16>, vector<2x128xf32> -> vector<2x128xf32>
    %39 = arith.addf %36, %38 : vector<2x128xf32>
    %40 = arith.negf %39 : vector<2x128xf32>
    %41 = math.exp %40 : vector<2x128xf32>
    %cst_26 = arith.constant 1.000000e+00 : f32
    %42 = vector.broadcast %cst_26 : f32 to vector<2x128xf32>
    %43 = arith.addf %42, %41 : vector<2x128xf32>
    %44 = arith.divf %42, %43 : vector<2x128xf32>
    %45 = arith.mulf %44, %8 : vector<2x128xf32>
    %46 = arith.addf %45, %11 : vector<2x128xf32>
    %47 = vector.extract_strided_slice %46 {offsets = [0, 0], sizes = [2, 32], strides = [1, 1]} : vector<2x128xf32> to vector<2x32xf32>
    %48 = vector.extract_strided_slice %46 {offsets = [0, 32], sizes = [2, 32], strides = [1, 1]} : vector<2x128xf32> to vector<2x32xf32>
    %49 = vector.extract_strided_slice %46 {offsets = [0, 64], sizes = [2, 32], strides = [1, 1]} : vector<2x128xf32> to vector<2x32xf32>
    %50 = vector.extract_strided_slice %46 {offsets = [0, 96], sizes = [2, 32], strides = [1, 1]} : vector<2x128xf32> to vector<2x32xf32>
    %51 = arith.mulf %48, %29 : vector<2x32xf32>
    %52 = arith.mulf %47, %49 : vector<2x32xf32>
    %53 = arith.addf %51, %52 : vector<2x32xf32>
    %54 = math.tanh %53 : vector<2x32xf32>
    %55 = arith.mulf %50, %54 : vector<2x32xf32>
    %c0_27 = arith.constant 0 : index
    %c0_28 = arith.constant 0 : index
    %56 = vector.load %arg4[%c0_27, %c0_28] : memref<16x32xf32, #tpu.memory_space<vmem>>, vector<2x32xf32>
    tpu.vector_store %arg4[%c0_27, %c0_28], %55 {strides = array<i32>} : memref<16x32xf32, #tpu.memory_space<vmem>>, vector<2x32xf32>,
    %57 = vector.extract_strided_slice %32 {offsets = [2, 0], sizes = [2, 128], strides = [1, 1]} : vector<16x128xf32> to vector<2x128xf32>
    %58 = arith.truncf %55 : vector<2x32xf32> to vector<2x32xbf16>
    %cst_29 = arith.constant dense<0.000000e+00> : vector<2x128xf32>
    %59 = tpu.matmul %58, %14, %cst_29 {dimension_numbers = #tpu.dot_dimension_numbers<[1], [0], [0], [1], [0, 0, 1, 1], [], []>} : vector<2x32xbf16>, vector<32x128xbf16>, vector<2x128xf32> -> vector<2x128xf32>
    %60 = arith.addf %57, %59 : vector<2x128xf32>
    %61 = arith.negf %60 : vector<2x128xf32>
    %62 = math.exp %61 : vector<2x128xf32>
    %cst_30 = arith.constant 1.000000e+00 : f32
    %63 = vector.broadcast %cst_30 : f32 to vector<2x128xf32>
    %64 = arith.addf %63, %62 : vector<2x128xf32>
    %65 = arith.divf %63, %64 : vector<2x128xf32>
    %66 = arith.mulf %65, %8 : vector<2x128xf32>
    %67 = arith.addf %66, %11 : vector<2x128xf32>
    %68 = vector.extract_strided_slice %67 {offsets = [0, 0], sizes = [2, 32], strides = [1, 1]} : vector<2x128xf32> to vector<2x32xf32>
    %69 = vector.extract_strided_slice %67 {offsets = [0, 32], sizes = [2, 32], strides = [1, 1]} : vector<2x128xf32> to vector<2x32xf32>
    %70 = vector.extract_strided_slice %67 {offsets = [0, 64], sizes = [2, 32], strides = [1, 1]} : vector<2x128xf32> to vector<2x32xf32>
    %71 = vector.extract_strided_slice %67 {offsets = [0, 96], sizes = [2, 32], strides = [1, 1]} : vector<2x128xf32> to vector<2x32xf32>
    %72 = arith.mulf %69, %53 : vector<2x32xf32>
    %73 = arith.mulf %68, %70 : vector<2x32xf32>
    %74 = arith.addf %72, %73 : vector<2x32xf32>
    %75 = math.tanh %74 : vector<2x32xf32>
    %76 = arith.mulf %71, %75 : vector<2x32xf32>
    %c2_31 = arith.constant 2 : index
    %c0_32 = arith.constant 0 : index
    %77 = vector.load %arg4[%c2_31, %c0_32] : memref<16x32xf32, #tpu.memory_space<vmem>>, vector<2x32xf32>
    tpu.vector_store %arg4[%c2_31, %c0_32], %76 {strides = array<i32>} : memref<16x32xf32, #tpu.memory_space<vmem>>, vector<2x32xf32>,
    %78 = vector.extract_strided_slice %32 {offsets = [4, 0], sizes = [2, 128], strides = [1, 1]} : vector<16x128xf32> to vector<2x128xf32>
    %79 = arith.truncf %76 : vector<2x32xf32> to vector<2x32xbf16>
    %cst_33 = arith.constant dense<0.000000e+00> : vector<2x128xf32>
    %80 = tpu.matmul %79, %14, %cst_33 {dimension_numbers = #tpu.dot_dimension_numbers<[1], [0], [0], [1], [0, 0, 1, 1], [], []>} : vector<2x32xbf16>, vector<32x128xbf16>, vector<2x128xf32> -> vector<2x128xf32>
    %81 = arith.addf %78, %80 : vector<2x128xf32>
    %82 = arith.negf %81 : vector<2x128xf32>
    %83 = math.exp %82 : vector<2x128xf32>
    %cst_34 = arith.constant 1.000000e+00 : f32
    %84 = vector.broadcast %cst_34 : f32 to vector<2x128xf32>
    %85 = arith.addf %84, %83 : vector<2x128xf32>
    %86 = arith.divf %84, %85 : vector<2x128xf32>
    %87 = arith.mulf %86, %8 : vector<2x128xf32>
    %88 = arith.addf %87, %11 : vector<2x128xf32>
    %89 = vector.extract_strided_slice %88 {offsets = [0, 0], sizes = [2, 32], strides = [1, 1]} : vector<2x128xf32> to vector<2x32xf32>
    %90 = vector.extract_strided_slice %88 {offsets = [0, 32], sizes = [2, 32], strides = [1, 1]} : vector<2x128xf32> to vector<2x32xf32>
    %91 = vector.extract_strided_slice %88 {offsets = [0, 64], sizes = [2, 32], strides = [1, 1]} : vector<2x128xf32> to vector<2x32xf32>
    %92 = vector.extract_strided_slice %88 {offsets = [0, 96], sizes = [2, 32], strides = [1, 1]} : vector<2x128xf32> to vector<2x32xf32>
    %93 = arith.mulf %90, %74 : vector<2x32xf32>
    %94 = arith.mulf %89, %91 : vector<2x32xf32>
    %95 = arith.addf %93, %94 : vector<2x32xf32>
    %96 = math.tanh %95 : vector<2x32xf32>
    %97 = arith.mulf %92, %96 : vector<2x32xf32>
    %c4_35 = arith.constant 4 : index
    %c0_36 = arith.constant 0 : index
    %98 = vector.load %arg4[%c4_35, %c0_36] : memref<16x32xf32, #tpu.memory_space<vmem>>, vector<2x32xf32>
    tpu.vector_store %arg4[%c4_35, %c0_36], %97 {strides = array<i32>} : memref<16x32xf32, #tpu.memory_space<vmem>>, vector<2x32xf32>,
    %99 = vector.extract_strided_slice %32 {offsets = [6, 0], sizes = [2, 128], strides = [1, 1]} : vector<16x128xf32> to vector<2x128xf32>
    %100 = arith.truncf %97 : vector<2x32xf32> to vector<2x32xbf16>
    %cst_37 = arith.constant dense<0.000000e+00> : vector<2x128xf32>
    %101 = tpu.matmul %100, %14, %cst_37 {dimension_numbers = #tpu.dot_dimension_numbers<[1], [0], [0], [1], [0, 0, 1, 1], [], []>} : vector<2x32xbf16>, vector<32x128xbf16>, vector<2x128xf32> -> vector<2x128xf32>
    %102 = arith.addf %99, %101 : vector<2x128xf32>
    %103 = arith.negf %102 : vector<2x128xf32>
    %104 = math.exp %103 : vector<2x128xf32>
    %cst_38 = arith.constant 1.000000e+00 : f32
    %105 = vector.broadcast %cst_38 : f32 to vector<2x128xf32>
    %106 = arith.addf %105, %104 : vector<2x128xf32>
    %107 = arith.divf %105, %106 : vector<2x128xf32>
    %108 = arith.mulf %107, %8 : vector<2x128xf32>
    %109 = arith.addf %108, %11 : vector<2x128xf32>
    %110 = vector.extract_strided_slice %109 {offsets = [0, 0], sizes = [2, 32], strides = [1, 1]} : vector<2x128xf32> to vector<2x32xf32>
    %111 = vector.extract_strided_slice %109 {offsets = [0, 32], sizes = [2, 32], strides = [1, 1]} : vector<2x128xf32> to vector<2x32xf32>
    %112 = vector.extract_strided_slice %109 {offsets = [0, 64], sizes = [2, 32], strides = [1, 1]} : vector<2x128xf32> to vector<2x32xf32>
    %113 = vector.extract_strided_slice %109 {offsets = [0, 96], sizes = [2, 32], strides = [1, 1]} : vector<2x128xf32> to vector<2x32xf32>
    %114 = arith.mulf %111, %95 : vector<2x32xf32>
    %115 = arith.mulf %110, %112 : vector<2x32xf32>
    %116 = arith.addf %114, %115 : vector<2x32xf32>
    %117 = math.tanh %116 : vector<2x32xf32>
    %118 = arith.mulf %113, %117 : vector<2x32xf32>
    %c6 = arith.constant 6 : index
    %c0_39 = arith.constant 0 : index
    %119 = vector.load %arg4[%c6, %c0_39] : memref<16x32xf32, #tpu.memory_space<vmem>>, vector<2x32xf32>
    tpu.vector_store %arg4[%c6, %c0_39], %118 {strides = array<i32>} : memref<16x32xf32, #tpu.memory_space<vmem>>, vector<2x32xf32>,
    %120 = vector.extract_strided_slice %32 {offsets = [8, 0], sizes = [2, 128], strides = [1, 1]} : vector<16x128xf32> to vector<2x128xf32>
    %121 = arith.truncf %118 : vector<2x32xf32> to vector<2x32xbf16>
    %cst_40 = arith.constant dense<0.000000e+00> : vector<2x128xf32>
    %122 = tpu.matmul %121, %14, %cst_40 {dimension_numbers = #tpu.dot_dimension_numbers<[1], [0], [0], [1], [0, 0, 1, 1], [], []>} : vector<2x32xbf16>, vector<32x128xbf16>, vector<2x128xf32> -> vector<2x128xf32>
    %123 = arith.addf %120, %122 : vector<2x128xf32>
    %124 = arith.negf %123 : vector<2x128xf32>
    %125 = math.exp %124 : vector<2x128xf32>
    %cst_41 = arith.constant 1.000000e+00 : f32
    %126 = vector.broadcast %cst_41 : f32 to vector<2x128xf32>
    %127 = arith.addf %126, %125 : vector<2x128xf32>
    %128 = arith.divf %126, %127 : vector<2x128xf32>
    %129 = arith.mulf %128, %8 : vector<2x128xf32>
    %130 = arith.addf %129, %11 : vector<2x128xf32>
    %131 = vector.extract_strided_slice %130 {offsets = [0, 0], sizes = [2, 32], strides = [1, 1]} : vector<2x128xf32> to vector<2x32xf32>
    %132 = vector.extract_strided_slice %130 {offsets = [0, 32], sizes = [2, 32], strides = [1, 1]} : vector<2x128xf32> to vector<2x32xf32>
    %133 = vector.extract_strided_slice %130 {offsets = [0, 64], sizes = [2, 32], strides = [1, 1]} : vector<2x128xf32> to vector<2x32xf32>
    %134 = vector.extract_strided_slice %130 {offsets = [0, 96], sizes = [2, 32], strides = [1, 1]} : vector<2x128xf32> to vector<2x32xf32>
    %135 = arith.mulf %132, %116 : vector<2x32xf32>
    %136 = arith.mulf %131, %133 : vector<2x32xf32>
    %137 = arith.addf %135, %136 : vector<2x32xf32>
    %138 = math.tanh %137 : vector<2x32xf32>
    %139 = arith.mulf %134, %138 : vector<2x32xf32>
    %c8 = arith.constant 8 : index
    %c0_42 = arith.constant 0 : index
    %140 = vector.load %arg4[%c8, %c0_42] : memref<16x32xf32, #tpu.memory_space<vmem>>, vector<2x32xf32>
    tpu.vector_store %arg4[%c8, %c0_42], %139 {strides = array<i32>} : memref<16x32xf32, #tpu.memory_space<vmem>>, vector<2x32xf32>,
    %141 = vector.extract_strided_slice %32 {offsets = [10, 0], sizes = [2, 128], strides = [1, 1]} : vector<16x128xf32> to vector<2x128xf32>
    %142 = arith.truncf %139 : vector<2x32xf32> to vector<2x32xbf16>
    %cst_43 = arith.constant dense<0.000000e+00> : vector<2x128xf32>
    %143 = tpu.matmul %142, %14, %cst_43 {dimension_numbers = #tpu.dot_dimension_numbers<[1], [0], [0], [1], [0, 0, 1, 1], [], []>} : vector<2x32xbf16>, vector<32x128xbf16>, vector<2x128xf32> -> vector<2x128xf32>
    %144 = arith.addf %141, %143 : vector<2x128xf32>
    %145 = arith.negf %144 : vector<2x128xf32>
    %146 = math.exp %145 : vector<2x128xf32>
    %cst_44 = arith.constant 1.000000e+00 : f32
    %147 = vector.broadcast %cst_44 : f32 to vector<2x128xf32>
    %148 = arith.addf %147, %146 : vector<2x128xf32>
    %149 = arith.divf %147, %148 : vector<2x128xf32>
    %150 = arith.mulf %149, %8 : vector<2x128xf32>
    %151 = arith.addf %150, %11 : vector<2x128xf32>
    %152 = vector.extract_strided_slice %151 {offsets = [0, 0], sizes = [2, 32], strides = [1, 1]} : vector<2x128xf32> to vector<2x32xf32>
    %153 = vector.extract_strided_slice %151 {offsets = [0, 32], sizes = [2, 32], strides = [1, 1]} : vector<2x128xf32> to vector<2x32xf32>
    %154 = vector.extract_strided_slice %151 {offsets = [0, 64], sizes = [2, 32], strides = [1, 1]} : vector<2x128xf32> to vector<2x32xf32>
    %155 = vector.extract_strided_slice %151 {offsets = [0, 96], sizes = [2, 32], strides = [1, 1]} : vector<2x128xf32> to vector<2x32xf32>
    %156 = arith.mulf %153, %137 : vector<2x32xf32>
    %157 = arith.mulf %152, %154 : vector<2x32xf32>
    %158 = arith.addf %156, %157 : vector<2x32xf32>
    %159 = math.tanh %158 : vector<2x32xf32>
    %160 = arith.mulf %155, %159 : vector<2x32xf32>
    %c10 = arith.constant 10 : index
    %c0_45 = arith.constant 0 : index
    %161 = vector.load %arg4[%c10, %c0_45] : memref<16x32xf32, #tpu.memory_space<vmem>>, vector<2x32xf32>
    tpu.vector_store %arg4[%c10, %c0_45], %160 {strides = array<i32>} : memref<16x32xf32, #tpu.memory_space<vmem>>, vector<2x32xf32>,
    %162 = vector.extract_strided_slice %32 {offsets = [12, 0], sizes = [2, 128], strides = [1, 1]} : vector<16x128xf32> to vector<2x128xf32>
    %163 = arith.truncf %160 : vector<2x32xf32> to vector<2x32xbf16>
    %cst_46 = arith.constant dense<0.000000e+00> : vector<2x128xf32>
    %164 = tpu.matmul %163, %14, %cst_46 {dimension_numbers = #tpu.dot_dimension_numbers<[1], [0], [0], [1], [0, 0, 1, 1], [], []>} : vector<2x32xbf16>, vector<32x128xbf16>, vector<2x128xf32> -> vector<2x128xf32>
    %165 = arith.addf %162, %164 : vector<2x128xf32>
    %166 = arith.negf %165 : vector<2x128xf32>
    %167 = math.exp %166 : vector<2x128xf32>
    %cst_47 = arith.constant 1.000000e+00 : f32
    %168 = vector.broadcast %cst_47 : f32 to vector<2x128xf32>
    %169 = arith.addf %168, %167 : vector<2x128xf32>
    %170 = arith.divf %168, %169 : vector<2x128xf32>
    %171 = arith.mulf %170, %8 : vector<2x128xf32>
    %172 = arith.addf %171, %11 : vector<2x128xf32>
    %173 = vector.extract_strided_slice %172 {offsets = [0, 0], sizes = [2, 32], strides = [1, 1]} : vector<2x128xf32> to vector<2x32xf32>
    %174 = vector.extract_strided_slice %172 {offsets = [0, 32], sizes = [2, 32], strides = [1, 1]} : vector<2x128xf32> to vector<2x32xf32>
    %175 = vector.extract_strided_slice %172 {offsets = [0, 64], sizes = [2, 32], strides = [1, 1]} : vector<2x128xf32> to vector<2x32xf32>
    %176 = vector.extract_strided_slice %172 {offsets = [0, 96], sizes = [2, 32], strides = [1, 1]} : vector<2x128xf32> to vector<2x32xf32>
    %177 = arith.mulf %174, %158 : vector<2x32xf32>
    %178 = arith.mulf %173, %175 : vector<2x32xf32>
    %179 = arith.addf %177, %178 : vector<2x32xf32>
    %180 = math.tanh %179 : vector<2x32xf32>
    %181 = arith.mulf %176, %180 : vector<2x32xf32>
    %c12 = arith.constant 12 : index
    %c0_48 = arith.constant 0 : index
    %182 = vector.load %arg4[%c12, %c0_48] : memref<16x32xf32, #tpu.memory_space<vmem>>, vector<2x32xf32>
    tpu.vector_store %arg4[%c12, %c0_48], %181 {strides = array<i32>} : memref<16x32xf32, #tpu.memory_space<vmem>>, vector<2x32xf32>,
    %183 = vector.extract_strided_slice %32 {offsets = [14, 0], sizes = [2, 128], strides = [1, 1]} : vector<16x128xf32> to vector<2x128xf32>
    %184 = arith.truncf %181 : vector<2x32xf32> to vector<2x32xbf16>
    %cst_49 = arith.constant dense<0.000000e+00> : vector<2x128xf32>
    %185 = tpu.matmul %184, %14, %cst_49 {dimension_numbers = #tpu.dot_dimension_numbers<[1], [0], [0], [1], [0, 0, 1, 1], [], []>} : vector<2x32xbf16>, vector<32x128xbf16>, vector<2x128xf32> -> vector<2x128xf32>
    %186 = arith.addf %183, %185 : vector<2x128xf32>
    %187 = arith.negf %186 : vector<2x128xf32>
    %188 = math.exp %187 : vector<2x128xf32>
    %cst_50 = arith.constant 1.000000e+00 : f32
    %189 = vector.broadcast %cst_50 : f32 to vector<2x128xf32>
    %190 = arith.addf %189, %188 : vector<2x128xf32>
    %191 = arith.divf %189, %190 : vector<2x128xf32>
    %192 = arith.mulf %191, %8 : vector<2x128xf32>
    %193 = arith.addf %192, %11 : vector<2x128xf32>
    %194 = vector.extract_strided_slice %193 {offsets = [0, 0], sizes = [2, 32], strides = [1, 1]} : vector<2x128xf32> to vector<2x32xf32>
    %195 = vector.extract_strided_slice %193 {offsets = [0, 32], sizes = [2, 32], strides = [1, 1]} : vector<2x128xf32> to vector<2x32xf32>
    %196 = vector.extract_strided_slice %193 {offsets = [0, 64], sizes = [2, 32], strides = [1, 1]} : vector<2x128xf32> to vector<2x32xf32>
    %197 = vector.extract_strided_slice %193 {offsets = [0, 96], sizes = [2, 32], strides = [1, 1]} : vector<2x128xf32> to vector<2x32xf32>
    %198 = arith.mulf %195, %179 : vector<2x32xf32>
    %199 = arith.mulf %194, %196 : vector<2x32xf32>
    %200 = arith.addf %198, %199 : vector<2x32xf32>
    %201 = math.tanh %200 : vector<2x32xf32>
    %202 = arith.mulf %197, %201 : vector<2x32xf32>
    %c14 = arith.constant 14 : index
    %c0_51 = arith.constant 0 : index
    %203 = vector.load %arg4[%c14, %c0_51] : memref<16x32xf32, #tpu.memory_space<vmem>>, vector<2x32xf32>
    tpu.vector_store %arg4[%c14, %c0_51], %202 {strides = array<i32>} : memref<16x32xf32, #tpu.memory_space<vmem>>, vector<2x32xf32>,
    %c0_52 = arith.constant 0 : index
    %c0_53 = arith.constant 0 : index
    %204 = vector.load %arg4[%c0_52, %c0_53] : memref<16x32xf32, #tpu.memory_space<vmem>>, vector<16x32xf32>
    %205 = arith.truncf %204 : vector<16x32xf32> to vector<16x32xbf16>
    %cst_54 = arith.constant dense<0.000000e+00> : vector<16x128xf32>
    %206 = tpu.matmul %205, %15, %cst_54 {dimension_numbers = #tpu.dot_dimension_numbers<[1], [0], [0], [1], [0, 0, 1, 1], [], []>} : vector<16x32xbf16>, vector<32x128xbf16>, vector<16x128xf32> -> vector<16x128xf32>
    %207 = vector.broadcast %24 : vector<1x128xf32> to vector<16x128xf32>
    %208 = arith.addf %206, %207 : vector<16x128xf32>
    %209 = vector.extract_strided_slice %208 {offsets = [0, 0], sizes = [2, 128], strides = [1, 1]} : vector<16x128xf32> to vector<2x128xf32>
    %210 = arith.truncf %29 : vector<2x32xf32> to vector<2x32xbf16>
    %cst_55 = arith.constant dense<0.000000e+00> : vector<2x128xf32>
    %211 = tpu.matmul %210, %16, %cst_55 {dimension_numbers = #tpu.dot_dimension_numbers<[1], [0], [0], [1], [0, 0, 1, 1], [], []>} : vector<2x32xbf16>, vector<32x128xbf16>, vector<2x128xf32> -> vector<2x128xf32>
    %212 = arith.addf %209, %211 : vector<2x128xf32>
    %213 = arith.negf %212 : vector<2x128xf32>
    %214 = math.exp %213 : vector<2x128xf32>
    %cst_56 = arith.constant 1.000000e+00 : f32
    %215 = vector.broadcast %cst_56 : f32 to vector<2x128xf32>
    %216 = arith.addf %215, %214 : vector<2x128xf32>
    %217 = arith.divf %215, %216 : vector<2x128xf32>
    %218 = arith.mulf %217, %8 : vector<2x128xf32>
    %219 = arith.addf %218, %11 : vector<2x128xf32>
    %220 = vector.extract_strided_slice %219 {offsets = [0, 0], sizes = [2, 32], strides = [1, 1]} : vector<2x128xf32> to vector<2x32xf32>
    %221 = vector.extract_strided_slice %219 {offsets = [0, 32], sizes = [2, 32], strides = [1, 1]} : vector<2x128xf32> to vector<2x32xf32>
    %222 = vector.extract_strided_slice %219 {offsets = [0, 64], sizes = [2, 32], strides = [1, 1]} : vector<2x128xf32> to vector<2x32xf32>
    %223 = vector.extract_strided_slice %219 {offsets = [0, 96], sizes = [2, 32], strides = [1, 1]} : vector<2x128xf32> to vector<2x32xf32>
    %224 = arith.mulf %221, %29 : vector<2x32xf32>
    %225 = arith.mulf %220, %222 : vector<2x32xf32>
    %226 = arith.addf %224, %225 : vector<2x32xf32>
    %227 = math.tanh %226 : vector<2x32xf32>
    %228 = arith.mulf %223, %227 : vector<2x32xf32>
    %229 = vector.extract_strided_slice %35 {offsets = [0, 0], sizes = [2, 128], strides = [1, 1]} : vector<16x128xf32> to vector<2x128xf32>
    %230 = arith.truncf %202 : vector<2x32xf32> to vector<2x32xbf16>
    %cst_57 = arith.constant dense<0.000000e+00> : vector<2x128xf32>
    %231 = tpu.matmul %230, %18, %cst_57 {dimension_numbers = #tpu.dot_dimension_numbers<[1], [0], [0], [1], [0, 0, 1, 1], [], []>} : vector<2x32xbf16>, vector<32x128xbf16>, vector<2x128xf32> -> vector<2x128xf32>
    %232 = arith.addf %229, %231 : vector<2x128xf32>
    %233 = arith.negf %232 : vector<2x128xf32>
    %234 = math.exp %233 : vector<2x128xf32>
    %cst_58 = arith.constant 1.000000e+00 : f32
    %235 = vector.broadcast %cst_58 : f32 to vector<2x128xf32>
    %236 = arith.addf %235, %234 : vector<2x128xf32>
    %237 = arith.divf %235, %236 : vector<2x128xf32>
    %238 = arith.mulf %237, %8 : vector<2x128xf32>
    %239 = arith.addf %238, %11 : vector<2x128xf32>
    %240 = vector.extract_strided_slice %239 {offsets = [0, 0], sizes = [2, 32], strides = [1, 1]} : vector<2x128xf32> to vector<2x32xf32>
    %241 = vector.extract_strided_slice %239 {offsets = [0, 32], sizes = [2, 32], strides = [1, 1]} : vector<2x128xf32> to vector<2x32xf32>
    %242 = vector.extract_strided_slice %239 {offsets = [0, 64], sizes = [2, 32], strides = [1, 1]} : vector<2x128xf32> to vector<2x32xf32>
    %243 = vector.extract_strided_slice %239 {offsets = [0, 96], sizes = [2, 32], strides = [1, 1]} : vector<2x128xf32> to vector<2x32xf32>
    %244 = arith.mulf %241, %200 : vector<2x32xf32>
    %245 = arith.mulf %240, %242 : vector<2x32xf32>
    %246 = arith.addf %244, %245 : vector<2x32xf32>
    %247 = math.tanh %246 : vector<2x32xf32>
    %248 = arith.mulf %243, %247 : vector<2x32xf32>
    %c0_59 = arith.constant 0 : index
    %c0_60 = arith.constant 0 : index
    %249 = vector.load %arg4[%c0_59, %c0_60] : memref<16x32xf32, #tpu.memory_space<vmem>>, vector<2x32xf32>
    tpu.vector_store %arg4[%c0_59, %c0_60], %248 {strides = array<i32>} : memref<16x32xf32, #tpu.memory_space<vmem>>, vector<2x32xf32>,
    %250 = vector.extract_strided_slice %208 {offsets = [2, 0], sizes = [2, 128], strides = [1, 1]} : vector<16x128xf32> to vector<2x128xf32>
    %251 = arith.truncf %228 : vector<2x32xf32> to vector<2x32xbf16>
    %cst_61 = arith.constant dense<0.000000e+00> : vector<2x128xf32>
    %252 = tpu.matmul %251, %16, %cst_61 {dimension_numbers = #tpu.dot_dimension_numbers<[1], [0], [0], [1], [0, 0, 1, 1], [], []>} : vector<2x32xbf16>, vector<32x128xbf16>, vector<2x128xf32> -> vector<2x128xf32>
    %253 = arith.addf %250, %252 : vector<2x128xf32>
    %254 = arith.negf %253 : vector<2x128xf32>
    %255 = math.exp %254 : vector<2x128xf32>
    %cst_62 = arith.constant 1.000000e+00 : f32
    %256 = vector.broadcast %cst_62 : f32 to vector<2x128xf32>
    %257 = arith.addf %256, %255 : vector<2x128xf32>
    %258 = arith.divf %256, %257 : vector<2x128xf32>
    %259 = arith.mulf %258, %8 : vector<2x128xf32>
    %260 = arith.addf %259, %11 : vector<2x128xf32>
    %261 = vector.extract_strided_slice %260 {offsets = [0, 0], sizes = [2, 32], strides = [1, 1]} : vector<2x128xf32> to vector<2x32xf32>
    %262 = vector.extract_strided_slice %260 {offsets = [0, 32], sizes = [2, 32], strides = [1, 1]} : vector<2x128xf32> to vector<2x32xf32>
    %263 = vector.extract_strided_slice %260 {offsets = [0, 64], sizes = [2, 32], strides = [1, 1]} : vector<2x128xf32> to vector<2x32xf32>
    %264 = vector.extract_strided_slice %260 {offsets = [0, 96], sizes = [2, 32], strides = [1, 1]} : vector<2x128xf32> to vector<2x32xf32>
    %265 = arith.mulf %262, %226 : vector<2x32xf32>
    %266 = arith.mulf %261, %263 : vector<2x32xf32>
    %267 = arith.addf %265, %266 : vector<2x32xf32>
    %268 = math.tanh %267 : vector<2x32xf32>
    %269 = arith.mulf %264, %268 : vector<2x32xf32>
    %270 = vector.extract_strided_slice %35 {offsets = [2, 0], sizes = [2, 128], strides = [1, 1]} : vector<16x128xf32> to vector<2x128xf32>
    %271 = arith.truncf %248 : vector<2x32xf32> to vector<2x32xbf16>
    %cst_63 = arith.constant dense<0.000000e+00> : vector<2x128xf32>
    %272 = tpu.matmul %271, %18, %cst_63 {dimension_numbers = #tpu.dot_dimension_numbers<[1], [0], [0], [1], [0, 0, 1, 1], [], []>} : vector<2x32xbf16>, vector<32x128xbf16>, vector<2x128xf32> -> vector<2x128xf32>
    %273 = arith.addf %270, %272 : vector<2x128xf32>
    %274 = arith.negf %273 : vector<2x128xf32>
    %275 = math.exp %274 : vector<2x128xf32>
    %cst_64 = arith.constant 1.000000e+00 : f32
    %276 = vector.broadcast %cst_64 : f32 to vector<2x128xf32>
    %277 = arith.addf %276, %275 : vector<2x128xf32>
    %278 = arith.divf %276, %277 : vector<2x128xf32>
    %279 = arith.mulf %278, %8 : vector<2x128xf32>
    %280 = arith.addf %279, %11 : vector<2x128xf32>
    %281 = vector.extract_strided_slice %280 {offsets = [0, 0], sizes = [2, 32], strides = [1, 1]} : vector<2x128xf32> to vector<2x32xf32>
    %282 = vector.extract_strided_slice %280 {offsets = [0, 32], sizes = [2, 32], strides = [1, 1]} : vector<2x128xf32> to vector<2x32xf32>
    %283 = vector.extract_strided_slice %280 {offsets = [0, 64], sizes = [2, 32], strides = [1, 1]} : vector<2x128xf32> to vector<2x32xf32>
    %284 = vector.extract_strided_slice %280 {offsets = [0, 96], sizes = [2, 32], strides = [1, 1]} : vector<2x128xf32> to vector<2x32xf32>
    %285 = arith.mulf %282, %246 : vector<2x32xf32>
    %286 = arith.mulf %281, %283 : vector<2x32xf32>
    %287 = arith.addf %285, %286 : vector<2x32xf32>
    %288 = math.tanh %287 : vector<2x32xf32>
    %289 = arith.mulf %284, %288 : vector<2x32xf32>
    %c2_65 = arith.constant 2 : index
    %c0_66 = arith.constant 0 : index
    %290 = vector.load %arg4[%c2_65, %c0_66] : memref<16x32xf32, #tpu.memory_space<vmem>>, vector<2x32xf32>
    tpu.vector_store %arg4[%c2_65, %c0_66], %289 {strides = array<i32>} : memref<16x32xf32, #tpu.memory_space<vmem>>, vector<2x32xf32>,
    %291 = vector.extract_strided_slice %208 {offsets = [4, 0], sizes = [2, 128], strides = [1, 1]} : vector<16x128xf32> to vector<2x128xf32>
    %292 = arith.truncf %269 : vector<2x32xf32> to vector<2x32xbf16>
    %cst_67 = arith.constant dense<0.000000e+00> : vector<2x128xf32>
    %293 = tpu.matmul %292, %16, %cst_67 {dimension_numbers = #tpu.dot_dimension_numbers<[1], [0], [0], [1], [0, 0, 1, 1], [], []>} : vector<2x32xbf16>, vector<32x128xbf16>, vector<2x128xf32> -> vector<2x128xf32>
    %294 = arith.addf %291, %293 : vector<2x128xf32>
    %295 = arith.negf %294 : vector<2x128xf32>
    %296 = math.exp %295 : vector<2x128xf32>
    %cst_68 = arith.constant 1.000000e+00 : f32
    %297 = vector.broadcast %cst_68 : f32 to vector<2x128xf32>
    %298 = arith.addf %297, %296 : vector<2x128xf32>
    %299 = arith.divf %297, %298 : vector<2x128xf32>
    %300 = arith.mulf %299, %8 : vector<2x128xf32>
    %301 = arith.addf %300, %11 : vector<2x128xf32>
    %302 = vector.extract_strided_slice %301 {offsets = [0, 0], sizes = [2, 32], strides = [1, 1]} : vector<2x128xf32> to vector<2x32xf32>
    %303 = vector.extract_strided_slice %301 {offsets = [0, 32], sizes = [2, 32], strides = [1, 1]} : vector<2x128xf32> to vector<2x32xf32>
    %304 = vector.extract_strided_slice %301 {offsets = [0, 64], sizes = [2, 32], strides = [1, 1]} : vector<2x128xf32> to vector<2x32xf32>
    %305 = vector.extract_strided_slice %301 {offsets = [0, 96], sizes = [2, 32], strides = [1, 1]} : vector<2x128xf32> to vector<2x32xf32>
    %306 = arith.mulf %303, %267 : vector<2x32xf32>
    %307 = arith.mulf %302, %304 : vector<2x32xf32>
    %308 = arith.addf %306, %307 : vector<2x32xf32>
    %309 = math.tanh %308 : vector<2x32xf32>
    %310 = arith.mulf %305, %309 : vector<2x32xf32>
    %311 = vector.extract_strided_slice %35 {offsets = [4, 0], sizes = [2, 128], strides = [1, 1]} : vector<16x128xf32> to vector<2x128xf32>
    %312 = arith.truncf %289 : vector<2x32xf32> to vector<2x32xbf16>
    %cst_69 = arith.constant dense<0.000000e+00> : vector<2x128xf32>
    %313 = tpu.matmul %312, %18, %cst_69 {dimension_numbers = #tpu.dot_dimension_numbers<[1], [0], [0], [1], [0, 0, 1, 1], [], []>} : vector<2x32xbf16>, vector<32x128xbf16>, vector<2x128xf32> -> vector<2x128xf32>
    %314 = arith.addf %311, %313 : vector<2x128xf32>
    %315 = arith.negf %314 : vector<2x128xf32>
    %316 = math.exp %315 : vector<2x128xf32>
    %cst_70 = arith.constant 1.000000e+00 : f32
    %317 = vector.broadcast %cst_70 : f32 to vector<2x128xf32>
    %318 = arith.addf %317, %316 : vector<2x128xf32>
    %319 = arith.divf %317, %318 : vector<2x128xf32>
    %320 = arith.mulf %319, %8 : vector<2x128xf32>
    %321 = arith.addf %320, %11 : vector<2x128xf32>
    %322 = vector.extract_strided_slice %321 {offsets = [0, 0], sizes = [2, 32], strides = [1, 1]} : vector<2x128xf32> to vector<2x32xf32>
    %323 = vector.extract_strided_slice %321 {offsets = [0, 32], sizes = [2, 32], strides = [1, 1]} : vector<2x128xf32> to vector<2x32xf32>
    %324 = vector.extract_strided_slice %321 {offsets = [0, 64], sizes = [2, 32], strides = [1, 1]} : vector<2x128xf32> to vector<2x32xf32>
    %325 = vector.extract_strided_slice %321 {offsets = [0, 96], sizes = [2, 32], strides = [1, 1]} : vector<2x128xf32> to vector<2x32xf32>
    %326 = arith.mulf %323, %287 : vector<2x32xf32>
    %327 = arith.mulf %322, %324 : vector<2x32xf32>
    %328 = arith.addf %326, %327 : vector<2x32xf32>
    %329 = math.tanh %328 : vector<2x32xf32>
    %330 = arith.mulf %325, %329 : vector<2x32xf32>
    %c4_71 = arith.constant 4 : index
    %c0_72 = arith.constant 0 : index
    %331 = vector.load %arg4[%c4_71, %c0_72] : memref<16x32xf32, #tpu.memory_space<vmem>>, vector<2x32xf32>
    tpu.vector_store %arg4[%c4_71, %c0_72], %330 {strides = array<i32>} : memref<16x32xf32, #tpu.memory_space<vmem>>, vector<2x32xf32>,
    %332 = vector.extract_strided_slice %208 {offsets = [6, 0], sizes = [2, 128], strides = [1, 1]} : vector<16x128xf32> to vector<2x128xf32>
    %333 = arith.truncf %310 : vector<2x32xf32> to vector<2x32xbf16>
    %cst_73 = arith.constant dense<0.000000e+00> : vector<2x128xf32>
    %334 = tpu.matmul %333, %16, %cst_73 {dimension_numbers = #tpu.dot_dimension_numbers<[1], [0], [0], [1], [0, 0, 1, 1], [], []>} : vector<2x32xbf16>, vector<32x128xbf16>, vector<2x128xf32> -> vector<2x128xf32>
    %335 = arith.addf %332, %334 : vector<2x128xf32>
    %336 = arith.negf %335 : vector<2x128xf32>
    %337 = math.exp %336 : vector<2x128xf32>
    %cst_74 = arith.constant 1.000000e+00 : f32
    %338 = vector.broadcast %cst_74 : f32 to vector<2x128xf32>
    %339 = arith.addf %338, %337 : vector<2x128xf32>
    %340 = arith.divf %338, %339 : vector<2x128xf32>
    %341 = arith.mulf %340, %8 : vector<2x128xf32>
    %342 = arith.addf %341, %11 : vector<2x128xf32>
    %343 = vector.extract_strided_slice %342 {offsets = [0, 0], sizes = [2, 32], strides = [1, 1]} : vector<2x128xf32> to vector<2x32xf32>
    %344 = vector.extract_strided_slice %342 {offsets = [0, 32], sizes = [2, 32], strides = [1, 1]} : vector<2x128xf32> to vector<2x32xf32>
    %345 = vector.extract_strided_slice %342 {offsets = [0, 64], sizes = [2, 32], strides = [1, 1]} : vector<2x128xf32> to vector<2x32xf32>
    %346 = vector.extract_strided_slice %342 {offsets = [0, 96], sizes = [2, 32], strides = [1, 1]} : vector<2x128xf32> to vector<2x32xf32>
    %347 = arith.mulf %344, %308 : vector<2x32xf32>
    %348 = arith.mulf %343, %345 : vector<2x32xf32>
    %349 = arith.addf %347, %348 : vector<2x32xf32>
    %350 = math.tanh %349 : vector<2x32xf32>
    %351 = arith.mulf %346, %350 : vector<2x32xf32>
    %352 = vector.extract_strided_slice %35 {offsets = [6, 0], sizes = [2, 128], strides = [1, 1]} : vector<16x128xf32> to vector<2x128xf32>
    %353 = arith.truncf %330 : vector<2x32xf32> to vector<2x32xbf16>
    %cst_75 = arith.constant dense<0.000000e+00> : vector<2x128xf32>
    %354 = tpu.matmul %353, %18, %cst_75 {dimension_numbers = #tpu.dot_dimension_numbers<[1], [0], [0], [1], [0, 0, 1, 1], [], []>} : vector<2x32xbf16>, vector<32x128xbf16>, vector<2x128xf32> -> vector<2x128xf32>
    %355 = arith.addf %352, %354 : vector<2x128xf32>
    %356 = arith.negf %355 : vector<2x128xf32>
    %357 = math.exp %356 : vector<2x128xf32>
    %cst_76 = arith.constant 1.000000e+00 : f32
    %358 = vector.broadcast %cst_76 : f32 to vector<2x128xf32>
    %359 = arith.addf %358, %357 : vector<2x128xf32>
    %360 = arith.divf %358, %359 : vector<2x128xf32>
    %361 = arith.mulf %360, %8 : vector<2x128xf32>
    %362 = arith.addf %361, %11 : vector<2x128xf32>
    %363 = vector.extract_strided_slice %362 {offsets = [0, 0], sizes = [2, 32], strides = [1, 1]} : vector<2x128xf32> to vector<2x32xf32>
    %364 = vector.extract_strided_slice %362 {offsets = [0, 32], sizes = [2, 32], strides = [1, 1]} : vector<2x128xf32> to vector<2x32xf32>
    %365 = vector.extract_strided_slice %362 {offsets = [0, 64], sizes = [2, 32], strides = [1, 1]} : vector<2x128xf32> to vector<2x32xf32>
    %366 = vector.extract_strided_slice %362 {offsets = [0, 96], sizes = [2, 32], strides = [1, 1]} : vector<2x128xf32> to vector<2x32xf32>
    %367 = arith.mulf %364, %328 : vector<2x32xf32>
    %368 = arith.mulf %363, %365 : vector<2x32xf32>
    %369 = arith.addf %367, %368 : vector<2x32xf32>
    %370 = math.tanh %369 : vector<2x32xf32>
    %371 = arith.mulf %366, %370 : vector<2x32xf32>
    %c6_77 = arith.constant 6 : index
    %c0_78 = arith.constant 0 : index
    %372 = vector.load %arg4[%c6_77, %c0_78] : memref<16x32xf32, #tpu.memory_space<vmem>>, vector<2x32xf32>
    tpu.vector_store %arg4[%c6_77, %c0_78], %371 {strides = array<i32>} : memref<16x32xf32, #tpu.memory_space<vmem>>, vector<2x32xf32>,
    %373 = vector.extract_strided_slice %208 {offsets = [8, 0], sizes = [2, 128], strides = [1, 1]} : vector<16x128xf32> to vector<2x128xf32>
    %374 = arith.truncf %351 : vector<2x32xf32> to vector<2x32xbf16>
    %cst_79 = arith.constant dense<0.000000e+00> : vector<2x128xf32>
    %375 = tpu.matmul %374, %16, %cst_79 {dimension_numbers = #tpu.dot_dimension_numbers<[1], [0], [0], [1], [0, 0, 1, 1], [], []>} : vector<2x32xbf16>, vector<32x128xbf16>, vector<2x128xf32> -> vector<2x128xf32>
    %376 = arith.addf %373, %375 : vector<2x128xf32>
    %377 = arith.negf %376 : vector<2x128xf32>
    %378 = math.exp %377 : vector<2x128xf32>
    %cst_80 = arith.constant 1.000000e+00 : f32
    %379 = vector.broadcast %cst_80 : f32 to vector<2x128xf32>
    %380 = arith.addf %379, %378 : vector<2x128xf32>
    %381 = arith.divf %379, %380 : vector<2x128xf32>
    %382 = arith.mulf %381, %8 : vector<2x128xf32>
    %383 = arith.addf %382, %11 : vector<2x128xf32>
    %384 = vector.extract_strided_slice %383 {offsets = [0, 0], sizes = [2, 32], strides = [1, 1]} : vector<2x128xf32> to vector<2x32xf32>
    %385 = vector.extract_strided_slice %383 {offsets = [0, 32], sizes = [2, 32], strides = [1, 1]} : vector<2x128xf32> to vector<2x32xf32>
    %386 = vector.extract_strided_slice %383 {offsets = [0, 64], sizes = [2, 32], strides = [1, 1]} : vector<2x128xf32> to vector<2x32xf32>
    %387 = vector.extract_strided_slice %383 {offsets = [0, 96], sizes = [2, 32], strides = [1, 1]} : vector<2x128xf32> to vector<2x32xf32>
    %388 = arith.mulf %385, %349 : vector<2x32xf32>
    %389 = arith.mulf %384, %386 : vector<2x32xf32>
    %390 = arith.addf %388, %389 : vector<2x32xf32>
    %391 = math.tanh %390 : vector<2x32xf32>
    %392 = arith.mulf %387, %391 : vector<2x32xf32>
    %393 = vector.extract_strided_slice %35 {offsets = [8, 0], sizes = [2, 128], strides = [1, 1]} : vector<16x128xf32> to vector<2x128xf32>
    %394 = arith.truncf %371 : vector<2x32xf32> to vector<2x32xbf16>
    %cst_81 = arith.constant dense<0.000000e+00> : vector<2x128xf32>
    %395 = tpu.matmul %394, %18, %cst_81 {dimension_numbers = #tpu.dot_dimension_numbers<[1], [0], [0], [1], [0, 0, 1, 1], [], []>} : vector<2x32xbf16>, vector<32x128xbf16>, vector<2x128xf32> -> vector<2x128xf32>
    %396 = arith.addf %393, %395 : vector<2x128xf32>
    %397 = arith.negf %396 : vector<2x128xf32>
    %398 = math.exp %397 : vector<2x128xf32>
    %cst_82 = arith.constant 1.000000e+00 : f32
    %399 = vector.broadcast %cst_82 : f32 to vector<2x128xf32>
    %400 = arith.addf %399, %398 : vector<2x128xf32>
    %401 = arith.divf %399, %400 : vector<2x128xf32>
    %402 = arith.mulf %401, %8 : vector<2x128xf32>
    %403 = arith.addf %402, %11 : vector<2x128xf32>
    %404 = vector.extract_strided_slice %403 {offsets = [0, 0], sizes = [2, 32], strides = [1, 1]} : vector<2x128xf32> to vector<2x32xf32>
    %405 = vector.extract_strided_slice %403 {offsets = [0, 32], sizes = [2, 32], strides = [1, 1]} : vector<2x128xf32> to vector<2x32xf32>
    %406 = vector.extract_strided_slice %403 {offsets = [0, 64], sizes = [2, 32], strides = [1, 1]} : vector<2x128xf32> to vector<2x32xf32>
    %407 = vector.extract_strided_slice %403 {offsets = [0, 96], sizes = [2, 32], strides = [1, 1]} : vector<2x128xf32> to vector<2x32xf32>
    %408 = arith.mulf %405, %369 : vector<2x32xf32>
    %409 = arith.mulf %404, %406 : vector<2x32xf32>
    %410 = arith.addf %408, %409 : vector<2x32xf32>
    %411 = math.tanh %410 : vector<2x32xf32>
    %412 = arith.mulf %407, %411 : vector<2x32xf32>
    %c8_83 = arith.constant 8 : index
    %c0_84 = arith.constant 0 : index
    %413 = vector.load %arg4[%c8_83, %c0_84] : memref<16x32xf32, #tpu.memory_space<vmem>>, vector<2x32xf32>
    tpu.vector_store %arg4[%c8_83, %c0_84], %412 {strides = array<i32>} : memref<16x32xf32, #tpu.memory_space<vmem>>, vector<2x32xf32>,
    %414 = vector.extract_strided_slice %208 {offsets = [10, 0], sizes = [2, 128], strides = [1, 1]} : vector<16x128xf32> to vector<2x128xf32>
    %415 = arith.truncf %392 : vector<2x32xf32> to vector<2x32xbf16>
    %cst_85 = arith.constant dense<0.000000e+00> : vector<2x128xf32>
    %416 = tpu.matmul %415, %16, %cst_85 {dimension_numbers = #tpu.dot_dimension_numbers<[1], [0], [0], [1], [0, 0, 1, 1], [], []>} : vector<2x32xbf16>, vector<32x128xbf16>, vector<2x128xf32> -> vector<2x128xf32>
    %417 = arith.addf %414, %416 : vector<2x128xf32>
    %418 = arith.negf %417 : vector<2x128xf32>
    %419 = math.exp %418 : vector<2x128xf32>
    %cst_86 = arith.constant 1.000000e+00 : f32
    %420 = vector.broadcast %cst_86 : f32 to vector<2x128xf32>
    %421 = arith.addf %420, %419 : vector<2x128xf32>
    %422 = arith.divf %420, %421 : vector<2x128xf32>
    %423 = arith.mulf %422, %8 : vector<2x128xf32>
    %424 = arith.addf %423, %11 : vector<2x128xf32>
    %425 = vector.extract_strided_slice %424 {offsets = [0, 0], sizes = [2, 32], strides = [1, 1]} : vector<2x128xf32> to vector<2x32xf32>
    %426 = vector.extract_strided_slice %424 {offsets = [0, 32], sizes = [2, 32], strides = [1, 1]} : vector<2x128xf32> to vector<2x32xf32>
    %427 = vector.extract_strided_slice %424 {offsets = [0, 64], sizes = [2, 32], strides = [1, 1]} : vector<2x128xf32> to vector<2x32xf32>
    %428 = vector.extract_strided_slice %424 {offsets = [0, 96], sizes = [2, 32], strides = [1, 1]} : vector<2x128xf32> to vector<2x32xf32>
    %429 = arith.mulf %426, %390 : vector<2x32xf32>
    %430 = arith.mulf %425, %427 : vector<2x32xf32>
    %431 = arith.addf %429, %430 : vector<2x32xf32>
    %432 = math.tanh %431 : vector<2x32xf32>
    %433 = arith.mulf %428, %432 : vector<2x32xf32>
    %434 = vector.extract_strided_slice %35 {offsets = [10, 0], sizes = [2, 128], strides = [1, 1]} : vector<16x128xf32> to vector<2x128xf32>
    %435 = arith.truncf %412 : vector<2x32xf32> to vector<2x32xbf16>
    %cst_87 = arith.constant dense<0.000000e+00> : vector<2x128xf32>
    %436 = tpu.matmul %435, %18, %cst_87 {dimension_numbers = #tpu.dot_dimension_numbers<[1], [0], [0], [1], [0, 0, 1, 1], [], []>} : vector<2x32xbf16>, vector<32x128xbf16>, vector<2x128xf32> -> vector<2x128xf32>
    %437 = arith.addf %434, %436 : vector<2x128xf32>
    %438 = arith.negf %437 : vector<2x128xf32>
    %439 = math.exp %438 : vector<2x128xf32>
    %cst_88 = arith.constant 1.000000e+00 : f32
    %440 = vector.broadcast %cst_88 : f32 to vector<2x128xf32>
    %441 = arith.addf %440, %439 : vector<2x128xf32>
    %442 = arith.divf %440, %441 : vector<2x128xf32>
    %443 = arith.mulf %442, %8 : vector<2x128xf32>
    %444 = arith.addf %443, %11 : vector<2x128xf32>
    %445 = vector.extract_strided_slice %444 {offsets = [0, 0], sizes = [2, 32], strides = [1, 1]} : vector<2x128xf32> to vector<2x32xf32>
    %446 = vector.extract_strided_slice %444 {offsets = [0, 32], sizes = [2, 32], strides = [1, 1]} : vector<2x128xf32> to vector<2x32xf32>
    %447 = vector.extract_strided_slice %444 {offsets = [0, 64], sizes = [2, 32], strides = [1, 1]} : vector<2x128xf32> to vector<2x32xf32>
    %448 = vector.extract_strided_slice %444 {offsets = [0, 96], sizes = [2, 32], strides = [1, 1]} : vector<2x128xf32> to vector<2x32xf32>
    %449 = arith.mulf %446, %410 : vector<2x32xf32>
    %450 = arith.mulf %445, %447 : vector<2x32xf32>
    %451 = arith.addf %449, %450 : vector<2x32xf32>
    %452 = math.tanh %451 : vector<2x32xf32>
    %453 = arith.mulf %448, %452 : vector<2x32xf32>
    %c10_89 = arith.constant 10 : index
    %c0_90 = arith.constant 0 : index
    %454 = vector.load %arg4[%c10_89, %c0_90] : memref<16x32xf32, #tpu.memory_space<vmem>>, vector<2x32xf32>
    tpu.vector_store %arg4[%c10_89, %c0_90], %453 {strides = array<i32>} : memref<16x32xf32, #tpu.memory_space<vmem>>, vector<2x32xf32>,
    %455 = vector.extract_strided_slice %208 {offsets = [12, 0], sizes = [2, 128], strides = [1, 1]} : vector<16x128xf32> to vector<2x128xf32>
    %456 = arith.truncf %433 : vector<2x32xf32> to vector<2x32xbf16>
    %cst_91 = arith.constant dense<0.000000e+00> : vector<2x128xf32>
    %457 = tpu.matmul %456, %16, %cst_91 {dimension_numbers = #tpu.dot_dimension_numbers<[1], [0], [0], [1], [0, 0, 1, 1], [], []>} : vector<2x32xbf16>, vector<32x128xbf16>, vector<2x128xf32> -> vector<2x128xf32>
    %458 = arith.addf %455, %457 : vector<2x128xf32>
    %459 = arith.negf %458 : vector<2x128xf32>
    %460 = math.exp %459 : vector<2x128xf32>
    %cst_92 = arith.constant 1.000000e+00 : f32
    %461 = vector.broadcast %cst_92 : f32 to vector<2x128xf32>
    %462 = arith.addf %461, %460 : vector<2x128xf32>
    %463 = arith.divf %461, %462 : vector<2x128xf32>
    %464 = arith.mulf %463, %8 : vector<2x128xf32>
    %465 = arith.addf %464, %11 : vector<2x128xf32>
    %466 = vector.extract_strided_slice %465 {offsets = [0, 0], sizes = [2, 32], strides = [1, 1]} : vector<2x128xf32> to vector<2x32xf32>
    %467 = vector.extract_strided_slice %465 {offsets = [0, 32], sizes = [2, 32], strides = [1, 1]} : vector<2x128xf32> to vector<2x32xf32>
    %468 = vector.extract_strided_slice %465 {offsets = [0, 64], sizes = [2, 32], strides = [1, 1]} : vector<2x128xf32> to vector<2x32xf32>
    %469 = vector.extract_strided_slice %465 {offsets = [0, 96], sizes = [2, 32], strides = [1, 1]} : vector<2x128xf32> to vector<2x32xf32>
    %470 = arith.mulf %467, %431 : vector<2x32xf32>
    %471 = arith.mulf %466, %468 : vector<2x32xf32>
    %472 = arith.addf %470, %471 : vector<2x32xf32>
    %473 = math.tanh %472 : vector<2x32xf32>
    %474 = arith.mulf %469, %473 : vector<2x32xf32>
    %475 = vector.extract_strided_slice %35 {offsets = [12, 0], sizes = [2, 128], strides = [1, 1]} : vector<16x128xf32> to vector<2x128xf32>
    %476 = arith.truncf %453 : vector<2x32xf32> to vector<2x32xbf16>
    %cst_93 = arith.constant dense<0.000000e+00> : vector<2x128xf32>
    %477 = tpu.matmul %476, %18, %cst_93 {dimension_numbers = #tpu.dot_dimension_numbers<[1], [0], [0], [1], [0, 0, 1, 1], [], []>} : vector<2x32xbf16>, vector<32x128xbf16>, vector<2x128xf32> -> vector<2x128xf32>
    %478 = arith.addf %475, %477 : vector<2x128xf32>
    %479 = arith.negf %478 : vector<2x128xf32>
    %480 = math.exp %479 : vector<2x128xf32>
    %cst_94 = arith.constant 1.000000e+00 : f32
    %481 = vector.broadcast %cst_94 : f32 to vector<2x128xf32>
    %482 = arith.addf %481, %480 : vector<2x128xf32>
    %483 = arith.divf %481, %482 : vector<2x128xf32>
    %484 = arith.mulf %483, %8 : vector<2x128xf32>
    %485 = arith.addf %484, %11 : vector<2x128xf32>
    %486 = vector.extract_strided_slice %485 {offsets = [0, 0], sizes = [2, 32], strides = [1, 1]} : vector<2x128xf32> to vector<2x32xf32>
    %487 = vector.extract_strided_slice %485 {offsets = [0, 32], sizes = [2, 32], strides = [1, 1]} : vector<2x128xf32> to vector<2x32xf32>
    %488 = vector.extract_strided_slice %485 {offsets = [0, 64], sizes = [2, 32], strides = [1, 1]} : vector<2x128xf32> to vector<2x32xf32>
    %489 = vector.extract_strided_slice %485 {offsets = [0, 96], sizes = [2, 32], strides = [1, 1]} : vector<2x128xf32> to vector<2x32xf32>
    %490 = arith.mulf %487, %451 : vector<2x32xf32>
    %491 = arith.mulf %486, %488 : vector<2x32xf32>
    %492 = arith.addf %490, %491 : vector<2x32xf32>
    %493 = math.tanh %492 : vector<2x32xf32>
    %494 = arith.mulf %489, %493 : vector<2x32xf32>
    %c12_95 = arith.constant 12 : index
    %c0_96 = arith.constant 0 : index
    %495 = vector.load %arg4[%c12_95, %c0_96] : memref<16x32xf32, #tpu.memory_space<vmem>>, vector<2x32xf32>
    tpu.vector_store %arg4[%c12_95, %c0_96], %494 {strides = array<i32>} : memref<16x32xf32, #tpu.memory_space<vmem>>, vector<2x32xf32>,
    %496 = vector.extract_strided_slice %208 {offsets = [14, 0], sizes = [2, 128], strides = [1, 1]} : vector<16x128xf32> to vector<2x128xf32>
    %497 = arith.truncf %474 : vector<2x32xf32> to vector<2x32xbf16>
    %cst_97 = arith.constant dense<0.000000e+00> : vector<2x128xf32>
    %498 = tpu.matmul %497, %16, %cst_97 {dimension_numbers = #tpu.dot_dimension_numbers<[1], [0], [0], [1], [0, 0, 1, 1], [], []>} : vector<2x32xbf16>, vector<32x128xbf16>, vector<2x128xf32> -> vector<2x128xf32>
    %499 = arith.addf %496, %498 : vector<2x128xf32>
    %500 = arith.negf %499 : vector<2x128xf32>
    %501 = math.exp %500 : vector<2x128xf32>
    %cst_98 = arith.constant 1.000000e+00 : f32
    %502 = vector.broadcast %cst_98 : f32 to vector<2x128xf32>
    %503 = arith.addf %502, %501 : vector<2x128xf32>
    %504 = arith.divf %502, %503 : vector<2x128xf32>
    %505 = arith.mulf %504, %8 : vector<2x128xf32>
    %506 = arith.addf %505, %11 : vector<2x128xf32>
    %507 = vector.extract_strided_slice %506 {offsets = [0, 0], sizes = [2, 32], strides = [1, 1]} : vector<2x128xf32> to vector<2x32xf32>
    %508 = vector.extract_strided_slice %506 {offsets = [0, 32], sizes = [2, 32], strides = [1, 1]} : vector<2x128xf32> to vector<2x32xf32>
    %509 = vector.extract_strided_slice %506 {offsets = [0, 64], sizes = [2, 32], strides = [1, 1]} : vector<2x128xf32> to vector<2x32xf32>
    %510 = vector.extract_strided_slice %506 {offsets = [0, 96], sizes = [2, 32], strides = [1, 1]} : vector<2x128xf32> to vector<2x32xf32>
    %511 = arith.mulf %508, %472 : vector<2x32xf32>
    %512 = arith.mulf %507, %509 : vector<2x32xf32>
    %513 = arith.addf %511, %512 : vector<2x32xf32>
    %514 = math.tanh %513 : vector<2x32xf32>
    %515 = arith.mulf %510, %514 : vector<2x32xf32>
    %516 = vector.extract_strided_slice %35 {offsets = [14, 0], sizes = [2, 128], strides = [1, 1]} : vector<16x128xf32> to vector<2x128xf32>
    %517 = arith.truncf %494 : vector<2x32xf32> to vector<2x32xbf16>
    %cst_99 = arith.constant dense<0.000000e+00> : vector<2x128xf32>
    %518 = tpu.matmul %517, %18, %cst_99 {dimension_numbers = #tpu.dot_dimension_numbers<[1], [0], [0], [1], [0, 0, 1, 1], [], []>} : vector<2x32xbf16>, vector<32x128xbf16>, vector<2x128xf32> -> vector<2x128xf32>
    %519 = arith.addf %516, %518 : vector<2x128xf32>
    %520 = arith.negf %519 : vector<2x128xf32>
    %521 = math.exp %520 : vector<2x128xf32>
    %cst_100 = arith.constant 1.000000e+00 : f32
    %522 = vector.broadcast %cst_100 : f32 to vector<2x128xf32>
    %523 = arith.addf %522, %521 : vector<2x128xf32>
    %524 = arith.divf %522, %523 : vector<2x128xf32>
    %525 = arith.mulf %524, %8 : vector<2x128xf32>
    %526 = arith.addf %525, %11 : vector<2x128xf32>
    %527 = vector.extract_strided_slice %526 {offsets = [0, 0], sizes = [2, 32], strides = [1, 1]} : vector<2x128xf32> to vector<2x32xf32>
    %528 = vector.extract_strided_slice %526 {offsets = [0, 32], sizes = [2, 32], strides = [1, 1]} : vector<2x128xf32> to vector<2x32xf32>
    %529 = vector.extract_strided_slice %526 {offsets = [0, 64], sizes = [2, 32], strides = [1, 1]} : vector<2x128xf32> to vector<2x32xf32>
    %530 = vector.extract_strided_slice %526 {offsets = [0, 96], sizes = [2, 32], strides = [1, 1]} : vector<2x128xf32> to vector<2x32xf32>
    %531 = arith.mulf %528, %492 : vector<2x32xf32>
    %532 = arith.mulf %527, %529 : vector<2x32xf32>
    %533 = arith.addf %531, %532 : vector<2x32xf32>
    %534 = math.tanh %533 : vector<2x32xf32>
    %535 = arith.mulf %530, %534 : vector<2x32xf32>
    %c14_101 = arith.constant 14 : index
    %c0_102 = arith.constant 0 : index
    %536 = vector.load %arg4[%c14_101, %c0_102] : memref<16x32xf32, #tpu.memory_space<vmem>>, vector<2x32xf32>
    tpu.vector_store %arg4[%c14_101, %c0_102], %535 {strides = array<i32>} : memref<16x32xf32, #tpu.memory_space<vmem>>, vector<2x32xf32>,
    %c0_103 = arith.constant 0 : index
    %c0_104 = arith.constant 0 : index
    %537 = vector.load %arg4[%c0_103, %c0_104] : memref<16x32xf32, #tpu.memory_space<vmem>>, vector<16x32xf32>
    %538 = arith.truncf %537 : vector<16x32xf32> to vector<16x32xbf16>
    %cst_105 = arith.constant dense<0.000000e+00> : vector<16x128xf32>
    %539 = tpu.matmul %538, %19, %cst_105 {dimension_numbers = #tpu.dot_dimension_numbers<[1], [0], [0], [1], [0, 0, 1, 1], [], []>} : vector<16x32xbf16>, vector<32x128xbf16>, vector<16x128xf32> -> vector<16x128xf32>
    %540 = vector.broadcast %26 : vector<1x128xf32> to vector<16x128xf32>
    %541 = arith.addf %539, %540 : vector<16x128xf32>
    %542 = vector.extract_strided_slice %541 {offsets = [0, 0], sizes = [2, 128], strides = [1, 1]} : vector<16x128xf32> to vector<2x128xf32>
    %543 = arith.truncf %515 : vector<2x32xf32> to vector<2x32xbf16>
    %cst_106 = arith.constant dense<0.000000e+00> : vector<2x128xf32>
    %544 = tpu.matmul %543, %20, %cst_106 {dimension_numbers = #tpu.dot_dimension_numbers<[1], [0], [0], [1], [0, 0, 1, 1], [], []>} : vector<2x32xbf16>, vector<32x128xbf16>, vector<2x128xf32> -> vector<2x128xf32>
    %545 = arith.addf %542, %544 : vector<2x128xf32>
    %546 = arith.negf %545 : vector<2x128xf32>
    %547 = math.exp %546 : vector<2x128xf32>
    %cst_107 = arith.constant 1.000000e+00 : f32
    %548 = vector.broadcast %cst_107 : f32 to vector<2x128xf32>
    %549 = arith.addf %548, %547 : vector<2x128xf32>
    %550 = arith.divf %548, %549 : vector<2x128xf32>
    %551 = arith.mulf %550, %8 : vector<2x128xf32>
    %552 = arith.addf %551, %11 : vector<2x128xf32>
    %553 = vector.extract_strided_slice %552 {offsets = [0, 0], sizes = [2, 32], strides = [1, 1]} : vector<2x128xf32> to vector<2x32xf32>
    %554 = vector.extract_strided_slice %552 {offsets = [0, 32], sizes = [2, 32], strides = [1, 1]} : vector<2x128xf32> to vector<2x32xf32>
    %555 = vector.extract_strided_slice %552 {offsets = [0, 64], sizes = [2, 32], strides = [1, 1]} : vector<2x128xf32> to vector<2x32xf32>
    %556 = vector.extract_strided_slice %552 {offsets = [0, 96], sizes = [2, 32], strides = [1, 1]} : vector<2x128xf32> to vector<2x32xf32>
    %557 = arith.mulf %554, %513 : vector<2x32xf32>
    %558 = arith.mulf %553, %555 : vector<2x32xf32>
    %559 = arith.addf %557, %558 : vector<2x32xf32>
    %560 = math.tanh %559 : vector<2x32xf32>
    %561 = arith.mulf %556, %560 : vector<2x32xf32>
    %562 = vector.extract_strided_slice %541 {offsets = [2, 0], sizes = [2, 128], strides = [1, 1]} : vector<16x128xf32> to vector<2x128xf32>
    %563 = arith.truncf %561 : vector<2x32xf32> to vector<2x32xbf16>
    %cst_108 = arith.constant dense<0.000000e+00> : vector<2x128xf32>
    %564 = tpu.matmul %563, %20, %cst_108 {dimension_numbers = #tpu.dot_dimension_numbers<[1], [0], [0], [1], [0, 0, 1, 1], [], []>} : vector<2x32xbf16>, vector<32x128xbf16>, vector<2x128xf32> -> vector<2x128xf32>
    %565 = arith.addf %562, %564 : vector<2x128xf32>
    %566 = arith.negf %565 : vector<2x128xf32>
    %567 = math.exp %566 : vector<2x128xf32>
    %cst_109 = arith.constant 1.000000e+00 : f32
    %568 = vector.broadcast %cst_109 : f32 to vector<2x128xf32>
    %569 = arith.addf %568, %567 : vector<2x128xf32>
    %570 = arith.divf %568, %569 : vector<2x128xf32>
    %571 = arith.mulf %570, %8 : vector<2x128xf32>
    %572 = arith.addf %571, %11 : vector<2x128xf32>
    %573 = vector.extract_strided_slice %572 {offsets = [0, 0], sizes = [2, 32], strides = [1, 1]} : vector<2x128xf32> to vector<2x32xf32>
    %574 = vector.extract_strided_slice %572 {offsets = [0, 32], sizes = [2, 32], strides = [1, 1]} : vector<2x128xf32> to vector<2x32xf32>
    %575 = vector.extract_strided_slice %572 {offsets = [0, 64], sizes = [2, 32], strides = [1, 1]} : vector<2x128xf32> to vector<2x32xf32>
    %576 = vector.extract_strided_slice %572 {offsets = [0, 96], sizes = [2, 32], strides = [1, 1]} : vector<2x128xf32> to vector<2x32xf32>
    %577 = arith.mulf %574, %559 : vector<2x32xf32>
    %578 = arith.mulf %573, %575 : vector<2x32xf32>
    %579 = arith.addf %577, %578 : vector<2x32xf32>
    %580 = math.tanh %579 : vector<2x32xf32>
    %581 = arith.mulf %576, %580 : vector<2x32xf32>
    %582 = vector.extract_strided_slice %541 {offsets = [4, 0], sizes = [2, 128], strides = [1, 1]} : vector<16x128xf32> to vector<2x128xf32>
    %583 = arith.truncf %581 : vector<2x32xf32> to vector<2x32xbf16>
    %cst_110 = arith.constant dense<0.000000e+00> : vector<2x128xf32>
    %584 = tpu.matmul %583, %20, %cst_110 {dimension_numbers = #tpu.dot_dimension_numbers<[1], [0], [0], [1], [0, 0, 1, 1], [], []>} : vector<2x32xbf16>, vector<32x128xbf16>, vector<2x128xf32> -> vector<2x128xf32>
    %585 = arith.addf %582, %584 : vector<2x128xf32>
    %586 = arith.negf %585 : vector<2x128xf32>
    %587 = math.exp %586 : vector<2x128xf32>
    %cst_111 = arith.constant 1.000000e+00 : f32
    %588 = vector.broadcast %cst_111 : f32 to vector<2x128xf32>
    %589 = arith.addf %588, %587 : vector<2x128xf32>
    %590 = arith.divf %588, %589 : vector<2x128xf32>
    %591 = arith.mulf %590, %8 : vector<2x128xf32>
    %592 = arith.addf %591, %11 : vector<2x128xf32>
    %593 = vector.extract_strided_slice %592 {offsets = [0, 0], sizes = [2, 32], strides = [1, 1]} : vector<2x128xf32> to vector<2x32xf32>
    %594 = vector.extract_strided_slice %592 {offsets = [0, 32], sizes = [2, 32], strides = [1, 1]} : vector<2x128xf32> to vector<2x32xf32>
    %595 = vector.extract_strided_slice %592 {offsets = [0, 64], sizes = [2, 32], strides = [1, 1]} : vector<2x128xf32> to vector<2x32xf32>
    %596 = vector.extract_strided_slice %592 {offsets = [0, 96], sizes = [2, 32], strides = [1, 1]} : vector<2x128xf32> to vector<2x32xf32>
    %597 = arith.mulf %594, %579 : vector<2x32xf32>
    %598 = arith.mulf %593, %595 : vector<2x32xf32>
    %599 = arith.addf %597, %598 : vector<2x32xf32>
    %600 = math.tanh %599 : vector<2x32xf32>
    %601 = arith.mulf %596, %600 : vector<2x32xf32>
    %602 = vector.extract_strided_slice %541 {offsets = [6, 0], sizes = [2, 128], strides = [1, 1]} : vector<16x128xf32> to vector<2x128xf32>
    %603 = arith.truncf %601 : vector<2x32xf32> to vector<2x32xbf16>
    %cst_112 = arith.constant dense<0.000000e+00> : vector<2x128xf32>
    %604 = tpu.matmul %603, %20, %cst_112 {dimension_numbers = #tpu.dot_dimension_numbers<[1], [0], [0], [1], [0, 0, 1, 1], [], []>} : vector<2x32xbf16>, vector<32x128xbf16>, vector<2x128xf32> -> vector<2x128xf32>
    %605 = arith.addf %602, %604 : vector<2x128xf32>
    %606 = arith.negf %605 : vector<2x128xf32>
    %607 = math.exp %606 : vector<2x128xf32>
    %cst_113 = arith.constant 1.000000e+00 : f32
    %608 = vector.broadcast %cst_113 : f32 to vector<2x128xf32>
    %609 = arith.addf %608, %607 : vector<2x128xf32>
    %610 = arith.divf %608, %609 : vector<2x128xf32>
    %611 = arith.mulf %610, %8 : vector<2x128xf32>
    %612 = arith.addf %611, %11 : vector<2x128xf32>
    %613 = vector.extract_strided_slice %612 {offsets = [0, 0], sizes = [2, 32], strides = [1, 1]} : vector<2x128xf32> to vector<2x32xf32>
    %614 = vector.extract_strided_slice %612 {offsets = [0, 32], sizes = [2, 32], strides = [1, 1]} : vector<2x128xf32> to vector<2x32xf32>
    %615 = vector.extract_strided_slice %612 {offsets = [0, 64], sizes = [2, 32], strides = [1, 1]} : vector<2x128xf32> to vector<2x32xf32>
    %616 = vector.extract_strided_slice %612 {offsets = [0, 96], sizes = [2, 32], strides = [1, 1]} : vector<2x128xf32> to vector<2x32xf32>
    %617 = arith.mulf %614, %599 : vector<2x32xf32>
    %618 = arith.mulf %613, %615 : vector<2x32xf32>
    %619 = arith.addf %617, %618 : vector<2x32xf32>
    %620 = math.tanh %619 : vector<2x32xf32>
    %621 = arith.mulf %616, %620 : vector<2x32xf32>
    %622 = vector.extract_strided_slice %541 {offsets = [8, 0], sizes = [2, 128], strides = [1, 1]} : vector<16x128xf32> to vector<2x128xf32>
    %623 = arith.truncf %621 : vector<2x32xf32> to vector<2x32xbf16>
    %cst_114 = arith.constant dense<0.000000e+00> : vector<2x128xf32>
    %624 = tpu.matmul %623, %20, %cst_114 {dimension_numbers = #tpu.dot_dimension_numbers<[1], [0], [0], [1], [0, 0, 1, 1], [], []>} : vector<2x32xbf16>, vector<32x128xbf16>, vector<2x128xf32> -> vector<2x128xf32>
    %625 = arith.addf %622, %624 : vector<2x128xf32>
    %626 = arith.negf %625 : vector<2x128xf32>
    %627 = math.exp %626 : vector<2x128xf32>
    %cst_115 = arith.constant 1.000000e+00 : f32
    %628 = vector.broadcast %cst_115 : f32 to vector<2x128xf32>
    %629 = arith.addf %628, %627 : vector<2x128xf32>
    %630 = arith.divf %628, %629 : vector<2x128xf32>
    %631 = arith.mulf %630, %8 : vector<2x128xf32>
    %632 = arith.addf %631, %11 : vector<2x128xf32>
    %633 = vector.extract_strided_slice %632 {offsets = [0, 0], sizes = [2, 32], strides = [1, 1]} : vector<2x128xf32> to vector<2x32xf32>
    %634 = vector.extract_strided_slice %632 {offsets = [0, 32], sizes = [2, 32], strides = [1, 1]} : vector<2x128xf32> to vector<2x32xf32>
    %635 = vector.extract_strided_slice %632 {offsets = [0, 64], sizes = [2, 32], strides = [1, 1]} : vector<2x128xf32> to vector<2x32xf32>
    %636 = vector.extract_strided_slice %632 {offsets = [0, 96], sizes = [2, 32], strides = [1, 1]} : vector<2x128xf32> to vector<2x32xf32>
    %637 = arith.mulf %634, %619 : vector<2x32xf32>
    %638 = arith.mulf %633, %635 : vector<2x32xf32>
    %639 = arith.addf %637, %638 : vector<2x32xf32>
    %640 = math.tanh %639 : vector<2x32xf32>
    %641 = arith.mulf %636, %640 : vector<2x32xf32>
    %642 = vector.extract_strided_slice %541 {offsets = [10, 0], sizes = [2, 128], strides = [1, 1]} : vector<16x128xf32> to vector<2x128xf32>
    %643 = arith.truncf %641 : vector<2x32xf32> to vector<2x32xbf16>
    %cst_116 = arith.constant dense<0.000000e+00> : vector<2x128xf32>
    %644 = tpu.matmul %643, %20, %cst_116 {dimension_numbers = #tpu.dot_dimension_numbers<[1], [0], [0], [1], [0, 0, 1, 1], [], []>} : vector<2x32xbf16>, vector<32x128xbf16>, vector<2x128xf32> -> vector<2x128xf32>
    %645 = arith.addf %642, %644 : vector<2x128xf32>
    %646 = arith.negf %645 : vector<2x128xf32>
    %647 = math.exp %646 : vector<2x128xf32>
    %cst_117 = arith.constant 1.000000e+00 : f32
    %648 = vector.broadcast %cst_117 : f32 to vector<2x128xf32>
    %649 = arith.addf %648, %647 : vector<2x128xf32>
    %650 = arith.divf %648, %649 : vector<2x128xf32>
    %651 = arith.mulf %650, %8 : vector<2x128xf32>
    %652 = arith.addf %651, %11 : vector<2x128xf32>
    %653 = vector.extract_strided_slice %652 {offsets = [0, 0], sizes = [2, 32], strides = [1, 1]} : vector<2x128xf32> to vector<2x32xf32>
    %654 = vector.extract_strided_slice %652 {offsets = [0, 32], sizes = [2, 32], strides = [1, 1]} : vector<2x128xf32> to vector<2x32xf32>
    %655 = vector.extract_strided_slice %652 {offsets = [0, 64], sizes = [2, 32], strides = [1, 1]} : vector<2x128xf32> to vector<2x32xf32>
    %656 = vector.extract_strided_slice %652 {offsets = [0, 96], sizes = [2, 32], strides = [1, 1]} : vector<2x128xf32> to vector<2x32xf32>
    %657 = arith.mulf %654, %639 : vector<2x32xf32>
    %658 = arith.mulf %653, %655 : vector<2x32xf32>
    %659 = arith.addf %657, %658 : vector<2x32xf32>
    %660 = math.tanh %659 : vector<2x32xf32>
    %661 = arith.mulf %656, %660 : vector<2x32xf32>
    %662 = vector.extract_strided_slice %541 {offsets = [12, 0], sizes = [2, 128], strides = [1, 1]} : vector<16x128xf32> to vector<2x128xf32>
    %663 = arith.truncf %661 : vector<2x32xf32> to vector<2x32xbf16>
    %cst_118 = arith.constant dense<0.000000e+00> : vector<2x128xf32>
    %664 = tpu.matmul %663, %20, %cst_118 {dimension_numbers = #tpu.dot_dimension_numbers<[1], [0], [0], [1], [0, 0, 1, 1], [], []>} : vector<2x32xbf16>, vector<32x128xbf16>, vector<2x128xf32> -> vector<2x128xf32>
    %665 = arith.addf %662, %664 : vector<2x128xf32>
    %666 = arith.negf %665 : vector<2x128xf32>
    %667 = math.exp %666 : vector<2x128xf32>
    %cst_119 = arith.constant 1.000000e+00 : f32
    %668 = vector.broadcast %cst_119 : f32 to vector<2x128xf32>
    %669 = arith.addf %668, %667 : vector<2x128xf32>
    %670 = arith.divf %668, %669 : vector<2x128xf32>
    %671 = arith.mulf %670, %8 : vector<2x128xf32>
    %672 = arith.addf %671, %11 : vector<2x128xf32>
    %673 = vector.extract_strided_slice %672 {offsets = [0, 0], sizes = [2, 32], strides = [1, 1]} : vector<2x128xf32> to vector<2x32xf32>
    %674 = vector.extract_strided_slice %672 {offsets = [0, 32], sizes = [2, 32], strides = [1, 1]} : vector<2x128xf32> to vector<2x32xf32>
    %675 = vector.extract_strided_slice %672 {offsets = [0, 64], sizes = [2, 32], strides = [1, 1]} : vector<2x128xf32> to vector<2x32xf32>
    %676 = vector.extract_strided_slice %672 {offsets = [0, 96], sizes = [2, 32], strides = [1, 1]} : vector<2x128xf32> to vector<2x32xf32>
    %677 = arith.mulf %674, %659 : vector<2x32xf32>
    %678 = arith.mulf %673, %675 : vector<2x32xf32>
    %679 = arith.addf %677, %678 : vector<2x32xf32>
    %680 = math.tanh %679 : vector<2x32xf32>
    %681 = arith.mulf %676, %680 : vector<2x32xf32>
    %682 = vector.extract_strided_slice %541 {offsets = [14, 0], sizes = [2, 128], strides = [1, 1]} : vector<16x128xf32> to vector<2x128xf32>
    %683 = arith.truncf %681 : vector<2x32xf32> to vector<2x32xbf16>
    %cst_120 = arith.constant dense<0.000000e+00> : vector<2x128xf32>
    %684 = tpu.matmul %683, %20, %cst_120 {dimension_numbers = #tpu.dot_dimension_numbers<[1], [0], [0], [1], [0, 0, 1, 1], [], []>} : vector<2x32xbf16>, vector<32x128xbf16>, vector<2x128xf32> -> vector<2x128xf32>
    %685 = arith.addf %682, %684 : vector<2x128xf32>
    %686 = arith.negf %685 : vector<2x128xf32>
    %687 = math.exp %686 : vector<2x128xf32>
    %cst_121 = arith.constant 1.000000e+00 : f32
    %688 = vector.broadcast %cst_121 : f32 to vector<2x128xf32>
    %689 = arith.addf %688, %687 : vector<2x128xf32>
    %690 = arith.divf %688, %689 : vector<2x128xf32>
    %691 = arith.mulf %690, %8 : vector<2x128xf32>
    %692 = arith.addf %691, %11 : vector<2x128xf32>
    %693 = vector.extract_strided_slice %692 {offsets = [0, 0], sizes = [2, 32], strides = [1, 1]} : vector<2x128xf32> to vector<2x32xf32>
    %694 = vector.extract_strided_slice %692 {offsets = [0, 32], sizes = [2, 32], strides = [1, 1]} : vector<2x128xf32> to vector<2x32xf32>
    %695 = vector.extract_strided_slice %692 {offsets = [0, 64], sizes = [2, 32], strides = [1, 1]} : vector<2x128xf32> to vector<2x32xf32>
    %696 = vector.extract_strided_slice %692 {offsets = [0, 96], sizes = [2, 32], strides = [1, 1]} : vector<2x128xf32> to vector<2x32xf32>
    %697 = arith.mulf %694, %679 : vector<2x32xf32>
    %698 = arith.mulf %693, %695 : vector<2x32xf32>
    %699 = arith.addf %697, %698 : vector<2x32xf32>
    %700 = math.tanh %699 : vector<2x32xf32>
    %701 = arith.mulf %696, %700 : vector<2x32xf32>
    %cst_122 = arith.constant 0.000000e+00 : f32
    %702 = vector.broadcast %cst_122 : f32 to vector<8x32xf32>
    %c0_123 = arith.constant 0 : index
    %c0_124 = arith.constant 0 : index
    %703 = vector.load %arg5[%c0_123, %c0_124] : memref<8x32xf32, #tpu.memory_space<vmem>>, vector<8x32xf32>
    tpu.vector_store %arg5[%c0_123, %c0_124], %702 {strides = array<i32>} : memref<8x32xf32, #tpu.memory_space<vmem>>, vector<8x32xf32>,
    %c0_125 = arith.constant 0 : index
    %c0_126 = arith.constant 0 : index
    %704 = vector.load %arg5[%c0_125, %c0_126] : memref<8x32xf32, #tpu.memory_space<vmem>>, vector<2x32xf32>
    tpu.vector_store %arg5[%c0_125, %c0_126], %535 {strides = array<i32>} : memref<8x32xf32, #tpu.memory_space<vmem>>, vector<2x32xf32>,
    %c2_127 = arith.constant 2 : index
    %c0_128 = arith.constant 0 : index
    %705 = vector.load %arg5[%c2_127, %c0_128] : memref<8x32xf32, #tpu.memory_space<vmem>>, vector<2x32xf32>
    tpu.vector_store %arg5[%c2_127, %c0_128], %701 {strides = array<i32>} : memref<8x32xf32, #tpu.memory_space<vmem>>, vector<2x32xf32>,
    %c0_129 = arith.constant 0 : index
    %c0_130 = arith.constant 0 : index
    %706 = vector.load %arg5[%c0_129, %c0_130] : memref<8x32xf32, #tpu.memory_space<vmem>>, vector<8x32xf32>
    %cst_131 = arith.constant 0.000000e+00 : f32
    %707 = vector.broadcast %cst_131 : f32 to vector<8x32xf32>
    %708 = arith.maximumf %706, %707 : vector<8x32xf32>
    %709 = arith.truncf %708 : vector<8x32xf32> to vector<8x32xbf16>
    %cst_132 = arith.constant dense<0.000000e+00> : vector<8x128xf32>
    %710 = tpu.matmul %709, %21, %cst_132 {dimension_numbers = #tpu.dot_dimension_numbers<[1], [0], [0], [1], [0, 0, 1, 1], [], []>} : vector<8x32xbf16>, vector<32x128xbf16>, vector<8x128xf32> -> vector<8x128xf32>
    %711 = vector.broadcast %27 : vector<1x128xf32> to vector<8x128xf32>
    %712 = arith.addf %710, %711 : vector<8x128xf32>
    %cst_133 = arith.constant 0.000000e+00 : f32
    %713 = vector.broadcast %cst_133 : f32 to vector<8x128xf32>
    %714 = arith.maximumf %712, %713 : vector<8x128xf32>
    %715 = arith.truncf %714 : vector<8x128xf32> to vector<8x128xbf16>
    %cst_134 = arith.constant dense<0.000000e+00> : vector<8x128xf32>
    %716 = tpu.matmul %715, %22, %cst_134 {dimension_numbers = #tpu.dot_dimension_numbers<[1], [0], [0], [1], [0, 0, 1, 1], [], []>} : vector<8x128xbf16>, vector<128x128xbf16>, vector<8x128xf32> -> vector<8x128xf32>
    %717 = vector.broadcast %28 : vector<1x128xf32> to vector<8x128xf32>
    %718 = arith.addf %716, %717 : vector<8x128xf32>
    %c0_135 = arith.constant 0 : index
    %c0_136 = arith.constant 0 : index
    %719 = vector.load %arg3[%c0_135, %c0_136] : memref<8x128xf32, #tpu.memory_space<vmem>>, vector<8x128xf32>
    tpu.vector_store %arg3[%c0_135, %c0_136], %718 {strides = array<i32>} : memref<8x128xf32, #tpu.memory_space<vmem>>, vector<8x128xf32>,
    return
  }
}

</mosaic_0001>

<bundles_post_ra>
// kernel: tpu_custom_call.1
= control target key start
LH: loop header
LB: loop body
LE: loop exit
PB: predicated region body
PF: predicated region fallthrough
CT: control target
= control target key end

     0   :  { %8 = vsyncpa [#allocation5], 0  ;;  %s4810_s0 = inlined_call_operand.hbm [shape: bf16[16,16], index: 0, kind: input, shape index: {}]   ;;  %s4811_s1 = inlined_call_operand.hbm [shape: bf16[384,128], index: 1, kind: input, shape index: {}]   ;;  %s4812_s2 = inlined_call_operand.hbm [shape: f32[8,128], index: 2, kind: input, shape index: {}]   ;;  %s4813_s3 = inlined_call_operand.hbm [shape: f32[8,128], index: 3, kind: output, shape index: {}]  }
   0x1   :  { %9 = vsyncpa [#allocation8], 0 }
   0x2   :  { %10 = vsyncpa [#allocation6], 0  ;;  %s4027_s12 = smov [#allocation7]   ;;  %s4028_s14 = smov [#allocation4]  }
   0x3   :  { %s28_s13 = sshll.u32 %s4027_s12, 4  ;;  %s16_s15 = sshll.u32 %s4028_s14, 4  ;;  %s29_s13 = int_to_ptr.vmem [resolvable:$true] %s28_s13  ;;  %s4058_s15 = int_to_ptr.vmem [resolvable:$true] %s16_s15 }
   0x4   :  { %s3933_s18 = scalar_lea.hbm %s4811_s1, 3072 }
   0x5   :  { %p3934_p0 = scmp.ne.s32.totalorder %s4811_s1, %s3933_s18  ;;  %p3937_p1 = scmp.lt.u32.totalorder %s3933_s18, %s4811_s1 }
   0x7   :  { %p3939_p2 = pnand %p3937_p1, %p3934_p0 }
   0x9   :  { %3942 = shalt.err (!%p3939_p2)
}
   0xa   :  { %s3943_s23 = scalar_lea.vmem %s29_s13, 3072  ;;  %p3948_p4 = scmp.lt.s32.totalorder %s29_s13, %s29_s13 }
   0xb   :  { %p3944_p3 = scmp.ne.s32.totalorder %s29_s13, %s3943_s23  ;;  %p3949_p5 = scmp.lt.s32.totalorder %s3943_s23, %s3943_s23 }
   0xd   :  { %p3950_p6 = por %p3949_p5, %p3948_p4 }
   0xf   :  { %p3951_p7 = pnand %p3950_p6, %p3944_p3 }
  0x11   :  { %3954 = shalt.err (!%p3951_p7)
}
  0x12   :  { %s4029_s24 = smov 64   ;;  %s4030_s25 = smov 4  }
  0x13   :  { %34 = dma.hbm_to_vmem [thread:$0]  %s4811_s1, 3072, %s29_s13, [#allocation8], %s4029_s24, %s4029_s24, %s4030_s25  }
  0x14   :  { %s3955_s30 = scalar_lea.hbm %s4810_s0, 128 }
  0x15   :  { %p3956_p8 = scmp.ne.s32.totalorder %s4810_s0, %s3955_s30  ;;  %p3959_p9 = scmp.lt.u32.totalorder %s3955_s30, %s4810_s0 }
  0x17   :  { %p3961_p10 = pnand %p3959_p9, %p3956_p8 }
  0x19   :  { %3964 = shalt.err (!%p3961_p10)
}
  0x1a   :  { %s3965_s8 = scalar_lea.vmem %s4058_s15, 128  ;;  %p3970_p12 = scmp.lt.s32.totalorder %s4058_s15, %s4058_s15 }
  0x1b   :  { %p3966_p11 = scmp.ne.s32.totalorder %s4058_s15, %s3965_s8  ;;  %p3971_p13 = scmp.lt.s32.totalorder %s3965_s8, %s3965_s8 }
  0x1d   :  { %p3972_p0 = por %p3971_p13, %p3970_p12 }
  0x1f   :  { %p3973_p1 = pnand %p3972_p0, %p3966_p11 }
  0x21   :  { %3976 = shalt.err (!%p3973_p1)
}
  0x22   :  { %22 = dma.hbm_to_vmem [thread:$0]  %s4810_s0, 128, %s4058_s15, [#allocation5], %s4029_s24, %s4029_s24, %s4030_s25  }
  0x23   :  { %s4031_s10 = smov [#allocation9]   ;;  %s3977_s14 = scalar_lea.hbm %s4812_s2, 128 }
  0x24   :  { %s41_s11 = sshll.u32 %s4031_s10, 4  ;;  %p3978_p2 = scmp.ne.s32.totalorder %s4812_s2, %s3977_s14  ;;  %s42_s11 = int_to_ptr.vmem [resolvable:$true] %s41_s11 }
  0x25   :  { %p3981_p3 = scmp.lt.u32.totalorder %s3977_s14, %s4812_s2 }
  0x27   :  { %p3983_p4 = pnand %p3981_p3, %p3978_p2 }
  0x29   :  { %3986 = shalt.err (!%p3983_p4)
}
  0x2a   :  { %s3987_s20 = scalar_lea.vmem %s42_s11, 128  ;;  %p3992_p6 = scmp.lt.s32.totalorder %s42_s11, %s42_s11 }
  0x2b   :  { %p3988_p5 = scmp.ne.s32.totalorder %s42_s11, %s3987_s20  ;;  %p3993_p7 = scmp.lt.s32.totalorder %s3987_s20, %s3987_s20 }
  0x2d   :  { %p3994_p8 = por %p3993_p7, %p3992_p6 }
  0x2f   :  { %p3995_p9 = pnand %p3994_p8, %p3988_p5 }
  0x31   :  { %3998 = shalt.err (!%p3995_p9)
}
  0x32   :  { %44 = dma.hbm_to_vmem [thread:$0]  %s4812_s2, 128, %s42_s11, [#allocation8]  }
  0x33   :  { %4021 = dma.done.wait [#allocation5], 128  }
  0x34   :  { %4022 = vsyncadd [#allocation5], 4294967168 }
  0x35   :  { %4023 = dma.done.wait [#allocation8], 3200  }
  0x36   :  { %4024 = vsyncadd [#allocation8], 4294964096  ;;  %v4032_v0 = vmov 0.0   ;;  %vm4033_vm0 = vmmov 0   ;;  %v3716_v1 = vld [vmem:[#allocation7] sm:$0xff]   ;;  %v4111_v2 = vld [vmem:[#allocation4] sm:$0xff]   ;;  %v55_v19 = vlaneseq }
  0x37   :  { %3393 = vmatprep.subr.bf16.mxu0 %v4032_v0  ;;  %3395 = vmatprep.mubr.msk.bf16.mxu0 %vm4033_vm0, %v4032_v0  ;;  %vm133_vm1 = vcmask 130048   ;;  %v4113_v3 = vld [vmem:[#allocation7 + $0x8] sm:$0xff]   ;;  %v4116_v4 = vld [vmem:[#allocation7 + $0x10] sm:$0xff]   ;;  %v4034_v5 = vmov 0   ;;  %v3177_v8 = vld [vmem:[#allocation9] ss:$0 sm:$0xff] }
  0x38   :  { %3399 = vmatprep.subr.bf16.mxu1 %v4032_v0  ;;  %3401 = vmatprep.mubr.msk.bf16.mxu1 %vm4033_vm0, %v4032_v0  ;;  %v56_v22 = vand.u32 127, %v55_v19  ;;  %v4035_v23 = vmov 1.0   ;;  %s4036_s2 = smov 32   ;;  %vm241_vm5 = vcmask 261120   ;;  %vm315_vm6 = vcmask 254976   ;;  %s4037_s21 = smov [#allocation10]  }
  0x39   :  { %3394 = vmatpush3.bf16.msra.mxu0 %v3716_v1  ;;  %2997 = vst.msk [vmem:[#allocation3] sm:$0xff] %vm241_vm5, %v4032_v0  ;;  %vm486_vm7 = vcmask 259076   ;;  %vm400_vm8 = vcmask 257026   ;;  %vm572_vm9 = vcmask 261126   ;;  %s3167_s22 = sshll.u32 %s4037_s21, 4  ;;  %s3168_s22 = int_to_ptr.vmem [resolvable:$true] %s3167_s22 }
  0x3a   :  { %3405 = vmatprep.subr.bf16.mxu0 %v4032_v0  ;;  %vm57_vm2 = vcmp.ge.s32.totalorder %v56_v22, 64  ;;  %vm58_vm3 = vcmp.lt.s32.totalorder %v56_v22, 96  ;;  %s3999_s23 = scalar_lea.vmem %s3168_s22, 128  ;;  %p4004_p11 = scmp.lt.s32.totalorder %s3168_s22, %s3168_s22 }
  0x3b   :  { %vm59_vm4 = vmand %vm57_vm2, %vm58_vm3  ;;  %p4000_p10 = scmp.ne.s32.totalorder %s3168_s22, %s3999_s23  ;;  %p4005_p12 = scmp.lt.s32.totalorder %s3999_s23, %s3999_s23 }
  0x3c   :  { %3396 = vmatmul.mubr.msk.bf16.vlgmr.msra.gmra.mrb[0].mxu0 %vm133_vm1, %v4111_v2  ;;  %v4138_v24 = vsel %vm59_vm4, 2.0, %v4035_v23  ;;  %v4141_v26 = vsel %vm59_vm4, -1.0, %v4032_v0 }
  0x3d   :  { %3406 = vmatpush3.bf16.msra.mxu0 %v4113_v3  ;;  %3409 = vmatprep.mubr.msk.bf16.mxu0 %vm4033_vm0, %v4032_v0  ;;  %p4006_p13 = por %p4005_p12, %p4004_p11 }
  0x3e   :  { %3407 = vmatprep.subr.bf16.mxu0 %v4032_v0 }
  0x3f   :  { %p4007_p0 = pnand %p4006_p13, %p4000_p10 }
  0x41   :  { %3408 = vmatpush3.bf16.msra.mxu0 %v4116_v4 }
  0x42   :  { %3413 = vmatprep.subr.bf16.mxu0 %v4032_v0 }
  0x44   :  { %3410 = vmatmul.mubr.bf16.vlgmr.msra.gmra.mrb[4].mxu0 %v4034_v5 }
  0x45   :  { %3414 = vmatpush3.bf16.msra.mxu0 %v4113_v3  ;;  %3417 = vmatprep.mubr.msk.bf16.mxu0 %vm4033_vm0, %v4032_v0 }
  0x46   :  { %3415 = vmatprep.subr.bf16.mxu0 %v4032_v0 }
  0x49   :  { %3416 = vmatpush3.bf16.msra.mxu0 %v4116_v4 }
  0x4a   :  { %3421 = vmatprep.subr.bf16.mxu0 %v4032_v0 }
 0x10f   :  { %v171_v6 = vpop.f32.mrb[0].mxu0 }
 0x110   :  { %v3397_v7 = vpop.f32.mrb[1].mxu0  ;;  %v4135_v12 = vadd.f32 %v3177_v8, %v171_v6 }
 0x111   :  { %v174_v9 = vpop.f32.mrb[2].mxu0 }
 0x112   :  { %v4133_v10 = vadd.f32 %v3177_v8, %v174_v9  ;;  %v3398_v11 = vpop.f32.mrb[3].mxu0 }
 0x117   :  { %v279_v13 = vpop.f32.mrb[4].mxu0 }
 0x118   :  { %v285_v14 = vadd.f32 %v279_v13, %v4135_v12  ;;  %v3411_v15 = vpop.f32.mrb[5].mxu0 }
 0x119   :  { %v282_v16 = vpop.f32.mrb[6].mxu0 }
 0x11a   :  { %v3186_v17 = vmul.f32 -1.442695, %v285_v14  ;;  %v3412_v18 = vpop.f32.mrb[7].mxu0 }
 0x11c   :  { %3741 = vpow2.f32 %v3186_v17 }
 0x126   :  { %v3742_v20 = vpop.eup %3741 }
 0x127   :  { %v289_v21 = vadd.f32 1.0, %v3742_v20 }
 0x129   :  { %3743 = vrcp.f32 %v289_v21 }
 0x133   :  { %v3744_v25 = vpop.eup %3743 }
 0x134   :  { %v292_v27 = vmul.f32 %v3744_v25, %v4138_v24  ;;  %v3720_v25 = vld [vmem:[#allocation7 + $0x38] sm:$0xff]  }
 0x135   :  { %3400 = vmatpush3.bf16.msra.mxu1 %v3720_v25 }
 0x136   :  { %v293_v28 = vadd.f32 %v292_v27, %v4141_v26  ;;  %3429 = vmatprep.subr.bf16.mxu1 %v4032_v0 }
 0x138   :  { %296 = vrot.lane.b32.xlu0 %v293_v28, %s4029_s24  ;;  %v294_v31 = vmul.f32 0.0, %v293_v28  ;;  %3402 = vmatmul.mubr.msk.bf16.vlgmr.msra.gmra.mrb[0].mxu1 %vm133_vm1, %v4111_v2 }
 0x139   :  { %3430 = vmatpush3.bf16.msra.mxu1 %v4113_v3  ;;  %3433 = vmatprep.mubr.msk.bf16.mxu1 %vm4033_vm0, %v4032_v0 }
 0x13a   :  { %3431 = vmatprep.subr.bf16.mxu1 %v4032_v0 }
 0x13d   :  { %3432 = vmatpush3.bf16.msra.mxu1 %v4116_v4 }
 0x13e   :  { %3445 = vmatprep.subr.bf16.mxu1 %v4032_v0 }
 0x1aa   :  { %v297_v29 = vpop.permute.xlu0 %296 }
 0x1ab   :  { %v299_v30 = vmul.f32 %v297_v29, %v293_v28 }
 0x1ad   :  { %301 = vrot.lane.b32.xlu0 %v299_v30, %s4036_s2 }
 0x21f   :  { %v302_v32 = vpop.permute.xlu0 %301 }
 0x220   :  { %v304_v33 = vadd.f32 %v302_v32, %v294_v31  ;;  %v4200_v31 = vld [vmem:[#allocation9 + $0x2] ss:$0 sm:$0xff]  ;;  %v4202_v32 = vpop.f32.mrb[0].mxu1 }
 0x222   :  { %3745 = vtanh.f32 %v304_v33  ;;  %v377_v53 = vrot.slane %v304_v33, 6  ;;  %v3403_v33 = vpop.f32.mrb[1].mxu1 }
 0x22c   :  { %v3746_v34 = vpop.eup %3745 }
 0x22d   :  { %307 = vrot.lane.b32.xlu1 %v3746_v34, %s4029_s24  ;;  %v225_v34 = vpop.f32.mrb[2].mxu1 }
 0x29f   :  { %v308_v35 = vpop.permute.xlu1 %307 }
 0x2a0   :  { %v4150_v36 = vmul.f32 %v308_v35, %v293_v28  ;;  %v4205_v35 = vadd.f32 %v4200_v31, %v225_v34 }
 0x2a2   :  { %v317_v37 = vpack.c.bf16 %v4150_v36, %v4150_v36 }
 0x2a4   :  { %319 = vrot.lane.b32.xlu1 %v317_v37, %s4036_s2  ;;  %v3404_v37 = vpop.f32.mrb[3].mxu1 }
 0x316   :  { %v320_v38 = vpop.permute.xlu1 %319 }
 0x317   :  { %3418 = vmatmul.mubr.msk.bf16.vlgmr.msra.gmra.mrb[8].mxu0 %vm241_vm5, %v320_v38 }
 0x318   :  { %3422 = vmatpush3.bf16.msra.mxu0 %v4113_v3  ;;  %3425 = vmatprep.mubr.msk.bf16.mxu0 %vm4033_vm0, %v4032_v0 }
 0x319   :  { %3423 = vmatprep.subr.bf16.mxu0 %v4032_v0 }
 0x31c   :  { %3424 = vmatpush3.bf16.msra.mxu0 %v4116_v4 }
 0x31d   :  { %3437 = vmatprep.subr.bf16.mxu0 %v4032_v0 }
 0x3ea   :  { %v358_v39 = vpop.f32.mrb[8].mxu0 }
 0x3eb   :  { %v365_v40 = vrot.slane %v358_v39, 6  ;;  %v3419_v41 = vpop.f32.mrb[9].mxu0 }
 0x3ec   :  { %v361_v42 = vpop.f32.mrb[10].mxu0 }
 0x3ed   :  { %v367_v43 = vadd.f32 %v365_v40, %v4135_v12  ;;  %v3420_v44 = vpop.f32.mrb[11].mxu0 }
 0x3ef   :  { %v3188_v45 = vmul.f32 -1.442695, %v367_v43 }
 0x3f1   :  { %3747 = vpow2.f32 %v3188_v45 }
 0x3fb   :  { %v3748_v46 = vpop.eup %3747 }
 0x3fc   :  { %v371_v47 = vadd.f32 1.0, %v3748_v46 }
 0x3fe   :  { %3749 = vrcp.f32 %v371_v47 }
 0x408   :  { %v3750_v48 = vpop.eup %3749 }
 0x409   :  { %v374_v49 = vmul.f32 %v3750_v48, %v4138_v24 }
 0x40b   :  { %v375_v50 = vadd.f32 %v374_v49, %v4141_v26 }
 0x40d   :  { %381 = vrot.lane.b32.xlu0 %v375_v50, %s4029_s24  ;;  %v379_v54 = vmul.f32 %v377_v53, %v375_v50 }
 0x47f   :  { %v382_v51 = vpop.permute.xlu0 %381 }
 0x480   :  { %v384_v52 = vmul.f32 %v382_v51, %v375_v50 }
 0x482   :  { %386 = vrot.lane.b32.xlu1 %v384_v52, %s4036_s2 }
 0x4f4   :  { %v387_v55 = vpop.permute.xlu1 %386 }
 0x4f5   :  { %v389_v56 = vadd.f32 %v387_v55, %v379_v54 }
 0x4f7   :  { %3751 = vtanh.f32 %v389_v56  ;;  %v463_v20 = vrot.slane %v389_v56, 6 }
 0x501   :  { %v3752_v57 = vpop.eup %3751 }
 0x502   :  { %392 = vrot.lane.b32.xlu0 %v3752_v57, %s4029_s24 }
 0x574   :  { %v393_v58 = vpop.permute.xlu0 %392 }
 0x575   :  { %v4168_v59 = vmul.f32 %v393_v58, %v375_v50 }
 0x577   :  { %v402_v60 = vpack.c.bf16 %v4168_v59, %v4168_v59 }
 0x579   :  { %v404_v61 = vrot.slane %v402_v60, 1 }
 0x57b   :  { %405 = vrot.lane.b32.xlu1 %v404_v61, %s4036_s2 }
 0x5ed   :  { %v406_v62 = vpop.permute.xlu1 %405 }
 0x5ee   :  { %3426 = vmatmul.mubr.msk.bf16.vlgmr.msra.gmra.mrb[12].mxu0 %vm241_vm5, %v406_v62 }
 0x5ef   :  { %3438 = vmatpush3.bf16.msra.mxu0 %v4113_v3  ;;  %3441 = vmatprep.mubr.msk.bf16.mxu0 %vm4033_vm0, %v4032_v0 }
 0x5f0   :  { %3439 = vmatprep.subr.bf16.mxu0 %v4032_v0 }
 0x5f3   :  { %3440 = vmatpush3.bf16.msra.mxu0 %v4116_v4 }
 0x5f4   :  { %3453 = vmatprep.subr.bf16.mxu0 %v4032_v0 }
 0x6c1   :  { %v444_v63 = vpop.f32.mrb[12].mxu0 }
 0x6c2   :  { %v451_v1 = vrot.slane %v444_v63, 4  ;;  %v3427_v6 = vpop.f32.mrb[13].mxu0 }
 0x6c3   :  { %v447_v7 = vpop.f32.mrb[14].mxu0 }
 0x6c4   :  { %v453_v8 = vadd.f32 %v451_v1, %v4135_v12  ;;  %v3428_v9 = vpop.f32.mrb[15].mxu0 }
 0x6c6   :  { %v3190_v11 = vmul.f32 -1.442695, %v453_v8 }
 0x6c8   :  { %3753 = vpow2.f32 %v3190_v11 }
 0x6d2   :  { %v3754_v13 = vpop.eup %3753 }
 0x6d3   :  { %v457_v14 = vadd.f32 1.0, %v3754_v13 }
 0x6d5   :  { %3755 = vrcp.f32 %v457_v14 }
 0x6df   :  { %v3756_v15 = vpop.eup %3755 }
 0x6e0   :  { %v460_v16 = vmul.f32 %v3756_v15, %v4138_v24 }
 0x6e2   :  { %v461_v17 = vadd.f32 %v460_v16, %v4141_v26 }
 0x6e4   :  { %467 = vrot.lane.b32.xlu0 %v461_v17, %s4029_s24  ;;  %v465_v21 = vmul.f32 %v463_v20, %v461_v17 }
 0x756   :  { %v468_v18 = vpop.permute.xlu0 %467 }
 0x757   :  { %v470_v19 = vmul.f32 %v468_v18, %v461_v17 }
 0x759   :  { %472 = vrot.lane.b32.xlu1 %v470_v19, %s4036_s2 }
 0x7cb   :  { %v473_v22 = vpop.permute.xlu1 %472 }
 0x7cc   :  { %v475_v23 = vadd.f32 %v473_v22, %v465_v21 }
 0x7ce   :  { %3757 = vtanh.f32 %v475_v23  ;;  %v549_v53 = vrot.slane %v475_v23, 6 }
 0x7d8   :  { %v3758_v27 = vpop.eup %3757 }
 0x7d9   :  { %478 = vrot.lane.b32.xlu0 %v3758_v27, %s4029_s24 }
 0x84b   :  { %v479_v28 = vpop.permute.xlu0 %478 }
 0x84c   :  { %v4195_v29 = vmul.f32 %v479_v28, %v461_v17 }
 0x84e   :  { %v488_v2 = vpack.c.bf16 %v4195_v29, %v4195_v29 }
 0x850   :  { %v490_v30 = vrot.slane %v488_v2, 2 }
 0x852   :  { %491 = vrot.lane.b32.xlu1 %v490_v30, %s4036_s2 }
 0x8c4   :  { %v492_v38 = vpop.permute.xlu1 %491 }
 0x8c5   :  { %3434 = vmatmul.mubr.msk.bf16.vlgmr.msra.gmra.mrb[4].mxu1 %vm241_vm5, %v492_v38 }
 0x8c6   :  { %3446 = vmatpush3.bf16.msra.mxu1 %v4113_v3  ;;  %3449 = vmatprep.mubr.msk.bf16.mxu1 %vm4033_vm0, %v4032_v0 }
 0x8c7   :  { %3447 = vmatprep.subr.bf16.mxu1 %v4032_v0 }
 0x8ca   :  { %3448 = vmatpush3.bf16.msra.mxu1 %v4116_v4 }
 0x8cb   :  { %3461 = vmatprep.subr.bf16.mxu1 %v4032_v0 }
 0x998   :  { %v530_v39 = vpop.f32.mrb[4].mxu1 }
 0x999   :  { %v537_v40 = vrot.slane %v530_v39, 2  ;;  %v3435_v41 = vpop.f32.mrb[5].mxu1 }
 0x99a   :  { %v533_v42 = vpop.f32.mrb[6].mxu1 }
 0x99b   :  { %v539_v43 = vadd.f32 %v537_v40, %v4135_v12  ;;  %v3436_v44 = vpop.f32.mrb[7].mxu1 }
 0x99d   :  { %v3192_v45 = vmul.f32 -1.442695, %v539_v43 }
 0x99f   :  { %3759 = vpow2.f32 %v3192_v45 }
 0x9a9   :  { %v3760_v46 = vpop.eup %3759 }
 0x9aa   :  { %v543_v47 = vadd.f32 1.0, %v3760_v46 }
 0x9ac   :  { %3761 = vrcp.f32 %v543_v47 }
 0x9b6   :  { %v3762_v48 = vpop.eup %3761 }
 0x9b7   :  { %v546_v49 = vmul.f32 %v3762_v48, %v4138_v24 }
 0x9b9   :  { %v547_v50 = vadd.f32 %v546_v49, %v4141_v26 }
 0x9bb   :  { %553 = vrot.lane.b32.xlu0 %v547_v50, %s4029_s24  ;;  %v551_v54 = vmul.f32 %v549_v53, %v547_v50 }
 0xa2d   :  { %v554_v51 = vpop.permute.xlu0 %553 }
 0xa2e   :  { %v556_v52 = vmul.f32 %v554_v51, %v547_v50 }
 0xa30   :  { %558 = vrot.lane.b32.xlu1 %v556_v52, %s4036_s2 }
 0xaa2   :  { %v559_v12 = vpop.permute.xlu1 %558 }
 0xaa3   :  { %v561_v55 = vadd.f32 %v559_v12, %v551_v54 }
 0xaa5   :  { %3763 = vtanh.f32 %v561_v55  ;;  %v632_v19 = vrot.slane %v561_v55, 6 }
 0xaaf   :  { %v3764_v56 = vpop.eup %3763 }
 0xab0   :  { %564 = vrot.lane.b32.xlu0 %v3764_v56, %s4029_s24 }
 0xb22   :  { %v565_v57 = vpop.permute.xlu0 %564 }
 0xb23   :  { %v4220_v58 = vmul.f32 %v565_v57, %v547_v50 }
 0xb25   :  { %v574_v60 = vpack.c.bf16 %v4220_v58, %v4220_v58 }
 0xb27   :  { %v576_v61 = vrot.slane %v574_v60, 3 }
 0xb29   :  { %577 = vrot.lane.b32.xlu1 %v576_v61, %s4036_s2 }
 0xb9b   :  { %v578_v62 = vpop.permute.xlu1 %577 }
 0xb9c   :  { %3442 = vmatmul.mubr.msk.bf16.vlgmr.msra.gmra.mrb[16].mxu0 %vm241_vm5, %v578_v62 }
 0xb9d   :  { %3454 = vmatpush3.bf16.msra.mxu0 %v4113_v3  ;;  %3457 = vmatprep.mubr.msk.bf16.mxu0 %vm4033_vm0, %v4032_v0 }
 0xb9e   :  { %3455 = vmatprep.subr.bf16.mxu0 %v4032_v0 }
 0xba1   :  { %3456 = vmatpush3.bf16.msra.mxu0 %v4116_v4 }
 0xba2   :  { %3469 = vmatprep.subr.bf16.mxu0 %v4032_v0 }
 0xc6f   :  { %v616_v63 = vpop.f32.mrb[16].mxu0 }
 0xc70   :  { %v622_v1 = vadd.f32 %v616_v63, %v4133_v10  ;;  %v3443_v6 = vpop.f32.mrb[17].mxu0 }
 0xc71   :  { %v619_v7 = vpop.f32.mrb[18].mxu0 }
 0xc72   :  { %v3194_v8 = vmul.f32 -1.442695, %v622_v1  ;;  %v3444_v9 = vpop.f32.mrb[19].mxu0 }
 0xc74   :  { %3765 = vpow2.f32 %v3194_v8 }
 0xc7e   :  { %v3766_v11 = vpop.eup %3765 }
 0xc7f   :  { %v626_v13 = vadd.f32 1.0, %v3766_v11 }
 0xc81   :  { %3767 = vrcp.f32 %v626_v13 }
 0xc8b   :  { %v3768_v14 = vpop.eup %3767 }
 0xc8c   :  { %v629_v15 = vmul.f32 %v3768_v14, %v4138_v24 }
 0xc8e   :  { %v630_v16 = vadd.f32 %v629_v15, %v4141_v26 }
 0xc90   :  { %636 = vrot.lane.b32.xlu0 %v630_v16, %s4029_s24  ;;  %v634_v20 = vmul.f32 %v632_v19, %v630_v16 }
 0xd02   :  { %v637_v17 = vpop.permute.xlu0 %636 }
 0xd03   :  { %v639_v18 = vmul.f32 %v637_v17, %v630_v16 }
 0xd05   :  { %641 = vrot.lane.b32.xlu1 %v639_v18, %s4036_s2 }
 0xd77   :  { %v642_v21 = vpop.permute.xlu1 %641 }
 0xd78   :  { %v644_v22 = vadd.f32 %v642_v21, %v634_v20 }
 0xd7a   :  { %3769 = vtanh.f32 %v644_v22  ;;  %v716_v46 = vrot.slane %v644_v22, 6 }
 0xd84   :  { %v3770_v23 = vpop.eup %3769 }
 0xd85   :  { %647 = vrot.lane.b32.xlu0 %v3770_v23, %s4029_s24 }
 0xdf7   :  { %v648_v25 = vpop.permute.xlu0 %647 }
 0xdf8   :  { %v4238_v27 = vmul.f32 %v648_v25, %v630_v16 }
 0xdfa   :  { %v656_v28 = vpack.c.bf16 %v4238_v27, %v4238_v27 }
 0xdfc   :  { %658 = vrot.lane.b32.xlu1 %v656_v28, %s4036_s2 }
 0xe6e   :  { %v659_v2 = vpop.permute.xlu1 %658 }
 0xe6f   :  { %3450 = vmatmul.mubr.msk.bf16.vlgmr.msra.gmra.mrb[8].mxu1 %vm241_vm5, %v659_v2 }
 0xe70   :  { %3462 = vmatpush3.bf16.msra.mxu1 %v4113_v3  ;;  %3465 = vmatprep.mubr.msk.bf16.mxu1 %vm4033_vm0, %v4032_v0 }
 0xe71   :  { %3463 = vmatprep.subr.bf16.mxu1 %v4032_v0 }
 0xe74   :  { %3464 = vmatpush3.bf16.msra.mxu1 %v4116_v4 }
 0xe75   :  { %3477 = vmatprep.subr.bf16.mxu1 %v4032_v0 }
 0xf42   :  { %v697_v30 = vpop.f32.mrb[8].mxu1 }
 0xf43   :  { %v704_v33 = vrot.slane %v697_v30, 6  ;;  %v3451_v34 = vpop.f32.mrb[9].mxu1 }
 0xf44   :  { %v700_v37 = vpop.f32.mrb[10].mxu1 }
 0xf45   :  { %v706_v38 = vadd.f32 %v704_v33, %v4133_v10  ;;  %v3452_v39 = vpop.f32.mrb[11].mxu1 }
 0xf47   :  { %v3196_v40 = vmul.f32 -1.442695, %v706_v38 }
 0xf49   :  { %3771 = vpow2.f32 %v3196_v40 }
 0xf53   :  { %v3772_v41 = vpop.eup %3771 }
 0xf54   :  { %v710_v3 = vadd.f32 1.0, %v3772_v41 }
 0xf56   :  { %3773 = vrcp.f32 %v710_v3 }
 0xf60   :  { %v3774_v42 = vpop.eup %3773 }
 0xf61   :  { %v713_v43 = vmul.f32 %v3774_v42, %v4138_v24 }
 0xf63   :  { %v714_v44 = vadd.f32 %v713_v43, %v4141_v26 }
 0xf65   :  { %720 = vrot.lane.b32.xlu0 %v714_v44, %s4029_s24  ;;  %v718_v47 = vmul.f32 %v716_v46, %v714_v44 }
 0xfd7   :  { %v721_v4 = vpop.permute.xlu0 %720 }
 0xfd8   :  { %v723_v45 = vmul.f32 %v721_v4, %v714_v44 }
 0xfda   :  { %725 = vrot.lane.b32.xlu1 %v723_v45, %s4036_s2 }
0x104c   :  { %v726_v48 = vpop.permute.xlu1 %725 }
0x104d   :  { %v728_v49 = vadd.f32 %v726_v48, %v718_v47  ;;  %v3721_v48 = vld [vmem:[#allocation7 + $0x18] sm:$0xff]  }
0x104f   :  { %3775 = vtanh.f32 %v728_v49  ;;  %v801_v14 = vrot.slane %v728_v49, 6  ;;  %v4300_v49 = vld [vmem:[#allocation7 + $0x28] sm:$0xff]  }
0x1059   :  { %v3776_v50 = vpop.eup %3775 }
0x105a   :  { %731 = vrot.lane.b32.xlu0 %v3776_v50, %s4029_s24  ;;  %v3723_v50 = vld [vmem:[#allocation7 + $0x20] sm:$0xff]  }
0x10cc   :  { %v732_v51 = vpop.permute.xlu0 %731 }
0x10cd   :  { %v4256_v52 = vmul.f32 %v732_v51, %v714_v44  ;;  %v4304_v51 = vld [vmem:[#allocation7 + $0x30] sm:$0xff]  }
0x10cf   :  { %v740_v53 = vpack.c.bf16 %v4256_v52, %v4256_v52 }
0x10d1   :  { %v742_v54 = vrot.slane %v740_v53, 1 }
0x10d3   :  { %743 = vrot.lane.b32.xlu1 %v742_v54, %s4036_s2 }
0x1145   :  { %v744_v12 = vpop.permute.xlu1 %743 }
0x1146   :  { %3458 = vmatmul.mubr.msk.bf16.vlgmr.msra.gmra.mrb[20].mxu0 %vm241_vm5, %v744_v12 }
0x1147   :  { %3473 = vmatprep.mubr.msk.bf16.mxu0 %vm4033_vm0, %v4032_v0  ;;  %3470 = vmatpush3.bf16.msra.mxu0 %v3721_v48 }
0x1148   :  { %3471 = vmatprep.subr.bf16.mxu0 %v4032_v0 }
0x114b   :  { %3472 = vmatpush3.bf16.msra.mxu0 %v3723_v50 }
0x114c   :  { %3485 = vmatprep.subr.bf16.mxu0 %v4032_v0 }
0x1219   :  { %v782_v55 = vpop.f32.mrb[20].mxu0 }
0x121a   :  { %v789_v56 = vrot.slane %v782_v55, 4  ;;  %v3459_v57 = vpop.f32.mrb[21].mxu0 }
0x121b   :  { %v785_v60 = vpop.f32.mrb[22].mxu0 }
0x121c   :  { %v791_v61 = vadd.f32 %v789_v56, %v4133_v10  ;;  %v3460_v62 = vpop.f32.mrb[23].mxu0  ;;  %v4323_v60 = vld [vmem:[#allocation7 + $0x40] sm:$0xff]  }
0x121d   :  { %v4327_v62 = vld [vmem:[#allocation7 + $0x48] sm:$0xff]  }
0x121e   :  { %v3198_v63 = vmul.f32 -1.442695, %v791_v61 }
0x1220   :  { %3777 = vpow2.f32 %v3198_v63 }
0x122a   :  { %v3778_v1 = vpop.eup %3777 }
0x122b   :  { %v795_v6 = vadd.f32 1.0, %v3778_v1 }
0x122d   :  { %3779 = vrcp.f32 %v795_v6 }
0x1237   :  { %v3780_v7 = vpop.eup %3779 }
0x1238   :  { %v798_v8 = vmul.f32 %v3780_v7, %v4138_v24 }
0x123a   :  { %v799_v9 = vadd.f32 %v798_v8, %v4141_v26 }
0x123c   :  { %805 = vrot.lane.b32.xlu0 %v799_v9, %s4029_s24  ;;  %v803_v15 = vmul.f32 %v801_v14, %v799_v9 }
0x12ae   :  { %v806_v11 = vpop.permute.xlu0 %805 }
0x12af   :  { %v808_v13 = vmul.f32 %v806_v11, %v799_v9 }
0x12b1   :  { %810 = vrot.lane.b32.xlu1 %v808_v13, %s4036_s2 }
0x1323   :  { %v811_v16 = vpop.permute.xlu1 %810 }
0x1324   :  { %v813_v17 = vadd.f32 %v811_v16, %v803_v15 }
0x1326   :  { %3781 = vtanh.f32 %v813_v17 }
0x1330   :  { %v3782_v18 = vpop.eup %3781 }
0x1331   :  { %816 = vrot.lane.b32.xlu0 %v3782_v18, %s4029_s24 }
0x13a3   :  { %v817_v19 = vpop.permute.xlu0 %816 }
0x13a4   :  { %v819_v20 = vmul.f32 %v817_v19, %v799_v9  ;;  %v3201_v9 = vld [vmem:[#allocation9 + $0x1] ss:$0 sm:$0xff] }
0x13a6   :  { %v825_v21 = vpack.c.bf16 %v819_v20, %v819_v20 }
0x13a8   :  { %v827_v22 = vrot.slane %v825_v21, 2 }
0x13aa   :  { %828 = vrot.lane.b32.xlu1 %v827_v22, %s4036_s2 }
0x141c   :  { %v829_v23 = vpop.permute.xlu1 %828 }
0x141d   :  { %3466 = vmatmul.mubr.msk.bf16.vlgmr.msra.gmra.mrb[12].mxu1 %vm241_vm5, %v829_v23 }
0x141e   :  { %3481 = vmatprep.mubr.msk.bf16.mxu1 %vm4033_vm0, %v4032_v0  ;;  %3478 = vmatpush3.bf16.msra.mxu1 %v4300_v49 }
0x141f   :  { %3479 = vmatprep.subr.bf16.mxu1 %v4032_v0 }
0x1422   :  { %3480 = vmatpush3.bf16.msra.mxu1 %v4304_v51 }
0x1423   :  { %3493 = vmatprep.subr.bf16.mxu1 %v4032_v0 }
0x1425   :  { %3482 = vmatmul.mubr.bf16.vlgmr.msra.gmra.mrb[16].mxu1 %v4034_v5 }
0x1426   :  { %3494 = vmatpush3.bf16.msra.mxu1 %v4300_v49  ;;  %3497 = vmatprep.mubr.msk.bf16.mxu1 %vm4033_vm0, %v4032_v0 }
0x1427   :  { %3495 = vmatprep.subr.bf16.mxu1 %v4032_v0 }
0x142a   :  { %3496 = vmatpush3.bf16.msra.mxu1 %v4304_v51 }
0x142b   :  { %3509 = vmatprep.subr.bf16.mxu1 %v4032_v0 }
0x14f0   :  { %v867_v25 = vpop.f32.mrb[12].mxu1 }
0x14f1   :  { %v874_v28 = vrot.slane %v867_v25, 2  ;;  %v3467_v2 = vpop.f32.mrb[13].mxu1 }
0x14f2   :  { %v870_v30 = vpop.f32.mrb[14].mxu1 }
0x14f3   :  { %v876_v33 = vadd.f32 %v874_v28, %v4133_v10  ;;  %v3468_v34 = vpop.f32.mrb[15].mxu1  ;;  %v886_v10 = vrot.slane %v813_v17, 6 }
0x14f5   :  { %v3200_v37 = vmul.f32 -1.442695, %v876_v33 }
0x14f7   :  { %3783 = vpow2.f32 %v3200_v37 }
0x14f8   :  { %v1019_v1 = vpop.f32.mrb[16].mxu1 }
0x14f9   :  { %v3483_v6 = vpop.f32.mrb[17].mxu1 }
0x14fa   :  { %v1022_v7 = vpop.f32.mrb[18].mxu1 }
0x14fb   :  { %v3484_v8 = vpop.f32.mrb[19].mxu1 }
0x1501   :  { %v3784_v38 = vpop.eup %3783 }
0x1502   :  { %v880_v39 = vadd.f32 1.0, %v3784_v38 }
0x1504   :  { %3785 = vrcp.f32 %v880_v39 }
0x150e   :  { %v3786_v40 = vpop.eup %3785 }
0x150f   :  { %v883_v41 = vmul.f32 %v3786_v40, %v4138_v24 }
0x1511   :  { %v884_v3 = vadd.f32 %v883_v41, %v4141_v26 }
0x1513   :  { %890 = vrot.lane.b32.xlu0 %v884_v3, %s4029_s24  ;;  %v888_v44 = vmul.f32 %v886_v10, %v884_v3 }
0x1585   :  { %v891_v42 = vpop.permute.xlu0 %890 }
0x1586   :  { %v893_v43 = vmul.f32 %v891_v42, %v884_v3 }
0x1588   :  { %895 = vrot.lane.b32.xlu1 %v893_v43, %s4036_s2 }
0x158c   :  { %312 = vrot.lane.b32.xlu1 %v4150_v36, %s4036_s2 }
0x1590   :  { %483 = vrot.lane.b32.xlu1 %v4195_v29, %s4036_s2 }
0x1594   :  { %652 = vrot.lane.b32.xlu1 %v4238_v27, %s4036_s2 }
0x1598   :  { %821 = vrot.lane.b32.xlu1 %v819_v20, %s4036_s2  ;;  %v4348_v20 = vadd.f32 %v4200_v31, %v4202_v32 }
0x15fa   :  { %v896_v4 = vpop.permute.xlu1 %895 }
0x15fb   :  { %v4286_v45 = vadd.f32 %v896_v4, %v888_v44 }
0x15fd   :  { %3787 = vtanh.f32 %v4286_v45 }
0x15fe   :  { %v313_v46 = vpop.permute.xlu1 %312 }
0x15ff   :  { %316 = vst.msk [vmem:[#allocation2] sm:$0x3] %vm315_vm6, %v313_v46 }
0x1602   :  { %v484_v36 = vpop.permute.xlu1 %483 }
0x1603   :  { %487 = vst.msk [vmem:[#allocation2] sm:$0x30] %vm486_vm7, %v484_v36  ;;  %v1121_v36 = vrot.slane %v4286_v45, 6 }
0x1606   :  { %v653_v29 = vpop.permute.xlu1 %652 }
0x1607   :  { %v3788_v47 = vpop.eup %3787  ;;  %655 = vst.msk [vmem:[#allocation2 + $0x8] sm:$0x3] %vm315_vm6, %v653_v29 }
0x1608   :  { %901 = vrot.lane.b32.xlu0 %v3788_v47, %s4029_s24 }
0x160a   :  { %v822_v27 = vpop.permute.xlu1 %821 }
0x160b   :  { %824 = vst.msk [vmem:[#allocation2 + $0x8] sm:$0x30] %vm486_vm7, %v822_v27 }
0x160c   :  { %397 = vrot.lane.b32.xlu0 %v4168_v59, %s4036_s2 }
0x1610   :  { %569 = vrot.lane.b32.xlu0 %v4220_v58, %s4036_s2 }
0x1614   :  { %736 = vrot.lane.b32.xlu0 %v4256_v52, %s4036_s2 }
0x167a   :  { %v902_v59 = vpop.permute.xlu0 %901 }
0x167b   :  { %v904_v58 = vmul.f32 %v902_v59, %v884_v3 }
0x167d   :  { %v1051_v52 = vpack.c.bf16 %v904_v58, %v904_v58  ;;  %906 = vrot.lane.b32.xlu0 %v904_v58, %s4036_s2 }
0x167e   :  { %v398_v53 = vpop.permute.xlu0 %397 }
0x167f   :  { %401 = vst.msk [vmem:[#allocation2] sm:$0xc] %vm400_vm8, %v398_v53  ;;  %v1053_v54 = vrot.slane %v1051_v52, 3 }
0x1681   :  { %1054 = vrot.lane.b32.xlu1 %v1053_v54, %s4036_s2 }
0x1682   :  { %v570_v5 = vpop.permute.xlu0 %569 }
0x1683   :  { %573 = vst.msk [vmem:[#allocation2] sm:$0xc0] %vm572_vm9, %v570_v5 }
0x1686   :  { %v737_v12 = vpop.permute.xlu0 %736 }
0x1687   :  { %739 = vst.msk [vmem:[#allocation2 + $0x8] sm:$0xc] %vm400_vm8, %v737_v12 }
0x168a   :  { %v910_v56 = vld [vmem:[#allocation2] sm:$0xff] }
0x16ef   :  { %v907_v55 = vpop.permute.xlu0 %906 }
0x16f0   :  { %909 = vst.msk [vmem:[#allocation2 + $0x8] sm:$0xc0] %vm572_vm9, %v907_v55 }
0x16f3   :  { %v1055_v63 = vpop.permute.xlu1 %1054 }
0x16f7   :  { %v911_v57 = vld [vmem:[#allocation2 + $0x8] sm:$0xff] }
0x16f8   :  { %v912_v61 = vpack.c.bf16 %v911_v57, %v910_v56 }
0x16fa   :  { %3474 = vmatmul.mubr.msk.bf16.vlgmr.msra.gmra.mrb[24].mxu0 %vm241_vm5, %v912_v61 }
0x16fb   :  { %3486 = vmatpush3.bf16.msra.mxu0 %v4323_v60  ;;  %3489 = vmatprep.mubr.msk.bf16.mxu0 %vm4033_vm0, %v4032_v0 }
0x16fc   :  { %3487 = vmatprep.subr.bf16.mxu0 %v4032_v0 }
0x16ff   :  { %3488 = vmatpush3.bf16.msra.mxu0 %v4327_v62 }
0x1700   :  { %3501 = vmatprep.subr.bf16.mxu0 %v4032_v0 }
0x1702   :  { %3490 = vmatmul.mubr.msk.bf16.vlgmr.msra.gmra.mrb[28].mxu0 %vm241_vm5, %v1055_v63 }
0x1703   :  { %3502 = vmatpush3.bf16.msra.mxu0 %v4323_v60  ;;  %3505 = vmatprep.mubr.msk.bf16.mxu0 %vm4033_vm0, %v4032_v0 }
0x1704   :  { %3503 = vmatprep.subr.bf16.mxu0 %v4032_v0 }
0x1707   :  { %3504 = vmatpush3.bf16.msra.mxu0 %v4327_v62 }
0x1708   :  { %3517 = vmatprep.subr.bf16.mxu0 %v4032_v0 }
0x17cd   :  { %v966_v11 = vpop.f32.mrb[24].mxu0 }
0x17ce   :  { %v4341_v13 = vadd.f32 %v3201_v9, %v966_v11  ;;  %v3475_v14 = vpop.f32.mrb[25].mxu0 }
0x17cf   :  { %v969_v15 = vpop.f32.mrb[26].mxu0 }
0x17d0   :  { %v4343_v16 = vadd.f32 %v3201_v9, %v969_v15  ;;  %v1025_v17 = vadd.f32 %v1019_v1, %v4341_v13  ;;  %v3476_v18 = vpop.f32.mrb[27].mxu0 }
0x17d2   :  { %v3207_v19 = vmul.f32 -1.442695, %v1025_v17 }
0x17d4   :  { %3789 = vpow2.f32 %v3207_v19 }
0x17d5   :  { %v1105_v21 = vpop.f32.mrb[28].mxu0 }
0x17d6   :  { %v1111_v22 = vadd.f32 %v1105_v21, %v4348_v20  ;;  %v3491_v23 = vpop.f32.mrb[29].mxu0 }
0x17d7   :  { %v1108_v25 = vpop.f32.mrb[30].mxu0 }
0x17d8   :  { %v3211_v28 = vmul.f32 -1.442695, %v1111_v22  ;;  %v3492_v2 = vpop.f32.mrb[31].mxu0 }
0x17da   :  { %3791 = vpow2.f32 %v3211_v28 }
0x17de   :  { %v3790_v30 = vpop.eup %3789 }
0x17df   :  { %v1029_v33 = vadd.f32 1.0, %v3790_v30 }
0x17e1   :  { %3793 = vrcp.f32 %v1029_v33 }
0x17e4   :  { %v3792_v34 = vpop.eup %3791 }
0x17e5   :  { %v1115_v37 = vadd.f32 1.0, %v3792_v34 }
0x17e7   :  { %3795 = vrcp.f32 %v1115_v37 }
0x17eb   :  { %v3794_v38 = vpop.eup %3793 }
0x17ec   :  { %v1032_v39 = vmul.f32 %v3794_v38, %v4138_v24 }
0x17ee   :  { %v1033_v31 = vadd.f32 %v1032_v39, %v4141_v26 }
0x17f0   :  { %1036 = vrot.lane.b32.xlu1 %v1033_v31, %s4029_s24  ;;  %v1034_v44 = vmul.f32 0.0, %v1033_v31 }
0x17f1   :  { %v3796_v32 = vpop.eup %3795 }
0x17f2   :  { %v1118_v40 = vmul.f32 %v3796_v32, %v4138_v24 }
0x17f4   :  { %v1119_v41 = vadd.f32 %v1118_v40, %v4141_v26 }
0x17f6   :  { %1125 = vrot.lane.b32.xlu0 %v1119_v41, %s4029_s24  ;;  %v1123_v29 = vmul.f32 %v1121_v36, %v1119_v41 }
0x1862   :  { %v1037_v3 = vpop.permute.xlu1 %1036 }
0x1863   :  { %v1039_v42 = vmul.f32 %v1037_v3, %v1033_v31 }
0x1865   :  { %1041 = vrot.lane.b32.xlu1 %v1039_v42, %s4036_s2 }
0x1868   :  { %v1126_v43 = vpop.permute.xlu0 %1125 }
0x1869   :  { %v1128_v10 = vmul.f32 %v1126_v43, %v1119_v41 }
0x186b   :  { %1130 = vrot.lane.b32.xlu0 %v1128_v10, %s4036_s2 }
0x18d7   :  { %v1042_v4 = vpop.permute.xlu1 %1041 }
0x18d8   :  { %v4359_v46 = vadd.f32 %v1042_v4, %v1034_v44 }
0x18da   :  { %3797 = vtanh.f32 %v4359_v46 }
0x18dd   :  { %v1131_v47 = vpop.permute.xlu0 %1130 }
0x18de   :  { %v4363_v27 = vadd.f32 %v1131_v47, %v1123_v29 }
0x18e0   :  { %3799 = vtanh.f32 %v4363_v27  ;;  %v1284_v3 = vrot.slane %v4363_v27, 6 }
0x18e4   :  { %v3798_v48 = vpop.eup %3797 }
0x18e5   :  { %1047 = vrot.lane.b32.xlu1 %v3798_v48, %s4029_s24 }
0x18ea   :  { %v3800_v50 = vpop.eup %3799 }
0x18eb   :  { %1136 = vrot.lane.b32.xlu0 %v3800_v50, %s4029_s24 }
0x1957   :  { %v1048_v59 = vpop.permute.xlu1 %1047 }
0x1958   :  { %v1050_v58 = vmul.f32 %v1048_v59, %v1033_v31  ;;  %v1205_v31 = vrot.slane %v4359_v46, 6 }
0x195a   :  { %v1145_v52 = vpack.c.bf16 %v1050_v58, %v1050_v58 }
0x195c   :  { %1147 = vrot.lane.b32.xlu1 %v1145_v52, %s4036_s2 }
0x195d   :  { %v1137_v45 = vpop.permute.xlu0 %1136 }
0x195e   :  { %v4369_v53 = vmul.f32 %v1137_v45, %v1119_v41 }
0x1960   :  { %v1224_v54 = vpack.c.bf16 %v4369_v53, %v4369_v53 }
0x1962   :  { %1226 = vrot.lane.b32.xlu0 %v1224_v54, %s4036_s2 }
0x19ce   :  { %v1148_v5 = vpop.permute.xlu1 %1147 }
0x19cf   :  { %3498 = vmatmul.mubr.msk.bf16.vlgmr.msra.gmra.mrb[20].mxu1 %vm241_vm5, %v1148_v5 }
0x19d0   :  { %3510 = vmatpush3.bf16.msra.mxu1 %v4300_v49  ;;  %3513 = vmatprep.mubr.msk.bf16.mxu1 %vm4033_vm0, %v4032_v0 }
0x19d1   :  { %3511 = vmatprep.subr.bf16.mxu1 %v4032_v0 }
0x19d4   :  { %v1227_v12 = vpop.permute.xlu0 %1226  ;;  %3512 = vmatpush3.bf16.msra.mxu1 %v4304_v51 }
0x19d5   :  { %3506 = vmatmul.mubr.msk.bf16.vlgmr.msra.gmra.mrb[32].mxu0 %vm241_vm5, %v1227_v12  ;;  %3525 = vmatprep.subr.bf16.mxu1 %v4032_v0 }
0x19d6   :  { %3518 = vmatpush3.bf16.msra.mxu0 %v4323_v60  ;;  %3521 = vmatprep.mubr.msk.bf16.mxu0 %vm4033_vm0, %v4032_v0 }
0x19d7   :  { %3519 = vmatprep.subr.bf16.mxu0 %v4032_v0 }
0x19da   :  { %3520 = vmatpush3.bf16.msra.mxu0 %v4327_v62 }
0x19db   :  { %3533 = vmatprep.subr.bf16.mxu0 %v4032_v0 }
0x1aa2   :  { %v1186_v55 = vpop.f32.mrb[20].mxu1 }
0x1aa3   :  { %v1193_v56 = vrot.slane %v1186_v55, 6  ;;  %v3499_v57 = vpop.f32.mrb[21].mxu1 }
0x1aa4   :  { %v1189_v61 = vpop.f32.mrb[22].mxu1 }
0x1aa5   :  { %v1195_v63 = vadd.f32 %v1193_v56, %v4341_v13  ;;  %v3500_v1 = vpop.f32.mrb[23].mxu1 }
0x1aa7   :  { %v3213_v6 = vmul.f32 -1.442695, %v1195_v63 }
0x1aa8   :  { %v1265_v7 = vpop.f32.mrb[32].mxu0 }
0x1aa9   :  { %3801 = vpow2.f32 %v3213_v6  ;;  %v1272_v8 = vrot.slane %v1265_v7, 6  ;;  %v3507_v9 = vpop.f32.mrb[33].mxu0 }
0x1aaa   :  { %v1268_v11 = vpop.f32.mrb[34].mxu0 }
0x1aab   :  { %v1274_v14 = vadd.f32 %v1272_v8, %v4348_v20  ;;  %v3508_v15 = vpop.f32.mrb[35].mxu0 }
0x1aad   :  { %v3215_v17 = vmul.f32 -1.442695, %v1274_v14 }
0x1aaf   :  { %3803 = vpow2.f32 %v3215_v17 }
0x1ab3   :  { %v3802_v18 = vpop.eup %3801 }
0x1ab4   :  { %v1199_v19 = vadd.f32 1.0, %v3802_v18 }
0x1ab6   :  { %3805 = vrcp.f32 %v1199_v19 }
0x1ab9   :  { %v3804_v21 = vpop.eup %3803 }
0x1aba   :  { %v1278_v22 = vadd.f32 1.0, %v3804_v21 }
0x1abc   :  { %3807 = vrcp.f32 %v1278_v22 }
0x1ac0   :  { %v3806_v23 = vpop.eup %3805 }
0x1ac1   :  { %v1202_v25 = vmul.f32 %v3806_v23, %v4138_v24 }
0x1ac3   :  { %v1203_v28 = vadd.f32 %v1202_v25, %v4141_v26 }
0x1ac5   :  { %1209 = vrot.lane.b32.xlu1 %v1203_v28, %s4029_s24  ;;  %v1207_v32 = vmul.f32 %v1205_v31, %v1203_v28 }
0x1ac6   :  { %v3808_v2 = vpop.eup %3807 }
0x1ac7   :  { %v1281_v30 = vmul.f32 %v3808_v2, %v4138_v24 }
0x1ac9   :  { %v1282_v33 = vadd.f32 %v1281_v30, %v4141_v26 }
0x1acb   :  { %1288 = vrot.lane.b32.xlu0 %v1282_v33, %s4029_s24  ;;  %v1286_v42 = vmul.f32 %v1284_v3, %v1282_v33 }
0x1b37   :  { %v1210_v34 = vpop.permute.xlu1 %1209 }
0x1b38   :  { %v1212_v37 = vmul.f32 %v1210_v34, %v1203_v28 }
0x1b3a   :  { %1214 = vrot.lane.b32.xlu1 %v1212_v37, %s4036_s2 }
0x1b3d   :  { %v1289_v38 = vpop.permute.xlu0 %1288 }
0x1b3e   :  { %v1291_v39 = vmul.f32 %v1289_v38, %v1282_v33 }
0x1b40   :  { %1293 = vrot.lane.b32.xlu0 %v1291_v39, %s4036_s2 }
0x1bac   :  { %v1215_v40 = vpop.permute.xlu1 %1214 }
0x1bad   :  { %v4399_v41 = vadd.f32 %v1215_v40, %v1207_v32 }
0x1baf   :  { %3809 = vtanh.f32 %v4399_v41  ;;  %v1369_v34 = vrot.slane %v4399_v41, 6 }
0x1bb2   :  { %v1294_v43 = vpop.permute.xlu0 %1293 }
0x1bb3   :  { %v4403_v10 = vadd.f32 %v1294_v43, %v1286_v42 }
0x1bb5   :  { %3811 = vtanh.f32 %v4403_v10  ;;  %v1449_v31 = vrot.slane %v4403_v10, 6 }
0x1bb9   :  { %v3810_v44 = vpop.eup %3809 }
0x1bba   :  { %1220 = vrot.lane.b32.xlu1 %v3810_v44, %s4029_s24 }
0x1bbf   :  { %v3812_v4 = vpop.eup %3811 }
0x1bc0   :  { %1299 = vrot.lane.b32.xlu0 %v3812_v4, %s4029_s24 }
0x1c2c   :  { %v1221_v46 = vpop.permute.xlu1 %1220 }
0x1c2d   :  { %v1223_v36 = vmul.f32 %v1221_v46, %v1203_v28 }
0x1c2f   :  { %v1308_v29 = vpack.c.bf16 %v1223_v36, %v1223_v36 }
0x1c31   :  { %v1310_v47 = vrot.slane %v1308_v29, 1 }
0x1c32   :  { %v1300_v48 = vpop.permute.xlu0 %1299 }
0x1c33   :  { %v4408_v27 = vmul.f32 %v1300_v48, %v1282_v33  ;;  %1311 = vrot.lane.b32.xlu1 %v1310_v47, %s4036_s2 }
0x1c35   :  { %v1388_v50 = vpack.c.bf16 %v4408_v27, %v4408_v27 }
0x1c37   :  { %v1390_v59 = vrot.slane %v1388_v50, 1 }
0x1c39   :  { %1391 = vrot.lane.b32.xlu0 %v1390_v59, %s4036_s2 }
0x1ca5   :  { %v1312_v58 = vpop.permute.xlu1 %1311 }
0x1ca6   :  { %3514 = vmatmul.mubr.msk.bf16.vlgmr.msra.gmra.mrb[24].mxu1 %vm241_vm5, %v1312_v58 }
0x1ca7   :  { %3526 = vmatpush3.bf16.msra.mxu1 %v4300_v49  ;;  %3529 = vmatprep.mubr.msk.bf16.mxu1 %vm4033_vm0, %v4032_v0 }
0x1ca8   :  { %3527 = vmatprep.subr.bf16.mxu1 %v4032_v0 }
0x1cab   :  { %v1392_v52 = vpop.permute.xlu0 %1391  ;;  %3528 = vmatpush3.bf16.msra.mxu1 %v4304_v51 }
0x1cac   :  { %3522 = vmatmul.mubr.msk.bf16.vlgmr.msra.gmra.mrb[36].mxu0 %vm241_vm5, %v1392_v52  ;;  %3541 = vmatprep.subr.bf16.mxu1 %v4032_v0 }
0x1cad   :  { %3534 = vmatpush3.bf16.msra.mxu0 %v4323_v60  ;;  %3537 = vmatprep.mubr.msk.bf16.mxu0 %vm4033_vm0, %v4032_v0 }
0x1cae   :  { %3535 = vmatprep.subr.bf16.mxu0 %v4032_v0 }
0x1cb1   :  { %3536 = vmatpush3.bf16.msra.mxu0 %v4327_v62 }
0x1cb2   :  { %3549 = vmatprep.subr.bf16.mxu0 %v4032_v0 }
0x1d79   :  { %v1350_v45 = vpop.f32.mrb[24].mxu1 }
0x1d7a   :  { %v1357_v54 = vrot.slane %v1350_v45, 4  ;;  %v3515_v5 = vpop.f32.mrb[25].mxu1 }
0x1d7b   :  { %v1353_v12 = vpop.f32.mrb[26].mxu1 }
0x1d7c   :  { %v1359_v55 = vadd.f32 %v1357_v54, %v4341_v13  ;;  %v3516_v56 = vpop.f32.mrb[27].mxu1 }
0x1d7e   :  { %v3217_v57 = vmul.f32 -1.442695, %v1359_v55 }
0x1d7f   :  { %v1430_v61 = vpop.f32.mrb[36].mxu0 }
0x1d80   :  { %3813 = vpow2.f32 %v3217_v57  ;;  %v1437_v63 = vrot.slane %v1430_v61, 4  ;;  %v3523_v1 = vpop.f32.mrb[37].mxu0 }
0x1d81   :  { %v1433_v6 = vpop.f32.mrb[38].mxu0 }
0x1d82   :  { %v1439_v7 = vadd.f32 %v1437_v63, %v4348_v20  ;;  %v3524_v8 = vpop.f32.mrb[39].mxu0 }
0x1d84   :  { %v3219_v9 = vmul.f32 -1.442695, %v1439_v7 }
0x1d86   :  { %3815 = vpow2.f32 %v3219_v9 }
0x1d8a   :  { %v3814_v11 = vpop.eup %3813 }
0x1d8b   :  { %v1363_v14 = vadd.f32 1.0, %v3814_v11 }
0x1d8d   :  { %3817 = vrcp.f32 %v1363_v14 }
0x1d90   :  { %v3816_v15 = vpop.eup %3815 }
0x1d91   :  { %v1443_v17 = vadd.f32 1.0, %v3816_v15 }
0x1d93   :  { %3819 = vrcp.f32 %v1443_v17 }
0x1d97   :  { %v3818_v18 = vpop.eup %3817 }
0x1d98   :  { %v1366_v19 = vmul.f32 %v3818_v18, %v4138_v24 }
0x1d9a   :  { %v1367_v21 = vadd.f32 %v1366_v19, %v4141_v26 }
0x1d9c   :  { %1373 = vrot.lane.b32.xlu1 %v1367_v21, %s4029_s24  ;;  %v1371_v37 = vmul.f32 %v1369_v34, %v1367_v21 }
0x1d9d   :  { %v3820_v22 = vpop.eup %3819 }
0x1d9e   :  { %v1446_v23 = vmul.f32 %v3820_v22, %v4138_v24 }
0x1da0   :  { %v1447_v25 = vadd.f32 %v1446_v23, %v4141_v26 }
0x1da2   :  { %1453 = vrot.lane.b32.xlu0 %v1447_v25, %s4029_s24  ;;  %v1451_v32 = vmul.f32 %v1449_v31, %v1447_v25 }
0x1e0e   :  { %v1374_v28 = vpop.permute.xlu1 %1373 }
0x1e0f   :  { %v1376_v2 = vmul.f32 %v1374_v28, %v1367_v21 }
0x1e11   :  { %1378 = vrot.lane.b32.xlu1 %v1376_v2, %s4036_s2 }
0x1e14   :  { %v1454_v30 = vpop.permute.xlu0 %1453 }
0x1e15   :  { %v1456_v33 = vmul.f32 %v1454_v30, %v1447_v25 }
0x1e17   :  { %1458 = vrot.lane.b32.xlu0 %v1456_v33, %s4036_s2 }
0x1e83   :  { %v1379_v38 = vpop.permute.xlu1 %1378 }
0x1e84   :  { %v4439_v39 = vadd.f32 %v1379_v38, %v1371_v37 }
0x1e86   :  { %3821 = vtanh.f32 %v4439_v39 }
0x1e89   :  { %v1459_v40 = vpop.permute.xlu0 %1458 }
0x1e8a   :  { %v4443_v3 = vadd.f32 %v1459_v40, %v1451_v32 }
0x1e8c   :  { %3823 = vtanh.f32 %v4443_v3  ;;  %v1614_v33 = vrot.slane %v4443_v3, 6 }
0x1e90   :  { %v3822_v42 = vpop.eup %3821 }
0x1e91   :  { %1384 = vrot.lane.b32.xlu1 %v3822_v42, %s4029_s24 }
0x1e96   :  { %v3824_v43 = vpop.eup %3823 }
0x1e97   :  { %1464 = vrot.lane.b32.xlu0 %v3824_v43, %s4029_s24 }
0x1f03   :  { %v1385_v41 = vpop.permute.xlu1 %1384 }
0x1f04   :  { %v1387_v44 = vmul.f32 %v1385_v41, %v1367_v21 }
0x1f06   :  { %v1473_v4 = vpack.c.bf16 %v1387_v44, %v1387_v44 }
0x1f08   :  { %v1475_v46 = vrot.slane %v1473_v4, 2 }
0x1f09   :  { %v1465_v36 = vpop.permute.xlu0 %1464 }
0x1f0a   :  { %v4448_v10 = vmul.f32 %v1465_v36, %v1447_v25  ;;  %1476 = vrot.lane.b32.xlu1 %v1475_v46, %s4036_s2  ;;  %v1534_v25 = vrot.slane %v4439_v39, 6 }
0x1f0c   :  { %v1553_v29 = vpack.c.bf16 %v4448_v10, %v4448_v10 }
0x1f0e   :  { %v1555_v47 = vrot.slane %v1553_v29, 2 }
0x1f10   :  { %1556 = vrot.lane.b32.xlu0 %v1555_v47, %s4036_s2 }
0x1f7c   :  { %v1477_v48 = vpop.permute.xlu1 %1476 }
0x1f7d   :  { %3530 = vmatmul.mubr.msk.bf16.vlgmr.msra.gmra.mrb[28].mxu1 %vm241_vm5, %v1477_v48 }
0x1f7e   :  { %3542 = vmatpush3.bf16.msra.mxu1 %v4300_v49  ;;  %3545 = vmatprep.mubr.msk.bf16.mxu1 %vm4033_vm0, %v4032_v0 }
0x1f7f   :  { %3543 = vmatprep.subr.bf16.mxu1 %v4032_v0 }
0x1f82   :  { %v1557_v50 = vpop.permute.xlu0 %1556  ;;  %3544 = vmatpush3.bf16.msra.mxu1 %v4304_v51 }
0x1f83   :  { %3538 = vmatmul.mubr.msk.bf16.vlgmr.msra.gmra.mrb[40].mxu0 %vm241_vm5, %v1557_v50  ;;  %3557 = vmatprep.subr.bf16.mxu1 %v4032_v0 }
0x1f84   :  { %3550 = vmatpush3.bf16.msra.mxu0 %v4323_v60  ;;  %3553 = vmatprep.mubr.msk.bf16.mxu0 %vm4033_vm0, %v4032_v0 }
0x1f85   :  { %3551 = vmatprep.subr.bf16.mxu0 %v4032_v0 }
0x1f88   :  { %3552 = vmatpush3.bf16.msra.mxu0 %v4327_v62 }
0x1f89   :  { %3565 = vmatprep.subr.bf16.mxu0 %v4032_v0 }
0x2050   :  { %v1515_v59 = vpop.f32.mrb[28].mxu1 }
0x2051   :  { %v1522_v58 = vrot.slane %v1515_v59, 2  ;;  %v3531_v52 = vpop.f32.mrb[29].mxu1 }
0x2052   :  { %v1518_v45 = vpop.f32.mrb[30].mxu1 }
0x2053   :  { %v1524_v54 = vadd.f32 %v1522_v58, %v4341_v13  ;;  %v3532_v5 = vpop.f32.mrb[31].mxu1 }
0x2055   :  { %v3221_v12 = vmul.f32 -1.442695, %v1524_v54 }
0x2056   :  { %v1595_v55 = vpop.f32.mrb[40].mxu0 }
0x2057   :  { %3825 = vpow2.f32 %v3221_v12  ;;  %v1602_v56 = vrot.slane %v1595_v55, 2  ;;  %v3539_v57 = vpop.f32.mrb[41].mxu0 }
0x2058   :  { %v1598_v61 = vpop.f32.mrb[42].mxu0 }
0x2059   :  { %v1604_v63 = vadd.f32 %v1602_v56, %v4348_v20  ;;  %v3540_v1 = vpop.f32.mrb[43].mxu0 }
0x205b   :  { %v3223_v6 = vmul.f32 -1.442695, %v1604_v63 }
0x205d   :  { %3827 = vpow2.f32 %v3223_v6 }
0x2061   :  { %v3826_v7 = vpop.eup %3825 }
0x2062   :  { %v1528_v8 = vadd.f32 1.0, %v3826_v7 }
0x2064   :  { %3829 = vrcp.f32 %v1528_v8 }
0x2067   :  { %v3828_v9 = vpop.eup %3827 }
0x2068   :  { %v1608_v11 = vadd.f32 1.0, %v3828_v9 }
0x206a   :  { %3831 = vrcp.f32 %v1608_v11 }
0x206e   :  { %v3830_v14 = vpop.eup %3829 }
0x206f   :  { %v1531_v13 = vmul.f32 %v3830_v14, %v4138_v24 }
0x2071   :  { %v1532_v15 = vadd.f32 %v1531_v13, %v4141_v26 }
0x2073   :  { %1538 = vrot.lane.b32.xlu1 %v1532_v15, %s4029_s24  ;;  %v1536_v28 = vmul.f32 %v1534_v25, %v1532_v15 }
0x2074   :  { %v3832_v17 = vpop.eup %3831 }
0x2075   :  { %v1611_v18 = vmul.f32 %v3832_v17, %v4138_v24 }
0x2077   :  { %v1612_v20 = vadd.f32 %v1611_v18, %v4141_v26 }
0x2079   :  { %1618 = vrot.lane.b32.xlu0 %v1612_v20, %s4029_s24  ;;  %v1616_v34 = vmul.f32 %v1614_v33, %v1612_v20 }
0x20e5   :  { %v1539_v19 = vpop.permute.xlu1 %1538 }
0x20e6   :  { %v1541_v21 = vmul.f32 %v1539_v19, %v1532_v15 }
0x20e8   :  { %1543 = vrot.lane.b32.xlu1 %v1541_v21, %s4036_s2 }
0x20eb   :  { %v1619_v22 = vpop.permute.xlu0 %1618 }
0x20ec   :  { %v1621_v23 = vmul.f32 %v1619_v22, %v1612_v20 }
0x20ee   :  { %1623 = vrot.lane.b32.xlu0 %v1621_v23, %s4036_s2 }
0x215a   :  { %v1544_v2 = vpop.permute.xlu1 %1543 }
0x215b   :  { %v4479_v30 = vadd.f32 %v1544_v2, %v1536_v28 }
0x215d   :  { %3833 = vtanh.f32 %v4479_v30  ;;  %v1696_v18 = vrot.slane %v4479_v30, 6 }
0x2160   :  { %v1624_v37 = vpop.permute.xlu0 %1623 }
0x2161   :  { %v4483_v38 = vadd.f32 %v1624_v37, %v1616_v34 }
0x2163   :  { %3835 = vtanh.f32 %v4483_v38  ;;  %v1773_v22 = vrot.slane %v4483_v38, 6 }
0x2167   :  { %v3834_v31 = vpop.eup %3833 }
0x2168   :  { %1549 = vrot.lane.b32.xlu1 %v3834_v31, %s4029_s24 }
0x216d   :  { %v3836_v32 = vpop.eup %3835 }
0x216e   :  { %1629 = vrot.lane.b32.xlu0 %v3836_v32, %s4029_s24 }
0x21da   :  { %v1550_v39 = vpop.permute.xlu1 %1549 }
0x21db   :  { %v1552_v40 = vmul.f32 %v1550_v39, %v1532_v15 }
0x21dd   :  { %v1638_v42 = vpack.c.bf16 %v1552_v40, %v1552_v40 }
0x21df   :  { %v1640_v43 = vrot.slane %v1638_v42, 3 }
0x21e0   :  { %v1630_v41 = vpop.permute.xlu0 %1629 }
0x21e1   :  { %v4488_v3 = vmul.f32 %v1630_v41, %v1612_v20  ;;  %1641 = vrot.lane.b32.xlu1 %v1640_v43, %s4036_s2 }
0x21e3   :  { %v1715_v44 = vpack.c.bf16 %v4488_v3, %v4488_v3 }
0x21e5   :  { %v1717_v4 = vrot.slane %v1715_v44, 3 }
0x21e7   :  { %1718 = vrot.lane.b32.xlu0 %v1717_v4, %s4036_s2 }
0x2253   :  { %v1642_v46 = vpop.permute.xlu1 %1641 }
0x2254   :  { %3546 = vmatmul.mubr.msk.bf16.vlgmr.msra.gmra.mrb[32].mxu1 %vm241_vm5, %v1642_v46 }
0x2255   :  { %3558 = vmatpush3.bf16.msra.mxu1 %v4300_v49  ;;  %3561 = vmatprep.mubr.msk.bf16.mxu1 %vm4033_vm0, %v4032_v0 }
0x2256   :  { %3559 = vmatprep.subr.bf16.mxu1 %v4032_v0 }
0x2259   :  { %v1719_v36 = vpop.permute.xlu0 %1718  ;;  %3560 = vmatpush3.bf16.msra.mxu1 %v4304_v51 }
0x225a   :  { %3554 = vmatmul.mubr.msk.bf16.vlgmr.msra.gmra.mrb[44].mxu0 %vm241_vm5, %v1719_v36  ;;  %3573 = vmatprep.subr.bf16.mxu1 %v4032_v0 }
0x225b   :  { %3566 = vmatpush3.bf16.msra.mxu0 %v4323_v60  ;;  %3569 = vmatprep.mubr.msk.bf16.mxu0 %vm4033_vm0, %v4032_v0 }
0x225c   :  { %3567 = vmatprep.subr.bf16.mxu0 %v4032_v0 }
0x225f   :  { %3568 = vmatpush3.bf16.msra.mxu0 %v4327_v62 }
0x2260   :  { %3581 = vmatprep.subr.bf16.mxu0 %v4032_v0 }
0x2327   :  { %v1680_v29 = vpop.f32.mrb[32].mxu1 }
0x2328   :  { %v1686_v47 = vadd.f32 %v1680_v29, %v4343_v16  ;;  %v3547_v48 = vpop.f32.mrb[33].mxu1 }
0x2329   :  { %v1683_v50 = vpop.f32.mrb[34].mxu1 }
0x232a   :  { %v3225_v59 = vmul.f32 -1.442695, %v1686_v47  ;;  %v3548_v58 = vpop.f32.mrb[35].mxu1 }
0x232c   :  { %3837 = vpow2.f32 %v3225_v59 }
0x232d   :  { %v1757_v52 = vpop.f32.mrb[44].mxu0 }
0x232e   :  { %v1763_v45 = vadd.f32 %v1757_v52, %v4205_v35  ;;  %v3555_v54 = vpop.f32.mrb[45].mxu0 }
0x232f   :  { %v1760_v5 = vpop.f32.mrb[46].mxu0 }
0x2330   :  { %v3227_v12 = vmul.f32 -1.442695, %v1763_v45  ;;  %v3556_v55 = vpop.f32.mrb[47].mxu0 }
0x2332   :  { %3839 = vpow2.f32 %v3227_v12 }
0x2336   :  { %v3838_v56 = vpop.eup %3837 }
0x2337   :  { %v1690_v57 = vadd.f32 1.0, %v3838_v56 }
0x2339   :  { %3841 = vrcp.f32 %v1690_v57 }
0x233c   :  { %v3840_v61 = vpop.eup %3839 }
0x233d   :  { %v1767_v63 = vadd.f32 1.0, %v3840_v61 }
0x233f   :  { %3843 = vrcp.f32 %v1767_v63 }
0x2343   :  { %v3842_v1 = vpop.eup %3841 }
0x2344   :  { %v1693_v6 = vmul.f32 %v3842_v1, %v4138_v24 }
0x2346   :  { %v1694_v7 = vadd.f32 %v1693_v6, %v4141_v26 }
0x2348   :  { %1700 = vrot.lane.b32.xlu1 %v1694_v7, %s4029_s24  ;;  %v1698_v20 = vmul.f32 %v1696_v18, %v1694_v7 }
0x2349   :  { %v3844_v8 = vpop.eup %3843 }
0x234a   :  { %v1770_v9 = vmul.f32 %v3844_v8, %v4138_v24 }
0x234c   :  { %v1771_v11 = vadd.f32 %v1770_v9, %v4141_v26 }
0x234e   :  { %1777 = vrot.lane.b32.xlu0 %v1771_v11, %s4029_s24  ;;  %v1775_v23 = vmul.f32 %v1773_v22, %v1771_v11 }
0x23ba   :  { %v1701_v14 = vpop.permute.xlu1 %1700 }
0x23bb   :  { %v1703_v13 = vmul.f32 %v1701_v14, %v1694_v7 }
0x23bd   :  { %1705 = vrot.lane.b32.xlu1 %v1703_v13, %s4036_s2 }
0x23c0   :  { %v1778_v15 = vpop.permute.xlu0 %1777 }
0x23c1   :  { %v1780_v17 = vmul.f32 %v1778_v15, %v1771_v11 }
0x23c3   :  { %1782 = vrot.lane.b32.xlu0 %v1780_v17, %s4036_s2 }
0x242f   :  { %v1706_v19 = vpop.permute.xlu1 %1705 }
0x2430   :  { %v4519_v21 = vadd.f32 %v1706_v19, %v1698_v20 }
0x2432   :  { %3845 = vtanh.f32 %v4519_v21 }
0x2435   :  { %v1783_v25 = vpop.permute.xlu0 %1782 }
0x2436   :  { %v4523_v28 = vadd.f32 %v1783_v25, %v1775_v23 }
0x2438   :  { %3847 = vtanh.f32 %v4523_v28  ;;  %v1936_v17 = vrot.slane %v4523_v28, 6 }
0x243c   :  { %v3846_v2 = vpop.eup %3845 }
0x243d   :  { %1711 = vrot.lane.b32.xlu1 %v3846_v2, %s4029_s24 }
0x2442   :  { %v3848_v33 = vpop.eup %3847 }
0x2443   :  { %1788 = vrot.lane.b32.xlu0 %v3848_v33, %s4029_s24 }
0x24af   :  { %v1712_v30 = vpop.permute.xlu1 %1711 }
0x24b0   :  { %v1714_v34 = vmul.f32 %v1712_v30, %v1694_v7 }
0x24b2   :  { %v1797_v37 = vpack.c.bf16 %v1714_v34, %v1714_v34 }
0x24b4   :  { %1799 = vrot.lane.b32.xlu1 %v1797_v37, %s4036_s2 }
0x24b5   :  { %v1789_v38 = vpop.permute.xlu0 %1788 }
0x24b6   :  { %v4529_v31 = vmul.f32 %v1789_v38, %v1771_v11  ;;  %v1857_v11 = vrot.slane %v4519_v21, 6 }
0x24b8   :  { %v1876_v32 = vpack.c.bf16 %v4529_v31, %v4529_v31 }
0x24ba   :  { %1878 = vrot.lane.b32.xlu0 %v1876_v32, %s4036_s2 }
0x2526   :  { %v1800_v39 = vpop.permute.xlu1 %1799 }
0x2527   :  { %3562 = vmatmul.mubr.msk.bf16.vlgmr.msra.gmra.mrb[36].mxu1 %vm241_vm5, %v1800_v39 }
0x2528   :  { %3574 = vmatpush3.bf16.msra.mxu1 %v4300_v49  ;;  %3577 = vmatprep.mubr.msk.bf16.mxu1 %vm4033_vm0, %v4032_v0 }
0x2529   :  { %3575 = vmatprep.subr.bf16.mxu1 %v4032_v0 }
0x252c   :  { %v1879_v40 = vpop.permute.xlu0 %1878  ;;  %3576 = vmatpush3.bf16.msra.mxu1 %v4304_v51 }
0x252d   :  { %3570 = vmatmul.mubr.msk.bf16.vlgmr.msra.gmra.mrb[48].mxu0 %vm241_vm5, %v1879_v40  ;;  %3589 = vmatprep.subr.bf16.mxu1 %v4032_v0 }
0x252e   :  { %3582 = vmatpush3.bf16.msra.mxu0 %v4323_v60  ;;  %3585 = vmatprep.mubr.msk.bf16.mxu0 %vm4033_vm0, %v4032_v0 }
0x252f   :  { %3583 = vmatprep.subr.bf16.mxu0 %v4032_v0 }
0x2532   :  { %3584 = vmatpush3.bf16.msra.mxu0 %v4327_v62 }
0x2533   :  { %3597 = vmatprep.subr.bf16.mxu0 %v4032_v0 }
0x25fa   :  { %v1838_v42 = vpop.f32.mrb[36].mxu1 }
0x25fb   :  { %v1845_v43 = vrot.slane %v1838_v42, 6  ;;  %v3563_v41 = vpop.f32.mrb[37].mxu1 }
0x25fc   :  { %v1841_v44 = vpop.f32.mrb[38].mxu1 }
0x25fd   :  { %v1847_v4 = vadd.f32 %v1845_v43, %v4343_v16  ;;  %v3564_v46 = vpop.f32.mrb[39].mxu1 }
0x25ff   :  { %v3229_v36 = vmul.f32 -1.442695, %v1847_v4 }
0x2600   :  { %v1917_v29 = vpop.f32.mrb[48].mxu0 }
0x2601   :  { %3849 = vpow2.f32 %v3229_v36  ;;  %v1924_v47 = vrot.slane %v1917_v29, 6  ;;  %v3571_v48 = vpop.f32.mrb[49].mxu0 }
0x2602   :  { %v1920_v50 = vpop.f32.mrb[50].mxu0 }
0x2603   :  { %v1926_v59 = vadd.f32 %v1924_v47, %v4205_v35  ;;  %v3572_v58 = vpop.f32.mrb[51].mxu0 }
0x2605   :  { %v3231_v52 = vmul.f32 -1.442695, %v1926_v59 }
0x2607   :  { %3851 = vpow2.f32 %v3231_v52 }
0x260b   :  { %v3850_v45 = vpop.eup %3849 }
0x260c   :  { %v1851_v54 = vadd.f32 1.0, %v3850_v45 }
0x260e   :  { %3853 = vrcp.f32 %v1851_v54 }
0x2611   :  { %v3852_v5 = vpop.eup %3851 }
0x2612   :  { %v1930_v12 = vadd.f32 1.0, %v3852_v5 }
0x2614   :  { %3855 = vrcp.f32 %v1930_v12 }
0x2618   :  { %v3854_v55 = vpop.eup %3853 }
0x2619   :  { %v1854_v56 = vmul.f32 %v3854_v55, %v4138_v24 }
0x261b   :  { %v1855_v57 = vadd.f32 %v1854_v56, %v4141_v26 }
0x261d   :  { %1861 = vrot.lane.b32.xlu1 %v1855_v57, %s4029_s24  ;;  %v1859_v14 = vmul.f32 %v1857_v11, %v1855_v57 }
0x261e   :  { %v3856_v61 = vpop.eup %3855 }
0x261f   :  { %v1933_v63 = vmul.f32 %v3856_v61, %v4138_v24 }
0x2621   :  { %v1934_v1 = vadd.f32 %v1933_v63, %v4141_v26 }
0x2623   :  { %1940 = vrot.lane.b32.xlu0 %v1934_v1, %s4029_s24  ;;  %v1938_v18 = vmul.f32 %v1936_v17, %v1934_v1 }
0x268f   :  { %v1862_v6 = vpop.permute.xlu1 %1861 }
0x2690   :  { %v1864_v7 = vmul.f32 %v1862_v6, %v1855_v57 }
0x2692   :  { %1866 = vrot.lane.b32.xlu1 %v1864_v7, %s4036_s2 }
0x2695   :  { %v1941_v8 = vpop.permute.xlu0 %1940 }
0x2696   :  { %v1943_v9 = vmul.f32 %v1941_v8, %v1934_v1 }
0x2698   :  { %1945 = vrot.lane.b32.xlu0 %v1943_v9, %s4036_s2 }
0x2704   :  { %v1867_v13 = vpop.permute.xlu1 %1866 }
0x2705   :  { %v4559_v15 = vadd.f32 %v1867_v13, %v1859_v14 }
0x2707   :  { %3857 = vtanh.f32 %v4559_v15  ;;  %v2021_v63 = vrot.slane %v4559_v15, 6 }
0x270a   :  { %v1946_v20 = vpop.permute.xlu0 %1945 }
0x270b   :  { %v4563_v19 = vadd.f32 %v1946_v20, %v1938_v18 }
0x270d   :  { %3859 = vtanh.f32 %v4563_v19  ;;  %v2101_v8 = vrot.slane %v4563_v19, 6 }
0x2711   :  { %v3858_v22 = vpop.eup %3857 }
0x2712   :  { %1872 = vrot.lane.b32.xlu1 %v3858_v22, %s4029_s24 }
0x2717   :  { %v3860_v23 = vpop.eup %3859 }
0x2718   :  { %1951 = vrot.lane.b32.xlu0 %v3860_v23, %s4029_s24 }
0x2784   :  { %v1873_v21 = vpop.permute.xlu1 %1872 }
0x2785   :  { %v1875_v25 = vmul.f32 %v1873_v21, %v1855_v57 }
0x2787   :  { %v1960_v2 = vpack.c.bf16 %v1875_v25, %v1875_v25 }
0x2789   :  { %v1962_v33 = vrot.slane %v1960_v2, 1 }
0x278a   :  { %v1952_v30 = vpop.permute.xlu0 %1951 }
0x278b   :  { %v4568_v28 = vmul.f32 %v1952_v30, %v1934_v1  ;;  %1963 = vrot.lane.b32.xlu1 %v1962_v33, %s4036_s2 }
0x278d   :  { %v2040_v34 = vpack.c.bf16 %v4568_v28, %v4568_v28 }
0x278f   :  { %v2042_v37 = vrot.slane %v2040_v34, 1 }
0x2791   :  { %2043 = vrot.lane.b32.xlu0 %v2042_v37, %s4036_s2 }
0x27fd   :  { %v1964_v38 = vpop.permute.xlu1 %1963 }
0x27fe   :  { %3578 = vmatmul.mubr.msk.bf16.vlgmr.msra.gmra.mrb[40].mxu1 %vm241_vm5, %v1964_v38 }
0x27ff   :  { %3590 = vmatpush3.bf16.msra.mxu1 %v4300_v49  ;;  %3593 = vmatprep.mubr.msk.bf16.mxu1 %vm4033_vm0, %v4032_v0 }
0x2800   :  { %3591 = vmatprep.subr.bf16.mxu1 %v4032_v0 }
0x2803   :  { %v2044_v32 = vpop.permute.xlu0 %2043  ;;  %3592 = vmatpush3.bf16.msra.mxu1 %v4304_v51 }
0x2804   :  { %3586 = vmatmul.mubr.msk.bf16.vlgmr.msra.gmra.mrb[52].mxu0 %vm241_vm5, %v2044_v32  ;;  %3605 = vmatprep.subr.bf16.mxu1 %v4032_v0 }
0x2805   :  { %3598 = vmatpush3.bf16.msra.mxu0 %v4323_v60  ;;  %3601 = vmatprep.mubr.msk.bf16.mxu0 %vm4033_vm0, %v4032_v0 }
0x2806   :  { %3599 = vmatprep.subr.bf16.mxu0 %v4032_v0 }
0x2809   :  { %3600 = vmatpush3.bf16.msra.mxu0 %v4327_v62 }
0x280a   :  { %3613 = vmatprep.subr.bf16.mxu0 %v4032_v0 }
0x28d1   :  { %v2002_v49 = vpop.f32.mrb[40].mxu1 }
0x28d2   :  { %v2009_v39 = vrot.slane %v2002_v49, 4  ;;  %v3579_v40 = vpop.f32.mrb[41].mxu1 }
0x28d3   :  { %v2005_v42 = vpop.f32.mrb[42].mxu1 }
0x28d4   :  { %v2011_v51 = vadd.f32 %v2009_v39, %v4343_v16  ;;  %v3580_v43 = vpop.f32.mrb[43].mxu1 }
0x28d6   :  { %v3233_v41 = vmul.f32 -1.442695, %v2011_v51 }
0x28d7   :  { %v2082_v44 = vpop.f32.mrb[52].mxu0 }
0x28d8   :  { %3861 = vpow2.f32 %v3233_v41  ;;  %v2089_v60 = vrot.slane %v2082_v44, 4  ;;  %v3587_v4 = vpop.f32.mrb[53].mxu0 }
0x28d9   :  { %v2085_v46 = vpop.f32.mrb[54].mxu0 }
0x28da   :  { %v2091_v36 = vadd.f32 %v2089_v60, %v4205_v35  ;;  %v3588_v29 = vpop.f32.mrb[55].mxu0 }
0x28dc   :  { %v3235_v47 = vmul.f32 -1.442695, %v2091_v36 }
0x28de   :  { %3863 = vpow2.f32 %v3235_v47 }
0x28e2   :  { %v3862_v62 = vpop.eup %3861 }
0x28e3   :  { %v2015_v48 = vadd.f32 1.0, %v3862_v62 }
0x28e5   :  { %3865 = vrcp.f32 %v2015_v48 }
0x28e8   :  { %v3864_v50 = vpop.eup %3863 }
0x28e9   :  { %v2095_v59 = vadd.f32 1.0, %v3864_v50 }
0x28eb   :  { %3867 = vrcp.f32 %v2095_v59 }
0x28ef   :  { %v3866_v58 = vpop.eup %3865 }
0x28f0   :  { %v2018_v52 = vmul.f32 %v3866_v58, %v4138_v24 }
0x28f2   :  { %v2019_v45 = vadd.f32 %v2018_v52, %v4141_v26 }
0x28f4   :  { %2025 = vrot.lane.b32.xlu1 %v2019_v45, %s4029_s24  ;;  %v2023_v1 = vmul.f32 %v2021_v63, %v2019_v45 }
0x28f5   :  { %v3868_v54 = vpop.eup %3867 }
0x28f6   :  { %v2098_v5 = vmul.f32 %v3868_v54, %v4138_v24 }
0x28f8   :  { %v2099_v12 = vadd.f32 %v2098_v5, %v4141_v26 }
0x28fa   :  { %2105 = vrot.lane.b32.xlu0 %v2099_v12, %s4029_s24  ;;  %v2103_v9 = vmul.f32 %v2101_v8, %v2099_v12  ;;  %v4646_v8 = vld [vmem:[#allocation7 + $0x68] sm:$0xff]  }
0x2966   :  { %v2026_v55 = vpop.permute.xlu1 %2025 }
0x2967   :  { %v2028_v56 = vmul.f32 %v2026_v55, %v2019_v45 }
0x2969   :  { %2030 = vrot.lane.b32.xlu1 %v2028_v56, %s4036_s2 }
0x296c   :  { %v2106_v57 = vpop.permute.xlu0 %2105 }
0x296d   :  { %v2108_v61 = vmul.f32 %v2106_v57, %v2099_v12 }
0x296f   :  { %2110 = vrot.lane.b32.xlu0 %v2108_v61, %s4036_s2 }
0x29db   :  { %v2031_v6 = vpop.permute.xlu1 %2030 }
0x29dc   :  { %v4599_v7 = vadd.f32 %v2031_v6, %v2023_v1 }
0x29de   :  { %3869 = vtanh.f32 %v4599_v7  ;;  %v2186_v54 = vrot.slane %v4599_v7, 6  ;;  %v4641_v7 = vld [vmem:[#allocation7 + $0x60] sm:$0xff]  }
0x29e1   :  { %v2111_v11 = vpop.permute.xlu0 %2110 }
0x29e2   :  { %v4603_v14 = vadd.f32 %v2111_v11, %v2103_v9 }
0x29e4   :  { %3871 = vtanh.f32 %v4603_v14  ;;  %v2266_v56 = vrot.slane %v4603_v14, 6 }
0x29e8   :  { %v3870_v13 = vpop.eup %3869 }
0x29e9   :  { %2036 = vrot.lane.b32.xlu1 %v3870_v13, %s4029_s24 }
0x29ee   :  { %v3872_v17 = vpop.eup %3871 }
0x29ef   :  { %2116 = vrot.lane.b32.xlu0 %v3872_v17, %s4029_s24 }
0x2a5b   :  { %v2037_v15 = vpop.permute.xlu1 %2036 }
0x2a5c   :  { %v2039_v18 = vmul.f32 %v2037_v15, %v2019_v45 }
0x2a5e   :  { %v2125_v20 = vpack.c.bf16 %v2039_v18, %v2039_v18 }
0x2a60   :  { %v2127_v22 = vrot.slane %v2125_v20, 2 }
0x2a61   :  { %v2117_v23 = vpop.permute.xlu0 %2116 }
0x2a62   :  { %v4608_v19 = vmul.f32 %v2117_v23, %v2099_v12  ;;  %2128 = vrot.lane.b32.xlu1 %v2127_v22, %s4036_s2 }
0x2a64   :  { %v2205_v21 = vpack.c.bf16 %v4608_v19, %v4608_v19 }
0x2a66   :  { %v2207_v25 = vrot.slane %v2205_v21, 2 }
0x2a68   :  { %2208 = vrot.lane.b32.xlu0 %v2207_v25, %s4036_s2 }
0x2ad4   :  { %v2129_v2 = vpop.permute.xlu1 %2128 }
0x2ad5   :  { %3594 = vmatmul.mubr.msk.bf16.vlgmr.msra.gmra.mrb[44].mxu1 %vm241_vm5, %v2129_v2 }
0x2ad6   :  { %3609 = vmatprep.mubr.msk.bf16.mxu1 %vm4033_vm0, %v4032_v0 }
0x2ada   :  { %v2209_v33 = vpop.permute.xlu0 %2208 }
0x2adb   :  { %3602 = vmatmul.mubr.msk.bf16.vlgmr.msra.gmra.mrb[56].mxu0 %vm241_vm5, %v2209_v33 }
0x2adc   :  { %3617 = vmatprep.mubr.msk.bf16.mxu0 %vm4033_vm0, %v4032_v0  ;;  %3614 = vmatpush3.bf16.msra.mxu0 %v4641_v7 }
0x2add   :  { %3615 = vmatprep.subr.bf16.mxu0 %v4032_v0 }
0x2ae0   :  { %3616 = vmatpush3.bf16.msra.mxu0 %v4646_v8 }
0x2ae1   :  { %3629 = vmatprep.subr.bf16.mxu0 %v4032_v0 }
0x2ba8   :  { %v2167_v30 = vpop.f32.mrb[44].mxu1 }
0x2ba9   :  { %v2174_v34 = vrot.slane %v2167_v30, 2  ;;  %v3595_v37 = vpop.f32.mrb[45].mxu1 }
0x2baa   :  { %v2170_v38 = vpop.f32.mrb[46].mxu1 }
0x2bab   :  { %v2176_v32 = vadd.f32 %v2174_v34, %v4343_v16  ;;  %v3596_v49 = vpop.f32.mrb[47].mxu1  ;;  %v3240_v38 = vld [vmem:[#allocation9 + $0x3] ss:$0 sm:$0xff] }
0x2bad   :  { %v3237_v39 = vmul.f32 -1.442695, %v2176_v32 }
0x2bae   :  { %v2247_v40 = vpop.f32.mrb[56].mxu0 }
0x2baf   :  { %3873 = vpow2.f32 %v3237_v39  ;;  %v2254_v42 = vrot.slane %v2247_v40, 2  ;;  %v3603_v51 = vpop.f32.mrb[57].mxu0 }
0x2bb0   :  { %v2250_v43 = vpop.f32.mrb[58].mxu0 }
0x2bb1   :  { %v2256_v41 = vadd.f32 %v2254_v42, %v4205_v35  ;;  %v3604_v44 = vpop.f32.mrb[59].mxu0 }
0x2bb3   :  { %v3239_v60 = vmul.f32 -1.442695, %v2256_v41 }
0x2bb5   :  { %3875 = vpow2.f32 %v3239_v60 }
0x2bb9   :  { %v3874_v4 = vpop.eup %3873 }
0x2bba   :  { %v2180_v46 = vadd.f32 1.0, %v3874_v4 }
0x2bbc   :  { %3877 = vrcp.f32 %v2180_v46 }
0x2bbf   :  { %v3876_v36 = vpop.eup %3875 }
0x2bc0   :  { %v2260_v29 = vadd.f32 1.0, %v3876_v36 }
0x2bc2   :  { %3879 = vrcp.f32 %v2260_v29 }
0x2bc6   :  { %v3878_v47 = vpop.eup %3877 }
0x2bc7   :  { %v2183_v16 = vmul.f32 %v3878_v47, %v4138_v24 }
0x2bc9   :  { %v2184_v62 = vadd.f32 %v2183_v16, %v4141_v26 }
0x2bcb   :  { %2190 = vrot.lane.b32.xlu1 %v2184_v62, %s4029_s24  ;;  %v2188_v5 = vmul.f32 %v2186_v54, %v2184_v62 }
0x2bcc   :  { %v3880_v48 = vpop.eup %3879 }
0x2bcd   :  { %v2263_v50 = vmul.f32 %v3880_v48, %v4138_v24 }
0x2bcf   :  { %v2264_v35 = vadd.f32 %v2263_v50, %v4141_v26 }
0x2bd1   :  { %2270 = vrot.lane.b32.xlu0 %v2264_v35, %s4029_s24  ;;  %v2268_v57 = vmul.f32 %v2266_v56, %v2264_v35 }
0x2c3d   :  { %v2191_v59 = vpop.permute.xlu1 %2190 }
0x2c3e   :  { %v2193_v58 = vmul.f32 %v2191_v59, %v2184_v62 }
0x2c40   :  { %2195 = vrot.lane.b32.xlu1 %v2193_v58, %s4036_s2 }
0x2c43   :  { %v2271_v52 = vpop.permute.xlu0 %2270 }
0x2c44   :  { %v2273_v45 = vmul.f32 %v2271_v52, %v2264_v35 }
0x2c46   :  { %2275 = vrot.lane.b32.xlu0 %v2273_v45, %s4036_s2 }
0x2cb2   :  { %v2196_v12 = vpop.permute.xlu1 %2195 }
0x2cb3   :  { %v4631_v55 = vadd.f32 %v2196_v12, %v2188_v5 }
0x2cb5   :  { %3881 = vtanh.f32 %v4631_v55  ;;  %v2423_v16 = vrot.slane %v4631_v55, 6 }
0x2cb8   :  { %v2276_v61 = vpop.permute.xlu0 %2275 }
0x2cb9   :  { %v2278_v63 = vadd.f32 %v2276_v61, %v2268_v57 }
0x2cbb   :  { %3883 = vtanh.f32 %v2278_v63 }
0x2cbf   :  { %v3882_v1 = vpop.eup %3881 }
0x2cc0   :  { %2201 = vrot.lane.b32.xlu1 %v3882_v1, %s4029_s24 }
0x2cc4   :  { %1304 = vrot.lane.b32.xlu1 %v4408_v27, %s4036_s2  ;;  %v3730_v27 = vld [vmem:[#allocation7 + $0x58] sm:$0xff]  }
0x2cc5   :  { %v3884_v6 = vpop.eup %3883 }
0x2cc6   :  { %2281 = vrot.lane.b32.xlu0 %v3884_v6, %s4029_s24 }
0x2cc8   :  { %1634 = vrot.lane.b32.xlu1 %v4488_v3, %s4036_s2 }
0x2cca   :  { %1141 = vrot.lane.b32.xlu0 %v4369_v53, %s4036_s2  ;;  %v3729_v53 = vld [vmem:[#allocation7 + $0x50] sm:$0xff]  }
0x2ccb   :  { %3606 = vmatpush3.bf16.msra.mxu1 %v3729_v53 }
0x2ccc   :  { %1956 = vrot.lane.b32.xlu1 %v4568_v28, %s4036_s2  ;;  %3607 = vmatprep.subr.bf16.mxu1 %v4032_v0 }
0x2cce   :  { %1469 = vrot.lane.b32.xlu0 %v4448_v10, %s4036_s2 }
0x2ccf   :  { %3608 = vmatpush3.bf16.msra.mxu1 %v3730_v27 }
0x2cd0   :  { %3621 = vmatprep.subr.bf16.mxu1 %v4032_v0 }
0x2cd2   :  { %1793 = vrot.lane.b32.xlu0 %v4529_v31, %s4036_s2 }
0x2cd6   :  { %2121 = vrot.lane.b32.xlu0 %v4608_v19, %s4036_s2 }
0x2d32   :  { %v2202_v3 = vpop.permute.xlu1 %2201 }
0x2d33   :  { %v2204_v28 = vmul.f32 %v2202_v3, %v2184_v62 }
0x2d35   :  { %v2353_v9 = vpack.c.bf16 %v2204_v28, %v2204_v28 }
0x2d36   :  { %v1305_v10 = vpop.permute.xlu1 %1304 }
0x2d37   :  { %v2355_v11 = vrot.slane %v2353_v9, 3  ;;  %1307 = vst.msk [vmem:[#allocation2] sm:$0xc] %vm400_vm8, %v1305_v10 }
0x2d38   :  { %v2282_v14 = vpop.permute.xlu0 %2281 }
0x2d39   :  { %v2284_v31 = vmul.f32 %v2282_v14, %v2264_v35  ;;  %2356 = vrot.lane.b32.xlu0 %v2355_v11, %s4036_s2 }
0x2d3a   :  { %v1635_v13 = vpop.permute.xlu1 %1634 }
0x2d3b   :  { %1637 = vst.msk [vmem:[#allocation2] sm:$0xc0] %vm572_vm9, %v1635_v13  ;;  %2286 = vrot.lane.b32.xlu1 %v2284_v31, %s4036_s2 }
0x2d3c   :  { %v1142_v17 = vpop.permute.xlu0 %1141 }
0x2d3d   :  { %1144 = vst.msk [vmem:[#allocation2] sm:$0x3] %vm315_vm6, %v1142_v17 }
0x2d3e   :  { %v1957_v15 = vpop.permute.xlu1 %1956 }
0x2d3f   :  { %1959 = vst.msk [vmem:[#allocation2 + $0x8] sm:$0xc] %vm400_vm8, %v1957_v15 }
0x2d40   :  { %v1470_v18 = vpop.permute.xlu0 %1469 }
0x2d41   :  { %1472 = vst.msk [vmem:[#allocation2] sm:$0x30] %vm486_vm7, %v1470_v18 }
0x2d44   :  { %v1794_v20 = vpop.permute.xlu0 %1793 }
0x2d45   :  { %1796 = vst.msk [vmem:[#allocation2 + $0x8] sm:$0x3] %vm315_vm6, %v1794_v20 }
0x2d48   :  { %v2122_v22 = vpop.permute.xlu0 %2121  ;;  %v2290_v21 = vld [vmem:[#allocation2] sm:$0xff] }
0x2d49   :  { %2124 = vst.msk [vmem:[#allocation2 + $0x8] sm:$0x30] %vm486_vm7, %v2122_v22 }
0x2dab   :  { %v2357_v23 = vpop.permute.xlu0 %2356 }
0x2dac   :  { %3618 = vmatmul.mubr.msk.bf16.vlgmr.msra.gmra.mrb[60].mxu0 %vm241_vm5, %v2357_v23 }
0x2dad   :  { %v2287_v19 = vpop.permute.xlu1 %2286  ;;  %3630 = vmatpush3.bf16.msra.mxu0 %v4641_v7  ;;  %3633 = vmatprep.mubr.msk.bf16.mxu0 %vm4033_vm0, %v4032_v0 }
0x2dae   :  { %2289 = vst.msk [vmem:[#allocation2 + $0x8] sm:$0xc0] %vm572_vm9, %v2287_v19  ;;  %2998 = vst.msk [vmem:[#allocation3 - $0x6] sm:$0xc0] %vm572_vm9, %v2287_v19  ;;  %3631 = vmatprep.subr.bf16.mxu0 %v4032_v0 }
0x2db1   :  { %3632 = vmatpush3.bf16.msra.mxu0 %v4646_v8 }
0x2db2   :  { %3645 = vmatprep.subr.bf16.mxu0 %v4032_v0 }
0x2db5   :  { %v2291_v25 = vld [vmem:[#allocation2 + $0x8] sm:$0xff] }
0x2db6   :  { %v2292_v2 = vpack.c.bf16 %v2291_v25, %v2290_v21 }
0x2db8   :  { %3610 = vmatmul.mubr.msk.bf16.vlgmr.msra.gmra.mrb[48].mxu1 %vm241_vm5, %v2292_v2 }
0x2db9   :  { %3622 = vmatpush3.bf16.msra.mxu1 %v4641_v7  ;;  %3625 = vmatprep.mubr.msk.bf16.mxu1 %vm4033_vm0, %v4032_v0 }
0x2dba   :  { %3623 = vmatprep.subr.bf16.mxu1 %v4032_v0 }
0x2dbd   :  { %3624 = vmatpush3.bf16.msra.mxu1 %v4646_v8 }
0x2dbe   :  { %3637 = vmatprep.subr.bf16.mxu1 %v4032_v0 }
0x2e7f   :  { %v2407_v33 = vpop.f32.mrb[60].mxu0 }
0x2e80   :  { %v3619_v30 = vpop.f32.mrb[61].mxu0 }
0x2e81   :  { %v2410_v34 = vpop.f32.mrb[62].mxu0 }
0x2e82   :  { %v3620_v37 = vpop.f32.mrb[63].mxu0 }
0x2e8b   :  { %v2346_v32 = vpop.f32.mrb[48].mxu1 }
0x2e8c   :  { %v4686_v49 = vadd.f32 %v3240_v38, %v2346_v32  ;;  %v3611_v39 = vpop.f32.mrb[49].mxu1 }
0x2e8d   :  { %v2349_v40 = vpop.f32.mrb[50].mxu1 }
0x2e8e   :  { %v2413_v42 = vadd.f32 %v2407_v33, %v4686_v49  ;;  %v4689_v51 = vadd.f32 %v3240_v38, %v2349_v40  ;;  %v3612_v43 = vpop.f32.mrb[51].mxu1 }
0x2e90   :  { %v3247_v41 = vmul.f32 -1.442695, %v2413_v42 }
0x2e92   :  { %3885 = vpow2.f32 %v3247_v41 }
0x2e9c   :  { %v3886_v44 = vpop.eup %3885 }
0x2e9d   :  { %v2417_v60 = vadd.f32 1.0, %v3886_v44 }
0x2e9f   :  { %3887 = vrcp.f32 %v2417_v60 }
0x2ea9   :  { %v3888_v4 = vpop.eup %3887 }
0x2eaa   :  { %v2420_v46 = vmul.f32 %v3888_v4, %v4138_v24 }
0x2eac   :  { %v2421_v36 = vadd.f32 %v2420_v46, %v4141_v26 }
0x2eae   :  { %2427 = vrot.lane.b32.xlu1 %v2421_v36, %s4029_s24  ;;  %v2425_v62 = vmul.f32 %v2423_v16, %v2421_v36 }
0x2f20   :  { %v2428_v29 = vpop.permute.xlu1 %2427 }
0x2f21   :  { %v2430_v47 = vmul.f32 %v2428_v29, %v2421_v36 }
0x2f23   :  { %2432 = vrot.lane.b32.xlu0 %v2430_v47, %s4036_s2 }
0x2f95   :  { %v2433_v48 = vpop.permute.xlu0 %2432 }
0x2f96   :  { %v2435_v50 = vadd.f32 %v2433_v48, %v2425_v62 }
0x2f98   :  { %3889 = vtanh.f32 %v2435_v50  ;;  %v2502_v9 = vrot.slane %v2435_v50, 6 }
0x2fa2   :  { %v3890_v35 = vpop.eup %3889 }
0x2fa3   :  { %2438 = vrot.lane.b32.xlu1 %v3890_v35, %s4029_s24 }
0x3015   :  { %v2439_v59 = vpop.permute.xlu1 %2438 }
0x3016   :  { %v2441_v58 = vmul.f32 %v2439_v59, %v2421_v36 }
0x3018   :  { %v2442_v52 = vpack.c.bf16 %v2441_v58, %v2441_v58 }
0x301a   :  { %2444 = vrot.lane.b32.xlu0 %v2442_v52, %s4036_s2 }
0x308c   :  { %v2445_v45 = vpop.permute.xlu0 %2444 }
0x308d   :  { %3626 = vmatmul.mubr.msk.bf16.vlgmr.msra.gmra.mrb[52].mxu1 %vm241_vm5, %v2445_v45 }
0x308e   :  { %3638 = vmatpush3.bf16.msra.mxu1 %v4641_v7  ;;  %3641 = vmatprep.mubr.msk.bf16.mxu1 %vm4033_vm0, %v4032_v0 }
0x308f   :  { %3639 = vmatprep.subr.bf16.mxu1 %v4032_v0 }
0x3092   :  { %3640 = vmatpush3.bf16.msra.mxu1 %v4646_v8 }
0x3093   :  { %3653 = vmatprep.subr.bf16.mxu1 %v4032_v0 }
0x3160   :  { %v2483_v54 = vpop.f32.mrb[52].mxu1 }
0x3161   :  { %v2490_v5 = vrot.slane %v2483_v54, 6  ;;  %v3627_v12 = vpop.f32.mrb[53].mxu1 }
0x3162   :  { %v2486_v55 = vpop.f32.mrb[54].mxu1 }
0x3163   :  { %v2492_v56 = vadd.f32 %v2490_v5, %v4686_v49  ;;  %v3628_v57 = vpop.f32.mrb[55].mxu1 }
0x3165   :  { %v3249_v61 = vmul.f32 -1.442695, %v2492_v56 }
0x3167   :  { %3891 = vpow2.f32 %v3249_v61 }
0x3171   :  { %v3892_v63 = vpop.eup %3891 }
0x3172   :  { %v2496_v1 = vadd.f32 1.0, %v3892_v63 }
0x3174   :  { %3893 = vrcp.f32 %v2496_v1 }
0x317e   :  { %v3894_v6 = vpop.eup %3893 }
0x317f   :  { %v2499_v53 = vmul.f32 %v3894_v6, %v4138_v24 }
0x3181   :  { %v2500_v27 = vadd.f32 %v2499_v53, %v4141_v26 }
0x3183   :  { %2506 = vrot.lane.b32.xlu1 %v2500_v27, %s4029_s24  ;;  %v2504_v10 = vmul.f32 %v2502_v9, %v2500_v27 }
0x31f5   :  { %v2507_v3 = vpop.permute.xlu1 %2506 }
0x31f6   :  { %v2509_v28 = vmul.f32 %v2507_v3, %v2500_v27 }
0x31f8   :  { %2511 = vrot.lane.b32.xlu0 %v2509_v28, %s4036_s2 }
0x326a   :  { %v2512_v11 = vpop.permute.xlu0 %2511 }
0x326b   :  { %v2514_v14 = vadd.f32 %v2512_v11, %v2504_v10 }
0x326d   :  { %3895 = vtanh.f32 %v2514_v14  ;;  %v2582_v42 = vrot.slane %v2514_v14, 6 }
0x3277   :  { %v3896_v31 = vpop.eup %3895 }
0x3278   :  { %2517 = vrot.lane.b32.xlu1 %v3896_v31, %s4029_s24 }
0x32ea   :  { %v2518_v13 = vpop.permute.xlu1 %2517 }
0x32eb   :  { %v2520_v17 = vmul.f32 %v2518_v13, %v2500_v27 }
0x32ed   :  { %v2521_v15 = vpack.c.bf16 %v2520_v17, %v2520_v17 }
0x32ef   :  { %v2523_v18 = vrot.slane %v2521_v15, 1 }
0x32f1   :  { %2524 = vrot.lane.b32.xlu0 %v2523_v18, %s4036_s2 }
0x3363   :  { %v2525_v20 = vpop.permute.xlu0 %2524 }
0x3364   :  { %3634 = vmatmul.mubr.msk.bf16.vlgmr.msra.gmra.mrb[64].mxu0 %vm241_vm5, %v2525_v20 }
0x3365   :  { %3646 = vmatpush3.bf16.msra.mxu0 %v4641_v7  ;;  %3649 = vmatprep.mubr.msk.bf16.mxu0 %vm4033_vm0, %v4032_v0 }
0x3366   :  { %3647 = vmatprep.subr.bf16.mxu0 %v4032_v0 }
0x3369   :  { %3648 = vmatpush3.bf16.msra.mxu0 %v4646_v8 }
0x336a   :  { %3661 = vmatprep.subr.bf16.mxu0 %v4032_v0 }
0x3437   :  { %v2563_v22 = vpop.f32.mrb[64].mxu0 }
0x3438   :  { %v2570_v23 = vrot.slane %v2563_v22, 4  ;;  %v3635_v19 = vpop.f32.mrb[65].mxu0 }
0x3439   :  { %v2566_v21 = vpop.f32.mrb[66].mxu0 }
0x343a   :  { %v2572_v25 = vadd.f32 %v2570_v23, %v4686_v49  ;;  %v3636_v2 = vpop.f32.mrb[67].mxu0 }
0x343c   :  { %v3251_v33 = vmul.f32 -1.442695, %v2572_v25 }
0x343e   :  { %3897 = vpow2.f32 %v3251_v33 }
0x3448   :  { %v3898_v30 = vpop.eup %3897 }
0x3449   :  { %v2576_v34 = vadd.f32 1.0, %v3898_v30 }
0x344b   :  { %3899 = vrcp.f32 %v2576_v34 }
0x3455   :  { %v3900_v37 = vpop.eup %3899 }
0x3456   :  { %v2579_v38 = vmul.f32 %v3900_v37, %v4138_v24 }
0x3458   :  { %v2580_v32 = vadd.f32 %v2579_v38, %v4141_v26 }
0x345a   :  { %2586 = vrot.lane.b32.xlu1 %v2580_v32, %s4029_s24  ;;  %v2584_v43 = vmul.f32 %v2582_v42, %v2580_v32 }
0x34cc   :  { %v2587_v39 = vpop.permute.xlu1 %2586 }
0x34cd   :  { %v2589_v40 = vmul.f32 %v2587_v39, %v2580_v32 }
0x34cf   :  { %2591 = vrot.lane.b32.xlu0 %v2589_v40, %s4036_s2 }
0x3541   :  { %v2592_v41 = vpop.permute.xlu0 %2591 }
0x3542   :  { %v2594_v44 = vadd.f32 %v2592_v41, %v2584_v43 }
0x3544   :  { %3901 = vtanh.f32 %v2594_v44  ;;  %v2662_v57 = vrot.slane %v2594_v44, 6 }
0x354e   :  { %v3902_v60 = vpop.eup %3901 }
0x354f   :  { %2597 = vrot.lane.b32.xlu1 %v3902_v60, %s4029_s24 }
0x35c1   :  { %v2598_v4 = vpop.permute.xlu1 %2597 }
0x35c2   :  { %v2600_v46 = vmul.f32 %v2598_v4, %v2580_v32 }
0x35c4   :  { %v2601_v36 = vpack.c.bf16 %v2600_v46, %v2600_v46 }
0x35c6   :  { %v2603_v29 = vrot.slane %v2601_v36, 2 }
0x35c8   :  { %2604 = vrot.lane.b32.xlu0 %v2603_v29, %s4036_s2 }
0x363a   :  { %v2605_v47 = vpop.permute.xlu0 %2604 }
0x363b   :  { %3642 = vmatmul.mubr.msk.bf16.vlgmr.msra.gmra.mrb[56].mxu1 %vm241_vm5, %v2605_v47 }
0x363c   :  { %3654 = vmatpush3.bf16.msra.mxu1 %v4641_v7  ;;  %3657 = vmatprep.mubr.msk.bf16.mxu1 %vm4033_vm0, %v4032_v0 }
0x363d   :  { %3655 = vmatprep.subr.bf16.mxu1 %v4032_v0 }
0x3640   :  { %3656 = vmatpush3.bf16.msra.mxu1 %v4646_v8 }
0x3641   :  { %3669 = vmatprep.subr.bf16.mxu1 %v4032_v0 }
0x370e   :  { %v2643_v16 = vpop.f32.mrb[56].mxu1 }
0x370f   :  { %v2650_v62 = vrot.slane %v2643_v16, 2  ;;  %v3643_v48 = vpop.f32.mrb[57].mxu1 }
0x3710   :  { %v2646_v50 = vpop.f32.mrb[58].mxu1 }
0x3711   :  { %v2652_v35 = vadd.f32 %v2650_v62, %v4686_v49  ;;  %v3644_v59 = vpop.f32.mrb[59].mxu1 }
0x3713   :  { %v3253_v58 = vmul.f32 -1.442695, %v2652_v35 }
0x3715   :  { %3903 = vpow2.f32 %v3253_v58 }
0x371f   :  { %v3904_v52 = vpop.eup %3903 }
0x3720   :  { %v2656_v45 = vadd.f32 1.0, %v3904_v52 }
0x3722   :  { %3905 = vrcp.f32 %v2656_v45 }
0x372c   :  { %v3906_v54 = vpop.eup %3905 }
0x372d   :  { %v2659_v5 = vmul.f32 %v3906_v54, %v4138_v24 }
0x372f   :  { %v2660_v12 = vadd.f32 %v2659_v5, %v4141_v26 }
0x3731   :  { %2666 = vrot.lane.b32.xlu1 %v2660_v12, %s4029_s24  ;;  %v2664_v61 = vmul.f32 %v2662_v57, %v2660_v12 }
0x37a3   :  { %v2667_v55 = vpop.permute.xlu1 %2666 }
0x37a4   :  { %v2669_v56 = vmul.f32 %v2667_v55, %v2660_v12 }
0x37a6   :  { %2671 = vrot.lane.b32.xlu0 %v2669_v56, %s4036_s2 }
0x3818   :  { %v2672_v49 = vpop.permute.xlu0 %2671 }
0x3819   :  { %v2674_v63 = vadd.f32 %v2672_v49, %v2664_v61 }
0x381b   :  { %3907 = vtanh.f32 %v2674_v63  ;;  %v2739_v21 = vrot.slane %v2674_v63, 6 }
0x3825   :  { %v3908_v1 = vpop.eup %3907 }
0x3826   :  { %2677 = vrot.lane.b32.xlu1 %v3908_v1, %s4029_s24 }
0x3898   :  { %v2678_v6 = vpop.permute.xlu1 %2677 }
0x3899   :  { %v2680_v53 = vmul.f32 %v2678_v6, %v2660_v12 }
0x389b   :  { %v2681_v27 = vpack.c.bf16 %v2680_v53, %v2680_v53 }
0x389d   :  { %v2683_v3 = vrot.slane %v2681_v27, 3 }
0x389f   :  { %2684 = vrot.lane.b32.xlu0 %v2683_v3, %s4036_s2 }
0x3911   :  { %v2685_v28 = vpop.permute.xlu0 %2684 }
0x3912   :  { %3650 = vmatmul.mubr.msk.bf16.vlgmr.msra.gmra.mrb[68].mxu0 %vm241_vm5, %v2685_v28 }
0x3913   :  { %3662 = vmatpush3.bf16.msra.mxu0 %v4641_v7  ;;  %3665 = vmatprep.mubr.msk.bf16.mxu0 %vm4033_vm0, %v4032_v0 }
0x3914   :  { %3663 = vmatprep.subr.bf16.mxu0 %v4032_v0 }
0x3917   :  { %3664 = vmatpush3.bf16.msra.mxu0 %v4646_v8 }
0x3918   :  { %3677 = vmatprep.subr.bf16.mxu0 %v4032_v0 }
0x39e5   :  { %v2723_v9 = vpop.f32.mrb[68].mxu0 }
0x39e6   :  { %v2729_v10 = vadd.f32 %v2723_v9, %v4689_v51  ;;  %v3651_v11 = vpop.f32.mrb[69].mxu0 }
0x39e7   :  { %v2726_v14 = vpop.f32.mrb[70].mxu0 }
0x39e8   :  { %v3255_v31 = vmul.f32 -1.442695, %v2729_v10  ;;  %v3652_v13 = vpop.f32.mrb[71].mxu0 }
0x39ea   :  { %3909 = vpow2.f32 %v3255_v31 }
0x39f4   :  { %v3910_v17 = vpop.eup %3909 }
0x39f5   :  { %v2733_v15 = vadd.f32 1.0, %v3910_v17 }
0x39f7   :  { %3911 = vrcp.f32 %v2733_v15 }
0x3a01   :  { %v3912_v18 = vpop.eup %3911 }
0x3a02   :  { %v2736_v20 = vmul.f32 %v3912_v18, %v4138_v24 }
0x3a04   :  { %v2737_v22 = vadd.f32 %v2736_v20, %v4141_v26 }
0x3a06   :  { %2743 = vrot.lane.b32.xlu1 %v2737_v22, %s4029_s24  ;;  %v2741_v25 = vmul.f32 %v2739_v21, %v2737_v22 }
0x3a78   :  { %v2744_v23 = vpop.permute.xlu1 %2743 }
0x3a79   :  { %v2746_v19 = vmul.f32 %v2744_v23, %v2737_v22 }
0x3a7b   :  { %2748 = vrot.lane.b32.xlu0 %v2746_v19, %s4036_s2 }
0x3aed   :  { %v2749_v2 = vpop.permute.xlu0 %2748 }
0x3aee   :  { %v2751_v33 = vadd.f32 %v2749_v2, %v2741_v25 }
0x3af0   :  { %3913 = vtanh.f32 %v2751_v33  ;;  %v2818_v16 = vrot.slane %v2751_v33, 6 }
0x3afa   :  { %v3914_v30 = vpop.eup %3913 }
0x3afb   :  { %2754 = vrot.lane.b32.xlu1 %v3914_v30, %s4029_s24 }
0x3b6d   :  { %v2755_v34 = vpop.permute.xlu1 %2754 }
0x3b6e   :  { %v2757_v37 = vmul.f32 %v2755_v34, %v2737_v22 }
0x3b70   :  { %v2758_v38 = vpack.c.bf16 %v2757_v37, %v2757_v37 }
0x3b72   :  { %2760 = vrot.lane.b32.xlu0 %v2758_v38, %s4036_s2 }
0x3be4   :  { %v2761_v32 = vpop.permute.xlu0 %2760 }
0x3be5   :  { %3658 = vmatmul.mubr.msk.bf16.vlgmr.msra.gmra.mrb[60].mxu1 %vm241_vm5, %v2761_v32 }
0x3be6   :  { %3670 = vmatpush3.bf16.msra.mxu1 %v4641_v7  ;;  %3673 = vmatprep.mubr.msk.bf16.mxu1 %vm4033_vm0, %v4032_v0 }
0x3be7   :  { %3671 = vmatprep.subr.bf16.mxu1 %v4032_v0 }
0x3bea   :  { %3672 = vmatpush3.bf16.msra.mxu1 %v4646_v8 }
0x3beb   :  { %3685 = vmatprep.subr.bf16.mxu1 %v4032_v0 }
0x3cb8   :  { %v2799_v39 = vpop.f32.mrb[60].mxu1 }
0x3cb9   :  { %v2806_v40 = vrot.slane %v2799_v39, 6  ;;  %v3659_v42 = vpop.f32.mrb[61].mxu1 }
0x3cba   :  { %v2802_v43 = vpop.f32.mrb[62].mxu1 }
0x3cbb   :  { %v2808_v41 = vadd.f32 %v2806_v40, %v4689_v51  ;;  %v3660_v44 = vpop.f32.mrb[63].mxu1 }
0x3cbd   :  { %v3257_v60 = vmul.f32 -1.442695, %v2808_v41 }
0x3cbf   :  { %3915 = vpow2.f32 %v3257_v60  ;;  %v3731_v60 = vld [vmem:[#allocation7 + $0x70] sm:$0xff]  }
0x3cc9   :  { %v3916_v4 = vpop.eup %3915 }
0x3cca   :  { %v2812_v7 = vadd.f32 1.0, %v3916_v4  ;;  %v3732_v4 = vld [vmem:[#allocation7 + $0x78] sm:$0xff]  }
0x3ccc   :  { %3917 = vrcp.f32 %v2812_v7  ;;  %v3733_v7 = vld [vmem:[#allocation7 + $0x80] sm:$0xff]  }
0x3cd6   :  { %v3918_v46 = vpop.eup %3917 }
0x3cd7   :  { %v2815_v36 = vmul.f32 %v3918_v46, %v4138_v24  ;;  %v3734_v46 = vld [vmem:[#allocation7 + $0x88] sm:$0xff]  }
0x3cd9   :  { %v2816_v29 = vadd.f32 %v2815_v36, %v4141_v26  ;;  %v3735_v36 = vld [vmem:[#allocation7 + $0x90] sm:$0xff]  }
0x3cdb   :  { %2822 = vrot.lane.b32.xlu1 %v2816_v29, %s4029_s24  ;;  %v2820_v62 = vmul.f32 %v2818_v16, %v2816_v29 }
0x3d4d   :  { %v2823_v8 = vpop.permute.xlu1 %2822 }
0x3d4e   :  { %v2825_v47 = vmul.f32 %v2823_v8, %v2816_v29  ;;  %v3737_v8 = vld [vmem:[#allocation7 + $0xa0] sm:$0xff]  }
0x3d50   :  { %2827 = vrot.lane.b32.xlu0 %v2825_v47, %s4036_s2  ;;  %v3738_v47 = vld [vmem:[#allocation7 + $0xa8] sm:$0xff]  }
0x3dc2   :  { %v2828_v48 = vpop.permute.xlu0 %2827 }
0x3dc3   :  { %v2830_v50 = vadd.f32 %v2828_v48, %v2820_v62 }
0x3dc5   :  { %3919 = vtanh.f32 %v2830_v50  ;;  %v2898_v9 = vrot.slane %v2830_v50, 6 }
0x3dcf   :  { %v3920_v35 = vpop.eup %3919 }
0x3dd0   :  { %2833 = vrot.lane.b32.xlu1 %v3920_v35, %s4029_s24  ;;  %v3739_v35 = vld [vmem:[#allocation7 + $0xb0] sm:$0xff]  }
0x3e42   :  { %v2834_v59 = vpop.permute.xlu1 %2833 }
0x3e43   :  { %v2836_v58 = vmul.f32 %v2834_v59, %v2816_v29  ;;  %v3736_v29 = vld [vmem:[#allocation7 + $0x98] sm:$0xff]  }
0x3e44   :  { %v3740_v59 = vld [vmem:[#allocation7 + $0xb8] sm:$0xff]  }
0x3e45   :  { %v2837_v52 = vpack.c.bf16 %v2836_v58, %v2836_v58  ;;  %v3262_v58 = vld [vmem:[#allocation9 + $0x4] ss:$0 sm:$0xff] }
0x3e47   :  { %v2839_v45 = vrot.slane %v2837_v52, 1 }
0x3e49   :  { %2840 = vrot.lane.b32.xlu0 %v2839_v45, %s4036_s2 }
0x3ebb   :  { %v2841_v54 = vpop.permute.xlu0 %2840 }
0x3ebc   :  { %3666 = vmatmul.mubr.msk.bf16.vlgmr.msra.gmra.mrb[72].mxu0 %vm241_vm5, %v2841_v54 }
0x3ebd   :  { %3681 = vmatprep.mubr.msk.bf16.mxu0 %vm4033_vm0, %v4032_v0  ;;  %3678 = vmatpush3.bf16.msra.mxu0 %v3731_v60 }
0x3ebe   :  { %3679 = vmatprep.subr.bf16.mxu0 %v4032_v0 }
0x3ec1   :  { %3680 = vmatpush3.bf16.msra.mxu0 %v3732_v4 }
0x3f8f   :  { %v2879_v5 = vpop.f32.mrb[72].mxu0 }
0x3f90   :  { %v2886_v12 = vrot.slane %v2879_v5, 4  ;;  %v3667_v55 = vpop.f32.mrb[73].mxu0 }
0x3f91   :  { %v2882_v56 = vpop.f32.mrb[74].mxu0 }
0x3f92   :  { %v2888_v57 = vadd.f32 %v2886_v12, %v4689_v51  ;;  %v3668_v61 = vpop.f32.mrb[75].mxu0 }
0x3f94   :  { %v3259_v49 = vmul.f32 -1.442695, %v2888_v57  ;;  %v3266_v57 = vld [vmem:[#allocation9 + $0x5] ss:$0 sm:$0xff] }
0x3f96   :  { %3921 = vpow2.f32 %v3259_v49 }
0x3fa0   :  { %v3922_v63 = vpop.eup %3921 }
0x3fa1   :  { %v2892_v1 = vadd.f32 1.0, %v3922_v63 }
0x3fa3   :  { %3923 = vrcp.f32 %v2892_v1 }
0x3fad   :  { %v3924_v6 = vpop.eup %3923 }
0x3fae   :  { %v2895_v53 = vmul.f32 %v3924_v6, %v4138_v24 }
0x3fb0   :  { %v2896_v27 = vadd.f32 %v2895_v53, %v4141_v26 }
0x3fb2   :  { %2902 = vrot.lane.b32.xlu1 %v2896_v27, %s4029_s24  ;;  %v2900_v10 = vmul.f32 %v2898_v9, %v2896_v27 }
0x4024   :  { %v2903_v3 = vpop.permute.xlu1 %2902 }
0x4025   :  { %v2905_v28 = vmul.f32 %v2903_v3, %v2896_v27 }
0x4027   :  { %2907 = vrot.lane.b32.xlu0 %v2905_v28, %s4036_s2 }
0x4099   :  { %v2908_v11 = vpop.permute.xlu0 %2907 }
0x409a   :  { %v2910_v14 = vadd.f32 %v2908_v11, %v2900_v10 }
0x409c   :  { %3925 = vtanh.f32 %v2910_v14  ;;  %v2978_v42 = vrot.slane %v2910_v14, 6 }
0x40a6   :  { %v3926_v31 = vpop.eup %3925 }
0x40a7   :  { %2913 = vrot.lane.b32.xlu1 %v3926_v31, %s4029_s24 }
0x4119   :  { %v2914_v13 = vpop.permute.xlu1 %2913 }
0x411a   :  { %v2916_v17 = vmul.f32 %v2914_v13, %v2896_v27 }
0x411c   :  { %v2917_v15 = vpack.c.bf16 %v2916_v17, %v2916_v17 }
0x411e   :  { %v2919_v18 = vrot.slane %v2917_v15, 2 }
0x4120   :  { %2920 = vrot.lane.b32.xlu0 %v2919_v18, %s4036_s2 }
0x4192   :  { %v2921_v20 = vpop.permute.xlu0 %2920 }
0x4193   :  { %3674 = vmatmul.mubr.msk.bf16.vlgmr.msra.gmra.mrb[64].mxu1 %vm241_vm5, %v2921_v20 }
0x4194   :  { %3701 = vmatprep.mubr.msk.bf16.mxu1 %vm4033_vm0, %v4032_v0  ;;  %3686 = vmatpush3.bf16.msra.mxu1 %v3733_v7 }
0x4195   :  { %3687 = vmatprep.subr.bf16.mxu1 %v4032_v0 }
0x4198   :  { %3688 = vmatpush3.bf16.msra.mxu1 %v3734_v46 }
0x4199   :  { %3689 = vmatprep.subr.bf16.mxu1 %v4032_v0 }
0x419c   :  { %3690 = vmatpush3.bf16.msra.mxu1 %v3735_v36 }
0x419d   :  { %3691 = vmatprep.subr.bf16.mxu1 %v4032_v0 }
0x41a0   :  { %3692 = vmatpush3.bf16.msra.mxu1 %v3736_v29 }
0x41a1   :  { %3693 = vmatprep.subr.bf16.mxu1 %v4032_v0 }
0x41a4   :  { %3694 = vmatpush3.bf16.msra.mxu1 %v3737_v8 }
0x41a5   :  { %3695 = vmatprep.subr.bf16.mxu1 %v4032_v0 }
0x41a8   :  { %3696 = vmatpush3.bf16.msra.mxu1 %v3738_v47 }
0x41a9   :  { %3697 = vmatprep.subr.bf16.mxu1 %v4032_v0 }
0x41ac   :  { %3698 = vmatpush3.bf16.msra.mxu1 %v3739_v35 }
0x41ad   :  { %3699 = vmatprep.subr.bf16.mxu1 %v4032_v0 }
0x41b0   :  { %3700 = vmatpush3.bf16.msra.mxu1 %v3740_v59 }
0x4266   :  { %v2959_v22 = vpop.f32.mrb[64].mxu1 }
0x4267   :  { %v2966_v23 = vrot.slane %v2959_v22, 2  ;;  %v3675_v19 = vpop.f32.mrb[65].mxu1 }
0x4268   :  { %v2962_v21 = vpop.f32.mrb[66].mxu1 }
0x4269   :  { %v2968_v25 = vadd.f32 %v2966_v23, %v4689_v51  ;;  %v3676_v2 = vpop.f32.mrb[67].mxu1 }
0x426b   :  { %v3261_v33 = vmul.f32 -1.442695, %v2968_v25 }
0x426d   :  { %3927 = vpow2.f32 %v3261_v33 }
0x4277   :  { %v3928_v30 = vpop.eup %3927 }
0x4278   :  { %v2972_v34 = vadd.f32 1.0, %v3928_v30 }
0x427a   :  { %3929 = vrcp.f32 %v2972_v34 }
0x4284   :  { %v3930_v37 = vpop.eup %3929 }
0x4285   :  { %v2975_v38 = vmul.f32 %v3930_v37, %v4138_v24 }
0x4287   :  { %v2976_v32 = vadd.f32 %v2975_v38, %v4141_v26 }
0x4289   :  { %2982 = vrot.lane.b32.xlu1 %v2976_v32, %s4029_s24  ;;  %v2980_v43 = vmul.f32 %v2978_v42, %v2976_v32 }
0x42fb   :  { %v2983_v39 = vpop.permute.xlu1 %2982 }
0x42fc   :  { %v2985_v40 = vmul.f32 %v2983_v39, %v2976_v32 }
0x42fe   :  { %2987 = vrot.lane.b32.xlu0 %v2985_v40, %s4036_s2 }
0x4370   :  { %v2988_v51 = vpop.permute.xlu0 %2987 }
0x4371   :  { %v2990_v41 = vadd.f32 %v2988_v51, %v2980_v43 }
0x4373   :  { %3931 = vtanh.f32 %v2990_v41 }
0x437d   :  { %v3932_v44 = vpop.eup %3931 }
0x437e   :  { %2993 = vrot.lane.b32.xlu1 %v3932_v44, %s4029_s24 }
0x43f0   :  { %v2994_v24 = vpop.permute.xlu1 %2993 }
0x43f1   :  { %v2996_v26 = vmul.f32 %v2994_v24, %v2976_v32 }
0x43f3   :  { %3000 = vrot.lane.b32.xlu0 %v2996_v26, %s4036_s2 }
0x4465   :  { %v3001_v16 = vpop.permute.xlu0 %3000 }
0x4466   :  { %3003 = vst.msk [vmem:[#allocation3 - $0x4] sm:$0xc0] %vm572_vm9, %v3001_v16 }
0x446d   :  { %v3004_v62 = vld [vmem:[#allocation3] sm:$0xff] }
0x446e   :  { %v3005_v48 = vmax.f32 %v3004_v62, 0.0 }
0x4470   :  { %v3006_v50 = vpack.c.bf16 %v3005_v48, %v3005_v48 }
0x4472   :  { %3682 = vmatmul.mubr.msk.bf16.vlgmr.msra.gmra.mrb[76].mxu0 %vm241_vm5, %v3006_v50 }
0x4545   :  { %v3060_v52 = vpop.f32.mrb[76].mxu0 }
0x4546   :  { %v3061_v45 = vadd.f32 %v3262_v58, %v3060_v52  ;;  %v3683_v54 = vpop.f32.mrb[77].mxu0 }
0x4547   :  { %v3063_v5 = vpop.f32.mrb[78].mxu0 }
0x4548   :  { %v3066_v12 = vmax.f32 %v3061_v45, 0.0  ;;  %v3684_v55 = vpop.f32.mrb[79].mxu0 }
0x454a   :  { %v3067_v56 = vpack.c.bf16 %v3066_v12, %v3066_v12 }
0x454c   :  { %3702 = vmatmul.mubr.bf16.vlgmr.msra.gmra.mrb[68].mxu1 %v3067_v56 }
0x461f   :  { %v3154_v61 = vpop.f32.mrb[68].mxu1 }
0x4620   :  { %v3155_v49 = vadd.f32 %v3266_v57, %v3154_v61  ;;  %v3703_v63 = vpop.f32.mrb[69].mxu1 }
0x4621   :  { %v3157_v1 = vpop.f32.mrb[70].mxu1 }
0x4622   :  { %3160 = vst [vmem:[#allocation10] sm:$0xff] %v3155_v49  ;;  %v3704_v0 = vpop.f32.mrb[71].mxu1 }
0x4623   :  { %4010 = shalt.err (!%p4007_p0)
}
0x4624   :  { %s4011_s26 = scalar_lea.hbm %s4813_s3, 128 }
0x4625   :  { %p4012_p1 = scmp.ne.s32.totalorder %s4813_s3, %s4011_s26  ;;  %p4015_p2 = scmp.lt.u32.totalorder %s4011_s26, %s4813_s3 }
0x4627   :  { %p4017_p3 = pnand %p4015_p2, %p4012_p1 }
0x4629   :  { %4020 = shalt.err (!%p4017_p3)
}
0x462a   :  { %3170 = dma.vmem_to_hbm [thread:$0]  %s3168_s22, 128, %s4813_s3, [#allocation6]  }
0x462b   :  { %4025 = dma.done.wait [#allocation6], 128  }
0x462c   :  { %4026 = vsyncadd [#allocation6], 4294967168 }
0x462d   :  { %3174 = vsyncpa [#allocation5], 1 }
0x462e   :  { %3175 = vsyncpa [#allocation8], 1 }
0x462f   :  { %3176 = vsyncpa [#allocation6], 1 }

</bundles_post_ra>
